<compile_context>
chip_gen: v5e
topology: v5e:2x2
jax: 0.10.0
libtpu: 0.0.40
codegen_flags: <defaults>
</compile_context>

<pallas_src>
import functools
import math

import jax
import jax.numpy as jnp
from jax import lax
from jax.experimental import pallas as pl
from jax.experimental.pallas import tpu as pltpu


# ----------------------------------------------------------------------------
# In-kernel math helpers (f32 statistics)
# ----------------------------------------------------------------------------
def _layernorm(x, scale, shift, eps=1e-8):
    # Matches torch reference: mean / var(unbiased=False) over last dim, eps=1e-8.
    mean = jnp.mean(x, axis=-1, keepdims=True)
    var = jnp.mean((x - mean) ** 2, axis=-1, keepdims=True)
    norm = (x - mean) * lax.rsqrt(var + eps)          # rsqrt -> EUP slot
    return scale * norm + shift


def _gelu(x):
    # Verbatim reproduction of the reference GELU grouping:
    #   0.5 * x * (1 + tanh(sqrt(2/pi) * (x + 0.044715) * x**3))
    c = jnp.float32(math.sqrt(2.0 / math.pi))
    return 0.5 * x * (1.0 + jnp.tanh(c * (x + 0.044715) * (x ** 3)))


# ----------------------------------------------------------------------------
# Fused transformer stack kernel: grid=(n_layers,), residual in VMEM scratch
# ----------------------------------------------------------------------------
def fused_blocks_kernel(
    tok_ref,                   # (M, D)   f32   (token embeddings, M = B*S)
    pos_ref,                   # (S, D)   f32   (position embeddings)
    ln1s_ref, ln1b_ref,        # (1, 1, D) f32 each
    wqkv_ref,                  # (1, D, 3D) bf16   fused Wq|Wk|Wv
    wo_ref, bo_ref,            # (1, D, D) bf16, (1, 1, D) f32
    ln2s_ref, ln2b_ref,        # (1, 1, D) f32 each
    w1_ref, b1_ref,            # (1, D, 4D) bf16, (1, 1, 4D) f32
    w2_ref, b2_ref,            # (1, 4D, D) bf16, (1, 1, D) f32
    lnfs_ref, lnfb_ref,        # (1, D) f32 each   (final LayerNorm)
    xn_out_ref,                # (M, D)   bf16   final-LN-normalized activations
    resid_ref,                 # (M, D)   f32    VMEM scratch (persists over l)
    *, num_heads: int, batch: int,
):
    l = pl.program_id(0)

    # Fold tok + pos embedding add into the first layer step (drop_emb = identity).
    @pl.when(l == 0)
    def _():
        resid_ref[...] = tok_ref[...] + jnp.tile(pos_ref[...], (batch, 1))

    x = resid_ref[...]                                 # (M, D) f32 residual
    M, D = x.shape
    H = num_heads
    hd = D // H
    S = M // batch
    scale = jnp.float32(1.0 / math.sqrt(hd))

    # ---- attention branch ---------------------------------------------------
    xn = _layernorm(x, ln1s_ref[0], ln1b_ref[0]).astype(jnp.bfloat16)
    qkv = jnp.dot(xn, wqkv_ref[0], preferred_element_type=jnp.float32)
    qkv = qkv.astype(jnp.bfloat16)                     # (M, 3D)

    def split_heads(t):                                # (M, hd*H slice) -> (B*H, S, hd)
        t4 = t.reshape(batch, S, H, hd)                # pure reshape
        return jnp.swapaxes(t4, 1, 2).reshape(batch * H, S, hd)

    qh = split_heads(qkv[:, 0 * D:1 * D])
    kh = split_heads(qkv[:, 1 * D:2 * D])
    vh = split_heads(qkv[:, 2 * D:3 * D])

    # Head-batched score / softmax / context (f32 statistics).
    sc = jnp.einsum("nqd,nkd->nqk", qh, kh,
                    preferred_element_type=jnp.float32) * scale       # (B*H, S, S)
    row = lax.broadcasted_iota(jnp.int32, (S, S), 0)
    col = lax.broadcasted_iota(jnp.int32, (S, S), 1)
    sc = jnp.where((col > row)[None, :, :], jnp.float32(-1e30), sc)   # causal mask
    sc = sc - jnp.max(sc, axis=-1, keepdims=True)
    p = jnp.exp(sc)
    p = p / jnp.sum(p, axis=-1, keepdims=True)         # exact softmax normalization

    ctx = jnp.einsum("nqk,nkd->nqd", p.astype(jnp.bfloat16), vh,
                     preferred_element_type=jnp.float32)              # (B*H, S, hd)
    ctx = jnp.swapaxes(ctx.reshape(batch, H, S, hd), 1, 2).reshape(M, D)
    ctx = ctx.astype(jnp.bfloat16)

    att = jnp.dot(ctx, wo_ref[0], preferred_element_type=jnp.float32) + bo_ref[0]
    x = x + att                                        # dropout_shortcut = identity

    # ---- feed-forward branch ------------------------------------------------
    xn2 = _layernorm(x, ln2s_ref[0], ln2b_ref[0]).astype(jnp.bfloat16)
    h1 = jnp.dot(xn2, w1_ref[0], preferred_element_type=jnp.float32) + b1_ref[0]
    h1 = _gelu(h1).astype(jnp.bfloat16)
    ff = jnp.dot(h1, w2_ref[0], preferred_element_type=jnp.float32) + b2_ref[0]
    x = x + ff                                         # dropout_shortcut = identity

    resid_ref[...] = x                                 # carry residual to layer l+1

    # Final LayerNorm hoisted out of the vocab-tiled head; emit once at l==L-1.
    @pl.when(l == pl.num_programs(0) - 1)
    def _():
        xn_out_ref[...] = _layernorm(
            x, lnfs_ref[...], lnfb_ref[...]).astype(xn_out_ref.dtype)


# ----------------------------------------------------------------------------
# Vocab-tiled output head: pure matmul on pre-normalized activations
# ----------------------------------------------------------------------------
def lm_head_kernel(xn_ref, wout_ref, o_ref):
    o_ref[...] = jnp.dot(xn_ref[...], wout_ref[...],
                         preferred_element_type=jnp.float32)


# ----------------------------------------------------------------------------
# VMEM budgeting
# ----------------------------------------------------------------------------
def _vmem_capacity_bytes():
    try:
        cap = getattr(pltpu.get_tpu_info(), "vmem_capacity_bytes", None)
        if cap:
            return int(cap)
    except Exception:
        pass
    return 64 << 20        # conservative fallback (v7x per-TC size)


def _vmem_limit(need_bytes):
    ceiling = (_vmem_capacity_bytes() * 85) // 100
    floor = min(32 << 20, ceiling)
    return int(max(min(int(need_bytes), ceiling), floor))


# ----------------------------------------------------------------------------
# Wrappers around pallas_call
# ----------------------------------------------------------------------------
def run_gpt_blocks(tok_flat, pos, p, *, num_heads, batch):
    M, D = tok_flat.shape
    S = pos.shape[0]
    L = p["wqkv"].shape[0]
    H = num_heads

    layer_stacked = (p["ln1_scale"], p["ln1_shift"], p["wqkv"], p["wo"], p["bo"],
                     p["ln2_scale"], p["ln2_shift"], p["w1"], p["b1"], p["w2"], p["b2"])
    per_layer_bytes = sum(int(a.size) * a.dtype.itemsize for a in layer_stacked) // L
    const_bytes = (M * D * 4 + S * D * 4 + 2 * D * 4 + M * D * 2)
    inter_bytes = 4 * (M * 3 * D + 2 * batch * H * S * S + M * 4 * D + 6 * M * D)
    need = 2 * per_layer_bytes + 2 * const_bytes + M * D * 4 + inter_bytes + (8 << 20)

    def lidx(l):      # per-layer stacked weights: prefetch layer l+1 while l computes
        return (l, 0, 0)

    def cidx(l):      # constant-index blocks (resident across the whole grid)
        return (0, 0)

    return pl.pallas_call(
        functools.partial(fused_blocks_kernel, num_heads=num_heads, batch=batch),
        out_shape=jax.ShapeDtypeStruct((M, D), jnp.bfloat16),
        grid=(L,),
        in_specs=[
            pl.BlockSpec((M, D), cidx),            # tok embeddings
            pl.BlockSpec((S, D), cidx),            # pos embeddings
            pl.BlockSpec((1, 1, D), lidx),         # ln1 scale
            pl.BlockSpec((1, 1, D), lidx),         # ln1 shift
            pl.BlockSpec((1, D, 3 * D), lidx),     # fused Wqkv
            pl.BlockSpec((1, D, D), lidx),         # Wo
            pl.BlockSpec((1, 1, D), lidx),         # out-proj bias
            pl.BlockSpec((1, 1, D), lidx),         # ln2 scale
            pl.BlockSpec((1, 1, D), lidx),         # ln2 shift
            pl.BlockSpec((1, D, 4 * D), lidx),     # FF W1
            pl.BlockSpec((1, 1, 4 * D), lidx),     # FF b1
            pl.BlockSpec((1, 4 * D, D), lidx),     # FF W2
            pl.BlockSpec((1, 1, D), lidx),         # FF b2
            pl.BlockSpec((1, D), cidx),            # final LN scale
            pl.BlockSpec((1, D), cidx),            # final LN shift
        ],
        out_specs=pl.BlockSpec((M, D), cidx),
        scratch_shapes=[pltpu.VMEM((M, D), jnp.float32)],   # f32 residual stream
        compiler_params=pltpu.CompilerParams(
            dimension_semantics=("arbitrary",),
            vmem_limit_bytes=_vmem_limit(need),
        ),
    )(tok_flat, pos,
      p["ln1_scale"], p["ln1_shift"], p["wqkv"], p["wo"], p["bo"],
      p["ln2_scale"], p["ln2_shift"], p["w1"], p["b1"], p["w2"], p["b2"],
      p["lnf_scale"], p["lnf_shift"])


def run_lm_head(xn, wout, *, tn=512):
    M, D = xn.shape
    V = wout.shape[1]
    tn = min(tn, V)
    assert V % tn == 0, "vocab size must be a multiple of the vocab tile"
    n_tiles = V // tn

    need = 2 * (M * D * 2 + D * tn * 2 + M * tn * 4) + 4 * M * tn + (4 << 20)
    return pl.pallas_call(
        lm_head_kernel,
        out_shape=jax.ShapeDtypeStruct((M, V), jnp.float32),
        grid=(n_tiles,),
        in_specs=[
            pl.BlockSpec((M, D), lambda n: (0, 0)),
            pl.BlockSpec((D, tn), lambda n: (0, n)),
        ],
        out_specs=pl.BlockSpec((M, tn), lambda n: (0, n)),
        compiler_params=pltpu.CompilerParams(
            dimension_semantics=("parallel",),
            vmem_limit_bytes=_vmem_limit(need),
        ),
    )(xn, wout)


def gpt_forward(input_ids, params, cfg):
    B, S = input_ids.shape
    D = cfg["emb_dim"]
    # Embedding gather stays in plain JAX; the tok+pos add happens inside the
    # fused kernel at grid step 0.
    tok_flat = jnp.take(params["tok_emb"], input_ids, axis=0).reshape(B * S, D)
    pos = params["pos_emb"][:S]

    xn = run_gpt_blocks(tok_flat, pos, params, num_heads=cfg["n_heads"], batch=B)
    logits = run_lm_head(xn, params["w_out"])
    return logits.reshape(B, S, -1)


# ----------------------------------------------------------------------------
# Deterministic synthetic parameter initialization (layer-stacked weights)
# ----------------------------------------------------------------------------
def init_params(key, cfg):
    D = cfg["emb_dim"]
    V = cfg["vocab_size"]
    C = cfg["context_length"]
    L = cfg["n_layers"]
    H4 = 4 * D
    std = 0.02

    keys = jax.random.split(key, 7)

    def nrm(k, shape, dtype=jnp.bfloat16):
        return (std * jax.random.normal(k, shape, jnp.float32)).astype(dtype)

    return {
        "tok_emb": nrm(keys[0], (V, D), jnp.float32),
        "pos_emb": nrm(keys[1], (C, D), jnp.float32),
        "ln1_scale": jnp.ones((L, 1, D), jnp.float32),
        "ln1_shift": jnp.zeros((L, 1, D), jnp.float32),
        "wqkv": nrm(keys[2], (L, D, 3 * D)),            # fused Wq|Wk|Wv (bf16)
        "wo": nrm(keys[3], (L, D, D)),                  # out-proj weight (bf16)
        "bo": jnp.zeros((L, 1, D), jnp.float32),        # out-proj bias
        "ln2_scale": jnp.ones((L, 1, D), jnp.float32),
        "ln2_shift": jnp.zeros((L, 1, D), jnp.float32),
        "w1": nrm(keys[4], (L, D, H4)),                 # FF W1 (bf16)
        "b1": jnp.zeros((L, 1, H4), jnp.float32),
        "w2": nrm(keys[5], (L, H4, D)),                 # FF W2 (bf16)
        "b2": jnp.zeros((L, 1, D), jnp.float32),
        "lnf_scale": jnp.ones((1, D), jnp.float32),
        "lnf_shift": jnp.zeros((1, D), jnp.float32),
        "w_out": nrm(keys[6], (D, V)),                  # output head (bf16, no bias)
    }


# ----------------------------------------------------------------------------
if __name__ == "__main__":
    # Small config consistent with the reference GPT structure.
    cfg = {
        "vocab_size": 512,
        "context_length": 8,
        "emb_dim": 128,
        "n_heads": 4,
        "n_layers": 2,
        "drop_rate": 0.1,
        "qkv_bias": False,
    }

    key = jax.random.PRNGKey(0)
    k_params, k_ids = jax.random.split(key)
    params = init_params(k_params, cfg)

    batch = 2
    input_ids = jax.random.randint(
        k_ids, (batch, cfg["context_length"]), 0, cfg["vocab_size"], dtype=jnp.int32
    )

    logits = gpt_forward(input_ids, params, cfg)
    logits = jax.block_until_ready(logits)

    assert logits.shape == (batch, cfg["context_length"], cfg["vocab_size"])
    assert logits.dtype == jnp.float32
    assert bool(jnp.isfinite(logits).all())
    print("KERNEL_OK")
</pallas_src>

<mosaic_0001>
module attributes {stable_mosaic.version = 11 : i64} {
  func.func @fused_blocks_kernel(%arg0: i32, %arg1: memref<16x128xf32, #tpu.memory_space<vmem>>, %arg2: memref<8x128xf32, #tpu.memory_space<vmem>>, %arg3: memref<1x1x128xf32, #tpu.memory_space<vmem>>, %arg4: memref<1x1x128xf32, #tpu.memory_space<vmem>>, %arg5: memref<1x128x384xbf16, #tpu.memory_space<vmem>>, %arg6: memref<1x128x128xbf16, #tpu.memory_space<vmem>>, %arg7: memref<1x1x128xf32, #tpu.memory_space<vmem>>, %arg8: memref<1x1x128xf32, #tpu.memory_space<vmem>>, %arg9: memref<1x1x128xf32, #tpu.memory_space<vmem>>, %arg10: memref<1x128x512xbf16, #tpu.memory_space<vmem>>, %arg11: memref<1x1x512xf32, #tpu.memory_space<vmem>>, %arg12: memref<1x512x128xbf16, #tpu.memory_space<vmem>>, %arg13: memref<1x1x128xf32, #tpu.memory_space<vmem>>, %arg14: memref<1x128xf32, #tpu.memory_space<vmem>>, %arg15: memref<1x128xf32, #tpu.memory_space<vmem>>, %arg16: memref<16x128xbf16, #tpu.memory_space<vmem>>, %arg17: memref<16x128xf32, #tpu.memory_space<vmem>>) attributes {dimension_semantics = [#tpu.dimension_semantics<arbitrary>], iteration_bounds = array<i64: 2>, scalar_prefetch = 0 : i64, scratch_operands = 1 : i64, tpu.core_type = #tpu.core_type<tc>, window_params = [{pipeline_mode = #tpu.pipeline_mode<synchronous>, transform_indices = @transform_0, window_bounds = array<i64: 16, 128>}, {pipeline_mode = #tpu.pipeline_mode<synchronous>, transform_indices = @transform_1, window_bounds = array<i64: 8, 128>}, {transform_indices = @transform_2, window_bounds = array<i64: 1, 1, 128>}, {transform_indices = @transform_3, window_bounds = array<i64: 1, 1, 128>}, {transform_indices = @transform_4, window_bounds = array<i64: 1, 128, 384>}, {transform_indices = @transform_5, window_bounds = array<i64: 1, 128, 128>}, {transform_indices = @transform_6, window_bounds = array<i64: 1, 1, 128>}, {transform_indices = @transform_7, window_bounds = array<i64: 1, 1, 128>}, {transform_indices = @transform_8, window_bounds = array<i64: 1, 1, 128>}, {transform_indices = @transform_9, window_bounds = array<i64: 1, 128, 512>}, {transform_indices = @transform_10, window_bounds = array<i64: 1, 1, 512>}, {transform_indices = @transform_11, window_bounds = array<i64: 1, 512, 128>}, {transform_indices = @transform_12, window_bounds = array<i64: 1, 1, 128>}, {pipeline_mode = #tpu.pipeline_mode<synchronous>, transform_indices = @transform_13, window_bounds = array<i64: 1, 128>}, {pipeline_mode = #tpu.pipeline_mode<synchronous>, transform_indices = @transform_14, window_bounds = array<i64: 1, 128>}, {pipeline_mode = #tpu.pipeline_mode<synchronous>, transform_indices = @transform_15, window_bounds = array<i64: 16, 128>}]} {
    %c0_i32 = arith.constant 0 : i32
    %0 = arith.cmpi eq, %arg0, %c0_i32 : i32
    %1 = arith.extui %0 : i1 to i32
    %c0_i32_0 = arith.constant 0 : i32
    %2 = arith.cmpi ne, %1, %c0_i32_0 : i32
    scf.if %2 {
      %c0_61 = arith.constant 0 : index
      %c0_62 = arith.constant 0 : index
      %141 = vector.load %arg1[%c0_61, %c0_62] : memref<16x128xf32, #tpu.memory_space<vmem>>, vector<16x128xf32>
      %c0_63 = arith.constant 0 : index
      %c0_64 = arith.constant 0 : index
      %142 = vector.load %arg2[%c0_63, %c0_64] : memref<8x128xf32, #tpu.memory_space<vmem>>, vector<8x128xf32>
      %143 = tpu.concatenate %142, %142 in 0 : vector<8x128xf32>, vector<8x128xf32> -> vector<16x128xf32>
      %144 = arith.addf %141, %143 : vector<16x128xf32>
      %c0_65 = arith.constant 0 : index
      %c0_66 = arith.constant 0 : index
      %145 = vector.load %arg17[%c0_65, %c0_66] : memref<16x128xf32, #tpu.memory_space<vmem>>, vector<16x128xf32>
      tpu.vector_store %arg17[%c0_65, %c0_66], %144 {strides = array<i32>} : memref<16x128xf32, #tpu.memory_space<vmem>>, vector<16x128xf32>,
    } else {
    }
    %c0 = arith.constant 0 : index
    %c0_1 = arith.constant 0 : index
    %3 = vector.load %arg17[%c0, %c0_1] : memref<16x128xf32, #tpu.memory_space<vmem>>, vector<16x128xf32>
    %c0_2 = arith.constant 0 : index
    %c0_3 = arith.constant 0 : index
    %c0_4 = arith.constant 0 : index
    %4 = vector.load %arg3[%c0_2, %c0_3, %c0_4] : memref<1x1x128xf32, #tpu.memory_space<vmem>>, vector<1x1x128xf32>
    %5 = vector.shape_cast %4 : vector<1x1x128xf32> to vector<1x128xf32>
    %c0_5 = arith.constant 0 : index
    %c0_6 = arith.constant 0 : index
    %c0_7 = arith.constant 0 : index
    %6 = vector.load %arg4[%c0_5, %c0_6, %c0_7] : memref<1x1x128xf32, #tpu.memory_space<vmem>>, vector<1x1x128xf32>
    %7 = vector.shape_cast %6 : vector<1x1x128xf32> to vector<1x128xf32>
    %cst = arith.constant dense<0.000000e+00> : vector<16xf32>
    %8 = vector.multi_reduction <add>, %3, %cst [1] : vector<16x128xf32> to vector<16xf32>
    %9 = vector.shape_cast %8 : vector<16xf32> to vector<16x1xf32>
    %cst_8 = arith.constant 1.280000e+02 : f32
    %10 = vector.broadcast %cst_8 : f32 to vector<16x1xf32>
    %11 = arith.divf %9, %10 : vector<16x1xf32>
    %12 = vector.broadcast %11 : vector<16x1xf32> to vector<16x128xf32>
    %13 = arith.subf %3, %12 : vector<16x128xf32>
    %14 = arith.mulf %13, %13 : vector<16x128xf32>
    %cst_9 = arith.constant dense<0.000000e+00> : vector<16xf32>
    %15 = vector.multi_reduction <add>, %14, %cst_9 [1] : vector<16x128xf32> to vector<16xf32>
    %16 = vector.shape_cast %15 : vector<16xf32> to vector<16x1xf32>
    %cst_10 = arith.constant 1.280000e+02 : f32
    %17 = vector.broadcast %cst_10 : f32 to vector<16x1xf32>
    %18 = arith.divf %16, %17 : vector<16x1xf32>
    %19 = vector.broadcast %11 : vector<16x1xf32> to vector<16x128xf32>
    %20 = arith.subf %3, %19 : vector<16x128xf32>
    %cst_11 = arith.constant 9.99999993E-9 : f32
    %21 = vector.broadcast %cst_11 : f32 to vector<16x1xf32>
    %22 = arith.addf %18, %21 : vector<16x1xf32>
    %23 = math.rsqrt %22 : vector<16x1xf32>
    %24 = vector.broadcast %23 : vector<16x1xf32> to vector<16x128xf32>
    %25 = arith.mulf %20, %24 : vector<16x128xf32>
    %26 = vector.broadcast %5 : vector<1x128xf32> to vector<16x128xf32>
    %27 = arith.mulf %26, %25 : vector<16x128xf32>
    %28 = vector.broadcast %7 : vector<1x128xf32> to vector<16x128xf32>
    %29 = arith.addf %27, %28 : vector<16x128xf32>
    %30 = arith.truncf %29 : vector<16x128xf32> to vector<16x128xbf16>
    %c0_12 = arith.constant 0 : index
    %c0_13 = arith.constant 0 : index
    %c0_14 = arith.constant 0 : index
    %31 = vector.load %arg5[%c0_12, %c0_13, %c0_14] : memref<1x128x384xbf16, #tpu.memory_space<vmem>>, vector<1x128x384xbf16>
    %32 = vector.shape_cast %31 : vector<1x128x384xbf16> to vector<128x384xbf16>
    %cst_15 = arith.constant dense<0.000000e+00> : vector<16x384xf32>
    %33 = tpu.matmul %30, %32, %cst_15 {dimension_numbers = #tpu.dot_dimension_numbers<[1], [0], [0], [1], [0, 0, 1, 1], [], []>} : vector<16x128xbf16>, vector<128x384xbf16>, vector<16x384xf32> -> vector<16x384xf32>
    %34 = arith.truncf %33 : vector<16x384xf32> to vector<16x384xbf16>
    %35 = vector.extract_strided_slice %34 {offsets = [0, 0], sizes = [16, 128], strides = [1, 1]} : vector<16x384xbf16> to vector<16x128xbf16>
    %36 = vector.shape_cast %35 : vector<16x128xbf16> to vector<2x8x4x32xbf16>
    %37 = tpu.transpose %36, [0, 2, 1, 3] : vector<2x8x4x32xbf16> -> vector<2x4x8x32xbf16>
    %38 = vector.shape_cast %37 : vector<2x4x8x32xbf16> to vector<8x8x32xbf16>
    %39 = vector.extract_strided_slice %34 {offsets = [0, 128], sizes = [16, 128], strides = [1, 1]} : vector<16x384xbf16> to vector<16x128xbf16>
    %40 = vector.shape_cast %39 : vector<16x128xbf16> to vector<2x8x4x32xbf16>
    %41 = tpu.transpose %40, [0, 2, 1, 3] : vector<2x8x4x32xbf16> -> vector<2x4x8x32xbf16>
    %42 = vector.shape_cast %41 : vector<2x4x8x32xbf16> to vector<8x8x32xbf16>
    %43 = vector.extract_strided_slice %34 {offsets = [0, 256], sizes = [16, 128], strides = [1, 1]} : vector<16x384xbf16> to vector<16x128xbf16>
    %44 = vector.shape_cast %43 : vector<16x128xbf16> to vector<2x8x4x32xbf16>
    %45 = tpu.transpose %44, [0, 2, 1, 3] : vector<2x8x4x32xbf16> -> vector<2x4x8x32xbf16>
    %46 = vector.shape_cast %45 : vector<2x4x8x32xbf16> to vector<8x8x32xbf16>
    "tpu.trace_start"() <{level = 10 : i32, message = "nqd,nkd->nqk"}> : () -> ()
    %cst_16 = arith.constant dense<0.000000e+00> : vector<8x8x8xf32>
    %47 = tpu.matmul %38, %42, %cst_16 {dimension_numbers = #tpu.dot_dimension_numbers<[2], [2], [1], [1], [0, 0, 0, 1, 1, 1], [0], [0]>} : vector<8x8x32xbf16>, vector<8x8x32xbf16>, vector<8x8x8xf32> -> vector<8x8x8xf32>
    "tpu.trace_stop"() : () -> ()
    %cst_17 = arith.constant 0.176776692 : f32
    %48 = vector.broadcast %cst_17 : f32 to vector<8x8x8xf32>
    %49 = arith.mulf %47, %48 : vector<8x8x8xf32>
    %50 = tpu.iota {dimensions = array<i32: 0>} : vector<8x8xi32>
    %51 = tpu.iota {dimensions = array<i32: 1>} : vector<8x8xi32>
    %52 = arith.cmpi sgt, %51, %50 : vector<8x8xi32>
    %53 = vector.shape_cast %52 : vector<8x8xi1> to vector<1x8x8xi1>
    %cst_18 = arith.constant -1.000000e+30 : f32
    %54 = vector.shape_cast %53 : vector<1x8x8xi1> to vector<1x8x8xi1>
    %55 = vector.broadcast %54 : vector<1x8x8xi1> to vector<8x8x8xi1>
    %56 = vector.broadcast %cst_18 : f32 to vector<8x8x8xf32>
    %57 = arith.select %55, %56, %49 : vector<8x8x8xi1>, vector<8x8x8xf32>
    %cst_19 = arith.constant dense<0xFF800000> : vector<8x8xf32>
    %58 = vector.multi_reduction <maximumf>, %57, %cst_19 [2] : vector<8x8x8xf32> to vector<8x8xf32>
    %59 = vector.shape_cast %58 : vector<8x8xf32> to vector<8x8x1xf32>
    %60 = vector.broadcast %59 : vector<8x8x1xf32> to vector<8x8x8xf32>
    %61 = arith.subf %57, %60 : vector<8x8x8xf32>
    %62 = math.exp %61 : vector<8x8x8xf32>
    %cst_20 = arith.constant dense<0.000000e+00> : vector<8x8xf32>
    %63 = vector.multi_reduction <add>, %62, %cst_20 [2] : vector<8x8x8xf32> to vector<8x8xf32>
    %64 = vector.shape_cast %63 : vector<8x8xf32> to vector<8x8x1xf32>
    %65 = vector.broadcast %64 : vector<8x8x1xf32> to vector<8x8x8xf32>
    %66 = arith.divf %62, %65 : vector<8x8x8xf32>
    %67 = arith.truncf %66 : vector<8x8x8xf32> to vector<8x8x8xbf16>
    "tpu.trace_start"() <{level = 10 : i32, message = "nqk,nkd->nqd"}> : () -> ()
    %cst_21 = arith.constant dense<0.000000e+00> : vector<8x8x32xf32>
    %68 = tpu.matmul %67, %46, %cst_21 {dimension_numbers = #tpu.dot_dimension_numbers<[2], [1], [1], [2], [0, 0, 0, 1, 1, 2], [0], [0]>} : vector<8x8x8xbf16>, vector<8x8x32xbf16>, vector<8x8x32xf32> -> vector<8x8x32xf32>
    "tpu.trace_stop"() : () -> ()
    %69 = vector.shape_cast %68 : vector<8x8x32xf32> to vector<2x4x8x32xf32>
    %70 = tpu.transpose %69, [0, 2, 1, 3] : vector<2x4x8x32xf32> -> vector<2x8x4x32xf32>
    %71 = vector.shape_cast %70 : vector<2x8x4x32xf32> to vector<16x128xf32>
    %72 = arith.truncf %71 : vector<16x128xf32> to vector<16x128xbf16>
    %c0_22 = arith.constant 0 : index
    %c0_23 = arith.constant 0 : index
    %c0_24 = arith.constant 0 : index
    %73 = vector.load %arg6[%c0_22, %c0_23, %c0_24] : memref<1x128x128xbf16, #tpu.memory_space<vmem>>, vector<1x128x128xbf16>
    %74 = vector.shape_cast %73 : vector<1x128x128xbf16> to vector<128x128xbf16>
    %cst_25 = arith.constant dense<0.000000e+00> : vector<16x128xf32>
    %75 = tpu.matmul %72, %74, %cst_25 {dimension_numbers = #tpu.dot_dimension_numbers<[1], [0], [0], [1], [0, 0, 1, 1], [], []>} : vector<16x128xbf16>, vector<128x128xbf16>, vector<16x128xf32> -> vector<16x128xf32>
    %c0_26 = arith.constant 0 : index
    %c0_27 = arith.constant 0 : index
    %c0_28 = arith.constant 0 : index
    %76 = vector.load %arg7[%c0_26, %c0_27, %c0_28] : memref<1x1x128xf32, #tpu.memory_space<vmem>>, vector<1x1x128xf32>
    %77 = vector.shape_cast %76 : vector<1x1x128xf32> to vector<1x128xf32>
    %78 = vector.broadcast %77 : vector<1x128xf32> to vector<16x128xf32>
    %79 = arith.addf %75, %78 : vector<16x128xf32>
    %80 = arith.addf %3, %79 : vector<16x128xf32>
    %c0_29 = arith.constant 0 : index
    %c0_30 = arith.constant 0 : index
    %c0_31 = arith.constant 0 : index
    %81 = vector.load %arg8[%c0_29, %c0_30, %c0_31] : memref<1x1x128xf32, #tpu.memory_space<vmem>>, vector<1x1x128xf32>
    %82 = vector.shape_cast %81 : vector<1x1x128xf32> to vector<1x128xf32>
    %c0_32 = arith.constant 0 : index
    %c0_33 = arith.constant 0 : index
    %c0_34 = arith.constant 0 : index
    %83 = vector.load %arg9[%c0_32, %c0_33, %c0_34] : memref<1x1x128xf32, #tpu.memory_space<vmem>>, vector<1x1x128xf32>
    %84 = vector.shape_cast %83 : vector<1x1x128xf32> to vector<1x128xf32>
    %cst_35 = arith.constant dense<0.000000e+00> : vector<16xf32>
    %85 = vector.multi_reduction <add>, %80, %cst_35 [1] : vector<16x128xf32> to vector<16xf32>
    %86 = vector.shape_cast %85 : vector<16xf32> to vector<16x1xf32>
    %cst_36 = arith.constant 1.280000e+02 : f32
    %87 = vector.broadcast %cst_36 : f32 to vector<16x1xf32>
    %88 = arith.divf %86, %87 : vector<16x1xf32>
    %89 = vector.broadcast %88 : vector<16x1xf32> to vector<16x128xf32>
    %90 = arith.subf %80, %89 : vector<16x128xf32>
    %91 = arith.mulf %90, %90 : vector<16x128xf32>
    %cst_37 = arith.constant dense<0.000000e+00> : vector<16xf32>
    %92 = vector.multi_reduction <add>, %91, %cst_37 [1] : vector<16x128xf32> to vector<16xf32>
    %93 = vector.shape_cast %92 : vector<16xf32> to vector<16x1xf32>
    %cst_38 = arith.constant 1.280000e+02 : f32
    %94 = vector.broadcast %cst_38 : f32 to vector<16x1xf32>
    %95 = arith.divf %93, %94 : vector<16x1xf32>
    %96 = vector.broadcast %88 : vector<16x1xf32> to vector<16x128xf32>
    %97 = arith.subf %80, %96 : vector<16x128xf32>
    %cst_39 = arith.constant 9.99999993E-9 : f32
    %98 = vector.broadcast %cst_39 : f32 to vector<16x1xf32>
    %99 = arith.addf %95, %98 : vector<16x1xf32>
    %100 = math.rsqrt %99 : vector<16x1xf32>
    %101 = vector.broadcast %100 : vector<16x1xf32> to vector<16x128xf32>
    %102 = arith.mulf %97, %101 : vector<16x128xf32>
    %103 = vector.broadcast %82 : vector<1x128xf32> to vector<16x128xf32>
    %104 = arith.mulf %103, %102 : vector<16x128xf32>
    %105 = vector.broadcast %84 : vector<1x128xf32> to vector<16x128xf32>
    %106 = arith.addf %104, %105 : vector<16x128xf32>
    %107 = arith.truncf %106 : vector<16x128xf32> to vector<16x128xbf16>
    %c0_40 = arith.constant 0 : index
    %c0_41 = arith.constant 0 : index
    %c0_42 = arith.constant 0 : index
    %108 = vector.load %arg10[%c0_40, %c0_41, %c0_42] : memref<1x128x512xbf16, #tpu.memory_space<vmem>>, vector<1x128x512xbf16>
    %109 = vector.shape_cast %108 : vector<1x128x512xbf16> to vector<128x512xbf16>
    %cst_43 = arith.constant dense<0.000000e+00> : vector<16x512xf32>
    %110 = tpu.matmul %107, %109, %cst_43 {dimension_numbers = #tpu.dot_dimension_numbers<[1], [0], [0], [1], [0, 0, 1, 1], [], []>} : vector<16x128xbf16>, vector<128x512xbf16>, vector<16x512xf32> -> vector<16x512xf32>
    %c0_44 = arith.constant 0 : index
    %c0_45 = arith.constant 0 : index
    %c0_46 = arith.constant 0 : index
    %111 = vector.load %arg11[%c0_44, %c0_45, %c0_46] : memref<1x1x512xf32, #tpu.memory_space<vmem>>, vector<1x1x512xf32>
    %112 = vector.shape_cast %111 : vector<1x1x512xf32> to vector<1x512xf32>
    %113 = vector.broadcast %112 : vector<1x512xf32> to vector<16x512xf32>
    %114 = arith.addf %110, %113 : vector<16x512xf32>
    %cst_47 = arith.constant 5.000000e-01 : f32
    %115 = vector.broadcast %cst_47 : f32 to vector<16x512xf32>
    %116 = arith.mulf %115, %114 : vector<16x512xf32>
    %cst_48 = arith.constant 4.471500e-02 : f32
    %117 = vector.broadcast %cst_48 : f32 to vector<16x512xf32>
    %118 = arith.addf %114, %117 : vector<16x512xf32>
    %cst_49 = arith.constant 0.797884583 : f32
    %119 = vector.broadcast %cst_49 : f32 to vector<16x512xf32>
    %120 = arith.mulf %119, %118 : vector<16x512xf32>
    %121 = arith.mulf %114, %114 : vector<16x512xf32>
    %122 = arith.mulf %114, %121 : vector<16x512xf32>
    %123 = arith.mulf %120, %122 : vector<16x512xf32>
    %124 = math.tanh %123 : vector<16x512xf32>
    %cst_50 = arith.constant 1.000000e+00 : f32
    %125 = vector.broadcast %cst_50 : f32 to vector<16x512xf32>
    %126 = arith.addf %125, %124 : vector<16x512xf32>
    %127 = arith.mulf %116, %126 : vector<16x512xf32>
    %128 = arith.truncf %127 : vector<16x512xf32> to vector<16x512xbf16>
    %c0_51 = arith.constant 0 : index
    %c0_52 = arith.constant 0 : index
    %c0_53 = arith.constant 0 : index
    %129 = vector.load %arg12[%c0_51, %c0_52, %c0_53] : memref<1x512x128xbf16, #tpu.memory_space<vmem>>, vector<1x512x128xbf16>
    %130 = vector.shape_cast %129 : vector<1x512x128xbf16> to vector<512x128xbf16>
    %cst_54 = arith.constant dense<0.000000e+00> : vector<16x128xf32>
    %131 = tpu.matmul %128, %130, %cst_54 {dimension_numbers = #tpu.dot_dimension_numbers<[1], [0], [0], [1], [0, 0, 1, 1], [], []>} : vector<16x512xbf16>, vector<512x128xbf16>, vector<16x128xf32> -> vector<16x128xf32>
    %c0_55 = arith.constant 0 : index
    %c0_56 = arith.constant 0 : index
    %c0_57 = arith.constant 0 : index
    %132 = vector.load %arg13[%c0_55, %c0_56, %c0_57] : memref<1x1x128xf32, #tpu.memory_space<vmem>>, vector<1x1x128xf32>
    %133 = vector.shape_cast %132 : vector<1x1x128xf32> to vector<1x128xf32>
    %134 = vector.broadcast %133 : vector<1x128xf32> to vector<16x128xf32>
    %135 = arith.addf %131, %134 : vector<16x128xf32>
    %136 = arith.addf %80, %135 : vector<16x128xf32>
    %c0_58 = arith.constant 0 : index
    %c0_59 = arith.constant 0 : index
    %137 = vector.load %arg17[%c0_58, %c0_59] : memref<16x128xf32, #tpu.memory_space<vmem>>, vector<16x128xf32>
    tpu.vector_store %arg17[%c0_58, %c0_59], %136 {strides = array<i32>} : memref<16x128xf32, #tpu.memory_space<vmem>>, vector<16x128xf32>,
    %c1_i32 = arith.constant 1 : i32
    %138 = arith.cmpi eq, %arg0, %c1_i32 : i32
    %139 = arith.extui %138 : i1 to i32
    %c0_i32_60 = arith.constant 0 : i32
    %140 = arith.cmpi ne, %139, %c0_i32_60 : i32
    scf.if %140 {
      %c0_61 = arith.constant 0 : index
      %c0_62 = arith.constant 0 : index
      %141 = vector.load %arg14[%c0_61, %c0_62] : memref<1x128xf32, #tpu.memory_space<vmem>>, vector<1x128xf32>
      %c0_63 = arith.constant 0 : index
      %c0_64 = arith.constant 0 : index
      %142 = vector.load %arg15[%c0_63, %c0_64] : memref<1x128xf32, #tpu.memory_space<vmem>>, vector<1x128xf32>
      %cst_65 = arith.constant dense<0.000000e+00> : vector<16xf32>
      %143 = vector.multi_reduction <add>, %136, %cst_65 [1] : vector<16x128xf32> to vector<16xf32>
      %144 = vector.shape_cast %143 : vector<16xf32> to vector<16x1xf32>
      %cst_66 = arith.constant 1.280000e+02 : f32
      %145 = vector.broadcast %cst_66 : f32 to vector<16x1xf32>
      %146 = arith.divf %144, %145 : vector<16x1xf32>
      %147 = vector.broadcast %146 : vector<16x1xf32> to vector<16x128xf32>
      %148 = arith.subf %136, %147 : vector<16x128xf32>
      %149 = arith.mulf %148, %148 : vector<16x128xf32>
      %cst_67 = arith.constant dense<0.000000e+00> : vector<16xf32>
      %150 = vector.multi_reduction <add>, %149, %cst_67 [1] : vector<16x128xf32> to vector<16xf32>
      %151 = vector.shape_cast %150 : vector<16xf32> to vector<16x1xf32>
      %cst_68 = arith.constant 1.280000e+02 : f32
      %152 = vector.broadcast %cst_68 : f32 to vector<16x1xf32>
      %153 = arith.divf %151, %152 : vector<16x1xf32>
      %154 = vector.broadcast %146 : vector<16x1xf32> to vector<16x128xf32>
      %155 = arith.subf %136, %154 : vector<16x128xf32>
      %cst_69 = arith.constant 9.99999993E-9 : f32
      %156 = vector.broadcast %cst_69 : f32 to vector<16x1xf32>
      %157 = arith.addf %153, %156 : vector<16x1xf32>
      %158 = math.rsqrt %157 : vector<16x1xf32>
      %159 = vector.broadcast %158 : vector<16x1xf32> to vector<16x128xf32>
      %160 = arith.mulf %155, %159 : vector<16x128xf32>
      %161 = vector.broadcast %141 : vector<1x128xf32> to vector<16x128xf32>
      %162 = arith.mulf %161, %160 : vector<16x128xf32>
      %163 = vector.broadcast %142 : vector<1x128xf32> to vector<16x128xf32>
      %164 = arith.addf %162, %163 : vector<16x128xf32>
      %165 = arith.truncf %164 : vector<16x128xf32> to vector<16x128xbf16>
      %c0_70 = arith.constant 0 : index
      %c0_71 = arith.constant 0 : index
      %166 = vector.load %arg16[%c0_70, %c0_71] : memref<16x128xbf16, #tpu.memory_space<vmem>>, vector<16x128xbf16>
      tpu.vector_store %arg16[%c0_70, %c0_71], %165 {strides = array<i32>} : memref<16x128xbf16, #tpu.memory_space<vmem>>, vector<16x128xbf16>,
    } else {
    }
    return
  }
  func.func @transform_0(%arg0: i32) -> (i32, i32) {
    %c0_i32 = arith.constant 0 : i32
    %c0_i32_0 = arith.constant 0 : i32
    %c0_i32_1 = arith.constant 0 : i32
    return %c0_i32, %c0_i32_0 : i32, i32
  }
  func.func @transform_1(%arg0: i32) -> (i32, i32) {
    %c0_i32 = arith.constant 0 : i32
    %c0_i32_0 = arith.constant 0 : i32
    %c0_i32_1 = arith.constant 0 : i32
    return %c0_i32, %c0_i32_0 : i32, i32
  }
  func.func @transform_2(%arg0: i32) -> (i32, i32, i32) {
    %c0_i32 = arith.constant 0 : i32
    %c0_i32_0 = arith.constant 0 : i32
    %c0_i32_1 = arith.constant 0 : i32
    return %arg0, %c0_i32, %c0_i32_0 : i32, i32, i32
  }
  func.func @transform_3(%arg0: i32) -> (i32, i32, i32) {
    %c0_i32 = arith.constant 0 : i32
    %c0_i32_0 = arith.constant 0 : i32
    %c0_i32_1 = arith.constant 0 : i32
    return %arg0, %c0_i32, %c0_i32_0 : i32, i32, i32
  }
  func.func @transform_4(%arg0: i32) -> (i32, i32, i32) {
    %c0_i32 = arith.constant 0 : i32
    %c0_i32_0 = arith.constant 0 : i32
    %c0_i32_1 = arith.constant 0 : i32
    return %arg0, %c0_i32, %c0_i32_0 : i32, i32, i32
  }
  func.func @transform_5(%arg0: i32) -> (i32, i32, i32) {
    %c0_i32 = arith.constant 0 : i32
    %c0_i32_0 = arith.constant 0 : i32
    %c0_i32_1 = arith.constant 0 : i32
    return %arg0, %c0_i32, %c0_i32_0 : i32, i32, i32
  }
  func.func @transform_6(%arg0: i32) -> (i32, i32, i32) {
    %c0_i32 = arith.constant 0 : i32
    %c0_i32_0 = arith.constant 0 : i32
    %c0_i32_1 = arith.constant 0 : i32
    return %arg0, %c0_i32, %c0_i32_0 : i32, i32, i32
  }
  func.func @transform_7(%arg0: i32) -> (i32, i32, i32) {
    %c0_i32 = arith.constant 0 : i32
    %c0_i32_0 = arith.constant 0 : i32
    %c0_i32_1 = arith.constant 0 : i32
    return %arg0, %c0_i32, %c0_i32_0 : i32, i32, i32
  }
  func.func @transform_8(%arg0: i32) -> (i32, i32, i32) {
    %c0_i32 = arith.constant 0 : i32
    %c0_i32_0 = arith.constant 0 : i32
    %c0_i32_1 = arith.constant 0 : i32
    return %arg0, %c0_i32, %c0_i32_0 : i32, i32, i32
  }
  func.func @transform_9(%arg0: i32) -> (i32, i32, i32) {
    %c0_i32 = arith.constant 0 : i32
    %c0_i32_0 = arith.constant 0 : i32
    %c0_i32_1 = arith.constant 0 : i32
    return %arg0, %c0_i32, %c0_i32_0 : i32, i32, i32
  }
  func.func @transform_10(%arg0: i32) -> (i32, i32, i32) {
    %c0_i32 = arith.constant 0 : i32
    %c0_i32_0 = arith.constant 0 : i32
    %c0_i32_1 = arith.constant 0 : i32
    return %arg0, %c0_i32, %c0_i32_0 : i32, i32, i32
  }
  func.func @transform_11(%arg0: i32) -> (i32, i32, i32) {
    %c0_i32 = arith.constant 0 : i32
    %c0_i32_0 = arith.constant 0 : i32
    %c0_i32_1 = arith.constant 0 : i32
    return %arg0, %c0_i32, %c0_i32_0 : i32, i32, i32
  }
  func.func @transform_12(%arg0: i32) -> (i32, i32, i32) {
    %c0_i32 = arith.constant 0 : i32
    %c0_i32_0 = arith.constant 0 : i32
    %c0_i32_1 = arith.constant 0 : i32
    return %arg0, %c0_i32, %c0_i32_0 : i32, i32, i32
  }
  func.func @transform_13(%arg0: i32) -> (i32, i32) {
    %c0_i32 = arith.constant 0 : i32
    %c0_i32_0 = arith.constant 0 : i32
    %c0_i32_1 = arith.constant 0 : i32
    return %c0_i32, %c0_i32_0 : i32, i32
  }
  func.func @transform_14(%arg0: i32) -> (i32, i32) {
    %c0_i32 = arith.constant 0 : i32
    %c0_i32_0 = arith.constant 0 : i32
    %c0_i32_1 = arith.constant 0 : i32
    return %c0_i32, %c0_i32_0 : i32, i32
  }
  func.func @transform_15(%arg0: i32) -> (i32, i32) {
    %c0_i32 = arith.constant 0 : i32
    %c0_i32_0 = arith.constant 0 : i32
    %c0_i32_1 = arith.constant 0 : i32
    return %c0_i32, %c0_i32_0 : i32, i32
  }
}

</mosaic_0001>

<bundles_post_ra>
// kernel: tpu_custom_call.1
= control target key start
LH: loop header
LB: loop body
LE: loop exit
PB: predicated region body
PF: predicated region fallthrough
CT: control target
= control target key end

     0   :  { %s6044_s0 = inlined_call_operand.hbm [shape: f32[16,128], index: 0, kind: input, shape index: {}]   ;;  %s6045_s1 = inlined_call_operand.hbm [shape: f32[8,128], index: 1, kind: input, shape index: {}]   ;;  %s6046_s2 = inlined_call_operand.hbm [shape: f32[2,1,128], index: 2, kind: input, shape index: {}]   ;;  %s6047_s3 = inlined_call_operand.hbm [shape: f32[2,1,128], index: 3, kind: input, shape index: {}]   ;;  %s6048_s4 = inlined_call_operand.hbm [shape: bf16[2,128,384], index: 4, kind: input, shape index: {}]   ;;  %s6049_s5 = inlined_call_operand.hbm [shape: bf16[2,128,128], index: 5, kind: input, shape index: {}]   ;;  %s6050_s6 = inlined_call_operand.hbm [shape: f32[2,1,128], index: 6, kind: input, shape index: {}]   ;;  %s6051_s7 = inlined_call_operand.hbm [shape: f32[2,1,128], index: 7, kind: input, shape index: {}]   ;;  %s6052_s8 = inlined_call_operand.hbm [shape: f32[2,1,128], index: 8, kind: input, shape index: {}]   ;;  %s6053_s9 = inlined_call_operand.hbm [shape: bf16[2,128,512], index: 9, kind: input, shape index: {}]   ;;  %s6054_s10 = inlined_call_operand.vmem [shape: f32[2,1,512], index: 10, kind: input, shape index: {}]   ;;  %s6055_s11 = inlined_call_operand.hbm [shape: bf16[2,512,128], index: 11, kind: input, shape index: {}]   ;;  %s6056_s12 = inlined_call_operand.vmem [shape: f32[2,1,128], index: 12, kind: input, shape index: {}]   ;;  %s6057_s13 = inlined_call_operand.vmem [shape: f32[1,128], index: 13, kind: input, shape index: {}]   ;;  %s6058_s14 = inlined_call_operand.vmem [shape: f32[1,128], index: 14, kind: input, shape index: {}]   ;;  %s6059_s15 = inlined_call_operand.hbm [shape: bf16[16,128], index: 15, kind: output, shape index: {}]  }
   0x1   :  { %6070 = sst [smem:[#allocation28_spill]] %s6044_s0 }
   0x2   :  { %6071 = sst [smem:[#allocation29_spill]] %s6046_s2 }
   0x3   :  { %6072 = sst [smem:[#allocation30_spill]] %s6047_s3 }
   0x4   :  { %6073 = sst [smem:[#allocation31_spill]] %s6054_s10 }
   0x5   :  { %6074 = sst [smem:[#allocation32_spill]] %s6056_s12 }
   0x6   :  { %6075 = sst [smem:[#allocation33_spill]] %s6057_s13 }
   0x7   :  { %6076 = sst [smem:[#allocation34_spill]] %s6058_s14 }
   0x8   :  { %6077 = sst [smem:[#allocation35_spill]] %s6059_s15 }
   0x9   :  { %20 = vsyncpa [#allocation4], 0 }
   0xa   :  { %21 = vsyncpa [#allocation7], 0 }
   0xb   :  { %22 = vsyncpa [#allocation5], 0  ;;  %s4965_s18 = smov 0   ;;  %s4967_s19 = smov 0  }
   0xc   :  { %s4969_s20 = smov 0   ;;  %s4971_s21 = smov 0  }
   0xd LB: > { %6078 = sst [smem:[#allocation22_spill]] %s4857_s19  ;;  %s4984_s22 = sadd.s32 4294967295, %s4865_s21   ;;  %s4865_s21 = sphi %s4971_s21, %s6109_s21   ;;  %s4861_s20 = sphi %s4969_s20, %s6112_s20   ;;  %s4857_s19 = sphi %s4967_s19, %s6111_s19   ;;  %s4853_s18 = sphi %s4965_s18, %s6110_s18  }
   0xe   : > { %6079 = sst [smem:[#allocation23_spill]] %s4861_s20  ;;  %s4987_s23 = sadd.s32 1, %s4865_s21  }
   0xf   : > { %6080 = sst [smem:[#allocation24_spill]] %s4984_s22  ;;  %s74_s24 = ssub.s32 %s4865_s21, %s4987_s23 }
  0x10   : > { %6081 = sst [smem:[#allocation25_spill]] %s4987_s23  ;;  %s77_s25 = sadd.s32 1, %s4861_s20 }
  0x11   : > { %p75_p0 = scmp.eq.s32.totalorder %s74_s24, 0  ;;  %p84_p1 = scmp.ne.s32.totalorder %s4861_s20, %s4857_s19 }
  0x12   : > { %p85_p2 = scmp.eq.s32.totalorder %s4865_s21, 0  ;;  %p90_p3 = scmp.ne.s32.totalorder %s4857_s19, %s4853_s18 }
  0x13   : > { %s4997_s26 = scalar_select %p75_p0, %s4861_s20, %s77_s25  }
  0x14   : > { %p4999_p4 = por %p85_p2, %p84_p1  ;;  %p91_p5 = scmp.eq.s32.totalorder %s4984_s22, 0 }
  0x15   : > { %6082 = sst [smem:[#allocation26_spill]] %s4997_s26  ;;  %p3718_p6 = scmp.ge.s32.totalorder %s4865_s21, 1 }
  0x16   : > { %p424_p7 = scmp.lt.s32.totalorder %s4865_s21, 3  ;;  %p5008_p8 = por %p91_p5, %p90_p3 }
  0x17   : > { %p3719_p9 = scmp.ne.s32.totalorder %s4984_s22, 0  ;;  %s6087_s0 = sld [smem:[#allocation28_spill]] }
  0x18   : > { %s6084_s28 = scalar_select %p5008_p8, 1, 0 }
  0x19   : > { %p5013_p10 = pnand %p3718_p6, %p424_p7  ;;  %s4867_s18 = smov [#allocation3]  }
  0x1a   : > { %6085 = sst [smem:[#allocation27_spill]] %s6084_s28  ;;  %s437_s24 = sshll.u32 %s4867_s18, 4  ;;  %s438_s24 = int_to_ptr.vmem [resolvable:$true] %s437_s24 }
  0x1b   : > { %p4282_p11 = pneg %p5013_p10  ;;  %p4319_p13 = scmp.lt.s32.totalorder %s4865_s21, 2 }
  0x1c   : > { %s469_s26 = sand.u32 1, %s4865_s21   ;;  %s4868_s23 = smov 128  }
  0x1d   : > { %s435_s17 = sshll.u32 %s6087_s0, 4  ;;  %p5024_p12 = pnand %p4282_p11, %p91_p5  ;;  %s436_s17 = int_to_ptr.hbm [resolvable:$true] %s435_s17 }
  0x1e   : > { %s4869_s15 = smov 8   ;;  %p5034_p0 = pnand %p4319_p13, %p4999_p4 }
  0x1f   : > { %4285 = dma.hbm_to_vmem [thread:$0]  (!%p5024_p12), %s436_s17, 256, %s438_s24, [#allocation4], %s4868_s23, %s4868_s23, %s4869_s15  }
  0x20   : > { %s5039_s16 = sand.u32 1, %s4861_s20   ;;  %s6090_s2 = sld [smem:[#allocation29_spill]] }
  0x21   : > { %s472_s10 = scalar_lea.vmem [#allocation8], %s5039_s16  ;;  %s5046_s28 = scalar_lea.sflag [#allocation4], %s469_s26 }
  0x22   : > { %s479_s12 = sshll.u32 %s472_s10, 4  ;;  %p5050_p2 = pneg %p5034_p0  ;;  %s480_s12 = int_to_ptr.vmem [resolvable:$true] %s479_s12 }
  0x26   : > { %s475_s14 = scalar_lea.hbm %s6090_s2, %s4865_s21  ;;  %s4498_s10 = scalar_lea.hbm %s6090_s2, 2 }
  0x27   : > { %s477_s13 = sshll.u32 %s475_s14, 4  ;;  %s478_s13 = int_to_ptr.hbm [resolvable:$true] %s477_s13 }
  0x28   : > { %s4491_s15 = sshra.s32 %s478_s13, 4  ;;  %s4492_s15 = int_to_ptr.hbm [resolvable:$true] %s4491_s15 }
  0x29   : > { %s4493_s23 = scalar_lea.hbm %s4492_s15, 1  ;;  %p4499_p6 = scmp.lt.s32.totalorder %s4492_s15, %s6090_s2 }
  0x2a   : > { %p4494_p1 = scmp.ne.s32.totalorder %s4492_s15, %s4493_s23  ;;  %p4500_p7 = scmp.lt.s32.totalorder %s4498_s10, %s4493_s23 }
  0x2c   : > { %p4496_p3 = pnand %p5050_p2, %p4494_p1  ;;  %p4501_p11 = por %p4500_p7, %p4499_p6 }
  0x2e   : > { %p4497_p4 = pneg %p4496_p3 }
  0x30   : > { %p4502_p13 = pnand %p4501_p11, %p4497_p4 }
  0x32   : > { %4505 = shalt.err (!%p4502_p13)
}
  0x33   : > { %4292 = dma.hbm_to_vmem [thread:$0]  (!%p5034_p0), %s478_s13, 16, %s480_s12, %s5046_s28  }
  0x34   : > { %s6092_s3 = sld [smem:[#allocation30_spill]]  ;;  %s489_s20 = scalar_lea.vmem [#allocation9], %s5039_s16 }
  0x35   : > { %s496_s19 = sshll.u32 %s489_s20, 4  ;;  %s497_s19 = int_to_ptr.vmem [resolvable:$true] %s496_s19 }
  0x3a   : > { %s492_s0 = scalar_lea.hbm %s6092_s3, %s4865_s21  ;;  %s4528_s12 = scalar_lea.hbm %s6092_s3, 2 }
  0x3b   : > { %s494_s14 = sshll.u32 %s492_s0, 4  ;;  %s495_s14 = int_to_ptr.hbm [resolvable:$true] %s494_s14 }
  0x3c   : > { %s4521_s15 = sshra.s32 %s495_s14, 4  ;;  %s4522_s15 = int_to_ptr.hbm [resolvable:$true] %s4521_s15 }
  0x3d   : > { %s4523_s23 = scalar_lea.hbm %s4522_s15, 1  ;;  %p4529_p6 = scmp.lt.s32.totalorder %s4522_s15, %s6092_s3 }
  0x3e   : > { %p4524_p1 = scmp.ne.s32.totalorder %s4522_s15, %s4523_s23  ;;  %p4530_p7 = scmp.lt.s32.totalorder %s4528_s12, %s4523_s23 }
  0x40   : > { %p4526_p3 = pnand %p4524_p1, %p5050_p2  ;;  %p4531_p11 = por %p4530_p7, %p4529_p6 }
  0x42   : > { %p4527_p4 = pneg %p4526_p3 }
  0x44   : > { %p4532_p13 = pnand %p4531_p11, %p4527_p4 }
  0x46   : > { %4535 = shalt.err (!%p4532_p13)
}
  0x47   : > { %4295 = dma.hbm_to_vmem [thread:$0]  (!%p5034_p0), %s495_s14, 16, %s497_s19, %s5046_s28  }
  0x48   : > { %s4249_s20 = smul.u32 192, %s5039_s16  ;;  %s3723_s18 = sshll.u32 %s5039_s16, 6 }
  0x49   : > { %s4250_s24 = smul.u32 192, %s4865_s21  ;;  %s4558_s2 = scalar_lea.hbm %s6048_s4, 384 }
  0x4a   : > { %s507_s15 = scalar_lea.vmem [#allocation10], %s4249_s20 }
  0x4b   : > { %s512_s17 = scalar_lea.hbm %s6048_s4, %s4250_s24  ;;  %s515_s23 = sshll.u32 %s507_s15, 4  ;;  %s516_s23 = int_to_ptr.vmem [resolvable:$true] %s515_s23 }
  0x4c   : > { %s513_s12 = sshll.u32 %s512_s17, 4  ;;  %s514_s12 = int_to_ptr.hbm [resolvable:$true] %s513_s12 }
  0x4d   : > { %s4551_s13 = sshra.s32 %s514_s12, 4  ;;  %s4552_s13 = int_to_ptr.hbm [resolvable:$true] %s4551_s13 }
  0x4e   : > { %s4553_s26 = scalar_lea.hbm %s4552_s13, 192  ;;  %p4559_p6 = scmp.lt.s32.totalorder %s4552_s13, %s6048_s4 }
  0x4f   : > { %p4554_p1 = scmp.ne.s32.totalorder %s4552_s13, %s4553_s26  ;;  %p4560_p7 = scmp.lt.s32.totalorder %s4558_s2, %s4553_s26 }
  0x51   : > { %p4556_p3 = pnand %p4554_p1, %p5050_p2  ;;  %p4561_p11 = por %p4560_p7, %p4559_p6 }
  0x53   : > { %p4557_p4 = pneg %p4556_p3 }
  0x55   : > { %p4562_p13 = pnand %p4561_p11, %p4557_p4 }
  0x57   : > { %4565 = shalt.err (!%p4562_p13)
}
  0x58   : > { %s4870_s20 = smov 192   ;;  %s4871_s24 = smov 12  }
  0x59   : > { %4298 = dma.hbm_to_vmem [thread:$0]  (!%p5034_p0), %s514_s12, 3072, %s516_s23, %s5046_s28, %s4870_s20, %s4870_s20, %s4871_s24  }
  0x5a   : > { %s4145_s0 = sshll.u32 %s4865_s21, 6  ;;  %s529_s10 = scalar_lea.vmem [#allocation11], %s3723_s18 }
  0x5b   : > { %s537_s17 = sshll.u32 %s529_s10, 4  ;;  %s534_s3 = scalar_lea.hbm %s6049_s5, %s4145_s0  ;;  %s538_s17 = int_to_ptr.vmem [resolvable:$true] %s537_s17 }
  0x5c   : > { %s535_s2 = sshll.u32 %s534_s3, 4  ;;  %s4588_s23 = scalar_lea.hbm %s6049_s5, 128  ;;  %s536_s2 = int_to_ptr.hbm [resolvable:$true] %s535_s2 }
  0x5d   : > { %s4581_s22 = sshra.s32 %s536_s2, 4  ;;  %s4582_s22 = int_to_ptr.hbm [resolvable:$true] %s4581_s22 }
  0x5e   : > { %s4583_s13 = scalar_lea.hbm %s4582_s22, 64  ;;  %p4589_p6 = scmp.lt.s32.totalorder %s4582_s22, %s6049_s5 }
  0x5f   : > { %p4584_p1 = scmp.ne.s32.totalorder %s4582_s22, %s4583_s13  ;;  %p4590_p7 = scmp.lt.s32.totalorder %s4588_s23, %s4583_s13 }
  0x61   : > { %p4586_p3 = pnand %p4584_p1, %p5050_p2  ;;  %p4591_p11 = por %p4590_p7, %p4589_p6 }
  0x63   : > { %p4587_p4 = pneg %p4586_p3 }
  0x65   : > { %p4592_p13 = pnand %p4591_p11, %p4587_p4 }
  0x67   : > { %4595 = shalt.err (!%p4592_p13)
}
  0x68   : > { %s6068_s20 = smov 64   ;;  %s6069_s24 = smov 4  }
  0x69   : > { %4301 = dma.hbm_to_vmem [thread:$0]  (!%p5034_p0), %s536_s2, 1024, %s538_s17, %s5046_s28, %s6068_s20, %s6068_s20, %s6069_s24  }
  0x6a   : > { %s553_s15 = scalar_lea.hbm %s6050_s6, %s4865_s21  ;;  %s550_s3 = scalar_lea.vmem [#allocation12], %s5039_s16 }
  0x6b   : > { %s555_s19 = sshll.u32 %s553_s15, 4  ;;  %s557_s22 = sshll.u32 %s550_s3, 4  ;;  %s556_s19 = int_to_ptr.hbm [resolvable:$true] %s555_s19  ;;  %s558_s22 = int_to_ptr.vmem [resolvable:$true] %s557_s22 }
  0x6c   : > { %s4611_s13 = sshra.s32 %s556_s19, 4  ;;  %s4618_s17 = scalar_lea.hbm %s6050_s6, 2  ;;  %s4612_s13 = int_to_ptr.hbm [resolvable:$true] %s4611_s13 }
  0x6d   : > { %s4613_s26 = scalar_lea.hbm %s4612_s13, 1  ;;  %p4619_p6 = scmp.lt.s32.totalorder %s4612_s13, %s6050_s6 }
  0x6e   : > { %p4614_p1 = scmp.ne.s32.totalorder %s4612_s13, %s4613_s26  ;;  %p4620_p7 = scmp.lt.s32.totalorder %s4618_s17, %s4613_s26 }
  0x70   : > { %p4616_p3 = pnand %p4614_p1, %p5050_p2  ;;  %p4621_p11 = por %p4620_p7, %p4619_p6 }
  0x72   : > { %p4617_p4 = pneg %p4616_p3 }
  0x74   : > { %p4622_p13 = pnand %p4621_p11, %p4617_p4 }
  0x76   : > { %4625 = shalt.err (!%p4622_p13)
}
  0x77   : > { %4304 = dma.hbm_to_vmem [thread:$0]  (!%p5034_p0), %s556_s19, 16, %s558_s22, %s5046_s28  }
  0x78   : > { %s570_s10 = scalar_lea.hbm %s6051_s7, %s4865_s21  ;;  %s567_s3 = scalar_lea.vmem [#allocation13], %s5039_s16 }
  0x79   : > { %s572_s15 = sshll.u32 %s570_s10, 4  ;;  %s574_s14 = sshll.u32 %s567_s3, 4  ;;  %s573_s15 = int_to_ptr.hbm [resolvable:$true] %s572_s15  ;;  %s575_s14 = int_to_ptr.vmem [resolvable:$true] %s574_s14 }
  0x7a   : > { %s4641_s13 = sshra.s32 %s573_s15, 4  ;;  %s4648_s19 = scalar_lea.hbm %s6051_s7, 2  ;;  %s4642_s13 = int_to_ptr.hbm [resolvable:$true] %s4641_s13 }
  0x7b   : > { %s4643_s26 = scalar_lea.hbm %s4642_s13, 1  ;;  %p4649_p6 = scmp.lt.s32.totalorder %s4642_s13, %s6051_s7 }
  0x7c   : > { %p4644_p1 = scmp.ne.s32.totalorder %s4642_s13, %s4643_s26  ;;  %p4650_p7 = scmp.lt.s32.totalorder %s4648_s19, %s4643_s26 }
  0x7e   : > { %p4646_p3 = pnand %p4644_p1, %p5050_p2  ;;  %p4651_p11 = por %p4650_p7, %p4649_p6 }
  0x80   : > { %p4647_p4 = pneg %p4646_p3 }
  0x82   : > { %p4652_p13 = pnand %p4651_p11, %p4647_p4 }
  0x84   : > { %4655 = shalt.err (!%p4652_p13)
}
  0x85   : > { %4307 = dma.hbm_to_vmem [thread:$0]  (!%p5034_p0), %s573_s15, 16, %s575_s14, %s5046_s28  }
  0x86   : > { %s587_s0 = scalar_lea.hbm %s6052_s8, %s4865_s21  ;;  %s584_s3 = scalar_lea.vmem [#allocation14], %s5039_s16 }
  0x87   : > { %s589_s10 = sshll.u32 %s587_s0, 4  ;;  %s591_s23 = sshll.u32 %s584_s3, 4  ;;  %s590_s10 = int_to_ptr.hbm [resolvable:$true] %s589_s10  ;;  %s592_s23 = int_to_ptr.vmem [resolvable:$true] %s591_s23 }
  0x88   : > { %s4671_s13 = sshra.s32 %s590_s10, 4  ;;  %s4678_s15 = scalar_lea.hbm %s6052_s8, 2  ;;  %s4672_s13 = int_to_ptr.hbm [resolvable:$true] %s4671_s13 }
  0x89   : > { %s4673_s26 = scalar_lea.hbm %s4672_s13, 1  ;;  %p4679_p6 = scmp.lt.s32.totalorder %s4672_s13, %s6052_s8 }
  0x8a   : > { %p4674_p1 = scmp.ne.s32.totalorder %s4672_s13, %s4673_s26  ;;  %p4680_p7 = scmp.lt.s32.totalorder %s4678_s15, %s4673_s26 }
  0x8c   : > { %p4676_p3 = pnand %p4674_p1, %p5050_p2  ;;  %p4681_p11 = por %p4680_p7, %p4679_p6 }
  0x8e   : > { %p4677_p4 = pneg %p4676_p3 }
  0x90   : > { %p4682_p13 = pnand %p4681_p11, %p4677_p4 }
  0x92   : > { %4685 = shalt.err (!%p4682_p13)
}
  0x93   : > { %4310 = dma.hbm_to_vmem [thread:$0]  (!%p5034_p0), %s590_s10, 16, %s592_s23, %s5046_s28  }
  0x94   : > { %s3726_s2 = sshll.u32 %s5039_s16, 8  ;;  %s4146_s18 = sshll.u32 %s4865_s21, 8 }
  0x95   : > { %s607_s3 = scalar_lea.hbm %s6053_s9, %s4146_s18  ;;  %s602_s13 = scalar_lea.vmem [#allocation15], %s3726_s2 }
  0x96   : > { %s608_s17 = sshll.u32 %s607_s3, 4  ;;  %s610_s26 = sshll.u32 %s602_s13, 4  ;;  %s609_s17 = int_to_ptr.hbm [resolvable:$true] %s608_s17  ;;  %s611_s26 = int_to_ptr.vmem [resolvable:$true] %s610_s26 }
  0x97   : > { %s4701_s19 = sshra.s32 %s609_s17, 4  ;;  %s4708_s21 = scalar_lea.hbm %s6053_s9, 512  ;;  %s4702_s19 = int_to_ptr.hbm [resolvable:$true] %s4701_s19 }
  0x98   : > { %s4703_s15 = scalar_lea.hbm %s4702_s19, 256  ;;  %p4709_p6 = scmp.lt.s32.totalorder %s4702_s19, %s6053_s9 }
  0x99   : > { %p4704_p1 = scmp.ne.s32.totalorder %s4702_s19, %s4703_s15  ;;  %p4710_p7 = scmp.lt.s32.totalorder %s4708_s21, %s4703_s15 }
  0x9b   : > { %p4706_p3 = pnand %p4704_p1, %p5050_p2  ;;  %p4711_p11 = por %p4710_p7, %p4709_p6 }
  0x9d   : > { %p4707_p4 = pneg %p4706_p3 }
  0x9f   : > { %p4712_p13 = pnand %p4711_p11, %p4707_p4 }
  0xa1   : > { %4715 = shalt.err (!%p4712_p13)
}
  0xa2   : > { %s4874_s12 = smov 256   ;;  %s4875_s0 = smov 16  }
  0xa3   : > { %4313 = dma.hbm_to_vmem [thread:$0]  (!%p5034_p0), %s609_s17, 4096, %s611_s26, %s5046_s28, %s4874_s12, %s4874_s12, %s4875_s0  }
  0xa4   : > { %s450_s10 = sshll.u32 %s6045_s1, 4  ;;  %s4876_s23 = smov [#allocation6]   ;;  %s451_s10 = int_to_ptr.hbm [resolvable:$true] %s450_s10 }
  0xa5   : > { %s452_s19 = sshll.u32 %s4876_s23, 4  ;;  %s636_s14 = scalar_lea.hbm %s6055_s11, %s4146_s18  ;;  %s453_s19 = int_to_ptr.vmem [resolvable:$true] %s452_s19 }
  0xa6   : > { %4288 = dma.hbm_to_vmem [thread:$0]  (!%p5024_p12), %s451_s10, 128, %s453_s19, [#allocation7]  }
  0xa7   : > { %s631_s22 = scalar_lea.vmem [#allocation16], %s3726_s2  ;;  %s637_s24 = sshll.u32 %s636_s14, 4  ;;  %s638_s24 = int_to_ptr.hbm [resolvable:$true] %s637_s24 }
  0xa8   : > { %s639_s20 = sshll.u32 %s631_s22, 4  ;;  %s4761_s17 = sshra.s32 %s638_s24, 4  ;;  %s640_s20 = int_to_ptr.vmem [resolvable:$true] %s639_s20  ;;  %s4762_s17 = int_to_ptr.hbm [resolvable:$true] %s4761_s17 }
  0xa9   : > { %s4763_s26 = scalar_lea.hbm %s4762_s17, 256  ;;  %s4768_s0 = scalar_lea.hbm %s6055_s11, 512 }
  0xaa   : > { %p4764_p1 = scmp.ne.s32.totalorder %s4762_s17, %s4763_s26  ;;  %p4769_p12 = scmp.lt.s32.totalorder %s4762_s17, %s6055_s11 }
  0xab   : > { %p4770_p6 = scmp.lt.s32.totalorder %s4768_s0, %s4763_s26 }
  0xac   : > { %p4766_p3 = pnand %p4764_p1, %p5050_p2 }
  0xad   : > { %p4771_p7 = por %p4770_p6, %p4769_p12 }
  0xae   : > { %p4767_p4 = pneg %p4766_p3 }
  0xb0   : > { %p4772_p11 = pnand %p4771_p7, %p4767_p4 }
  0xb2   : > { %4775 = shalt.err (!%p4772_p11)
}
  0xb3   : > { %s6093_s16 = smov 4   ;;  %s6094_s2 = smov 64  }
  0xb4   : > { %4316 = dma.hbm_to_vmem [thread:$0]  (!%p5034_p0), %s638_s24, 4096, %s640_s20, %s5046_s28, %s6094_s2, %s6094_s2, %s6093_s16  }
  0xb5   : > { %657 = sbr.rel (%p5013_p10) target bundleno = 2528 (0x9e0), region = 80  ;;  %s6095_s27 = sld [smem:[#allocation24_spill]] (!%p5013_p10) }
  0xba   : > { %4836 = dma.done.wait (%p91_p5), [#allocation4], 256  }
  0xbb   : > { %4838 = vsyncadd (%p91_p5), [#allocation4], 4294967040 }
  0xbc   : > { %4840 = dma.done.wait (%p91_p5), [#allocation7], 128  }
  0xbd   : > { %4842 = vsyncadd (%p91_p5), [#allocation7], 4294967168  ;;  %s6096_s30 = sld [smem:[#allocation22_spill]]  ;;  %s669_s10 = sand.u32 1, %s6095_s27  }
  0xbe   : > { %s670_s29 = scalar_lea.sflag [#allocation4], %s669_s10 }
  0xc3   : > { %s5218_s28 = sand.u32 1, %s6096_s30  }
  0xc4   : > { %4844 = dma.done.wait (%p5008_p8), %s670_s29, 12368  }
  0xc5   : > { %4846 = vsyncadd (%p5008_p8), %s670_s29, 4294954928  ;;  %s4251_s24 = smul.u32 192, %s5218_s28  ;;  %s3735_s23 = sshll.u32 %s5218_s28, 6 }
  0xc6   : > { %s3736_s19 = sshll.u32 %s5218_s28, 8  ;;  %p833_p5 = scmp.lt.s32.totalorder %s6095_s27, 1 }
  0xc7   : > { %s6098_s17 = sld [smem:[#allocation32_spill]]  ;;  %s681_s13 = scalar_lea.vmem [#allocation9], %s5218_s28 }
  0xc8   : > { %s5230_s15 = scalar_select %p833_p5, %s6095_s27, 1 }
  0xc9   : > { %s6099_s0 = sld [smem:[#allocation31_spill]]  ;;  %s5243_s16 = scalar_lea.vmem [#allocation10], %s4251_s24 }
  0xca   : > { %s3738_s21 = sshll.u32 %s5230_s15, 2  ;;  %s5245_s2 = scalar_lea.vmem [#allocation11], %s3735_s23 }
  0xcb   : > { %s710_s30 = scalar_lea.vmem [#allocation12], %s5218_s28  ;;  %s719_s18 = scalar_lea.vmem [#allocation13], %s5218_s28 }
  0xcc   : > { %s728_s10 = scalar_lea.vmem [#allocation14], %s5218_s28  ;;  %s5250_s29 = scalar_lea.vmem [#allocation15], %s3736_s19 }
  0xcd   : > { %s839_s26 = scalar_lea.vmem %s6098_s17, %s5230_s15  ;;  %s5252_s20 = scalar_lea.vmem [#allocation16], %s3736_s19 }
  0xce   : > { %844 = sbr.rel (%p3719_p9) target bundleno = 216 (0xd8), region = 128 }
  0xcf   : > { %s5240_s3 = scalar_lea.vmem %s6099_s0, %s3738_s21 }
  0xd3   : > { %v845_v0 = vld [vmem:[#allocation3] sm:$0xff]  ;;  %v847_v1 = vld [vmem:[#allocation6] sm:$0xff]  ;;  %v846_v2 = vld [vmem:[#allocation3 + $0x8] sm:$0xff] }
  0xd4   : > { %v848_v3 = vadd.f32 %v847_v1, %v845_v0  ;;  %v849_v4 = vadd.f32 %v847_v1, %v846_v2 }
  0xd6   : > { %850 = vst [vmem:[#allocation2] sm:$0xff] %v848_v3 }
  0xd7   : > { %851 = vst [vmem:[#allocation2 + $0x8] sm:$0xff] %v849_v4 }
  0xd8 PF: > { %v4877_v7 = vmov 128.0   ;;  %v3826_v22 = vld [vmem:[%s5243_s16 + $0xa8] sm:$0xf]  ;;  %v4170_v23 = vld [vmem:[%s5243_s16 + $0xb0] sm:$0xf0]  ;;  %s6100_s27 = scalar_lea.vmem [#allocation8], %s5218_s28 }
  0xd9   : > { %4395 = vrcp.f32 %v4877_v7  ;;  %v4169_v24 = vld [vmem:[%s5243_s16 + $0xac] sm:$0xf]  ;;  %v3827_v25 = vor.u32 %v4170_v23, %v3826_v22  ;;  %v3828_v26 = vld [vmem:[%s5243_s16 + $0xb4] sm:$0xf0]  ;;  %v3834_v27 = vld [vmem:[%s5243_s16 + $0xb0] sm:$0xf] }
  0xda   : > { %v4171_v28 = vld [vmem:[%s5243_s16 + $0xb8] sm:$0xf0]  ;;  %v3831_v29 = vor.u32 %v4169_v24, %v3828_v26  ;;  %v3814_v31 = vld [vmem:[%s5243_s16 + $0x90] sm:$0xf]  ;;  %v4166_v33 = vld [vmem:[%s5243_s16 + $0x94] sm:$0xf] }
  0xdb   : > { %v3835_v30 = vor.u32 %v4171_v28, %v3834_v27  ;;  %1074 = vmatpush.bf16.msra.mxu0 %v3827_v25  ;;  %v4167_v32 = vld [vmem:[%s5243_s16 + $0x98] sm:$0xf0]  ;;  %v3816_v35 = vld [vmem:[%s5243_s16 + $0x9c] sm:$0xf0]  ;;  %v3822_v36 = vld [vmem:[%s5243_s16 + $0x98] sm:$0xf] }
  0xdc   : > { %1088 = vmatpush.bf16.msra.mxu1 %v3831_v29  ;;  %v3815_v34 = vor.u32 %v4167_v32, %v3814_v31  ;;  %v4168_v37 = vld [vmem:[%s5243_s16 + $0xa0] sm:$0xf0]  ;;  %v3819_v38 = vor.u32 %v4166_v33, %v3816_v35  ;;  %v3802_v40 = vld [vmem:[%s5243_s16 + $0x78] sm:$0xf]  ;;  %v4163_v42 = vld [vmem:[%s5243_s16 + $0x7c] sm:$0xf] }
  0xdd   : > { %v852_v5 = vld [vmem:[#allocation2] sm:$0xff]  ;;  %1102 = vmatpush.bf16.msra.mxu2 %v3835_v30  ;;  %v3823_v39 = vor.u32 %v4168_v37, %v3822_v36  ;;  %v4164_v41 = vld [vmem:[%s5243_s16 + $0x80] sm:$0xf0]  ;;  %v3804_v44 = vld [vmem:[%s5243_s16 + $0x84] sm:$0xf0]  ;;  %s4878_s24 = smov 32  }
  0xde   : > { %856 = vadd.xlane.f32.xlu0 %v852_v5  ;;  %v853_v6 = vld [vmem:[#allocation2 + $0x8] sm:$0xff]  ;;  %v3803_v43 = vor.u32 %v4164_v41, %v3802_v40  ;;  %v4165_v46 = vld [vmem:[%s5243_s16 + $0x88] sm:$0xf0]  ;;  %v3807_v47 = vor.u32 %v4163_v42, %v3804_v44  ;;  %v4160_v51 = vld [vmem:[%s5243_s16 + $0x64] sm:$0xf]  ;;  %s4879_s23 = smov 96  }
  0xdf   : > { %v4396_v8 = vpop.eup %4395  ;;  %1075 = vmatpush.bf16.msra.mxu0 %v3815_v34  ;;  %v3810_v45 = vld [vmem:[%s5243_s16 + $0x80] sm:$0xf]  ;;  %v4161_v50 = vld [vmem:[%s5243_s16 + $0x68] sm:$0xf0]  ;;  %v3792_v53 = vld [vmem:[%s5243_s16 + $0x6c] sm:$0xf0] }
  0xe0   : > { %v861_v9 = vmul.f32 128.0, %v4396_v8  ;;  %vm865_vm0 = vweird.f32 %v4396_v8  ;;  %1089 = vmatpush.bf16.msra.mxu1 %v3819_v38  ;;  %v3811_v48 = vor.u32 %v4165_v46, %v3810_v45  ;;  %v3790_v49 = vld [vmem:[%s5243_s16 + $0x60] sm:$0xf]  ;;  %v3798_v54 = vld [vmem:[%s5243_s16 + $0x68] sm:$0xf]  ;;  %v3795_v56 = vor.u32 %v4160_v51, %v3792_v53  ;;  %s4880_s19 = smov 64  }
  0xe1   : > { %1103 = vmatpush.bf16.msra.mxu2 %v3823_v39  ;;  %v3791_v52 = vor.u32 %v4161_v50, %v3790_v49  ;;  %v4162_v55 = vld [vmem:[%s5243_s16 + $0x70] sm:$0xf0]  ;;  %v3778_v58 = vld [vmem:[%s5243_s16 + $0x48] sm:$0xf]  ;;  %v4157_v60 = vld [vmem:[%s5243_s16 + $0x4c] sm:$0xf] }
  0xe2   : > { %v862_v10 = vsub.f32 1.0, %v861_v9  ;;  %v3799_v57 = vor.u32 %v4162_v55, %v3798_v54  ;;  %v4158_v59 = vld [vmem:[%s5243_s16 + $0x50] sm:$0xf0]  ;;  %v3780_v62 = vld [vmem:[%s5243_s16 + $0x54] sm:$0xf0]  ;;  %vm1169_vm7 = vcmask 1047556  }
  0xe3   : > { %1076 = vmatpush.bf16.msra.mxu0 %v3803_v43  ;;  %v3779_v61 = vor.u32 %v4158_v59, %v3778_v58  ;;  %v3786_v63 = vld [vmem:[%s5243_s16 + $0x50] sm:$0xf]  ;;  %v4159_v0 = vld [vmem:[%s5243_s16 + $0x58] sm:$0xf0]  ;;  %v3783_v1 = vor.u32 %v4157_v60, %v3780_v62  ;;  %v3768_v7 = vld [vmem:[%s5243_s16 + $0x3c] sm:$0xf0] }
  0xe4   : > { %v863_v11 = vmul.f32 %v4396_v8, %v862_v10  ;;  %1090 = vmatpush.bf16.msra.mxu1 %v3807_v47  ;;  %v3787_v2 = vor.u32 %v4159_v0, %v3786_v63  ;;  %v3766_v3 = vld [vmem:[%s5243_s16 + $0x30] sm:$0xf]  ;;  %v4155_v4 = vld [vmem:[%s5243_s16 + $0x38] sm:$0xf0]  ;;  %v4156_v9 = vld [vmem:[%s5243_s16 + $0x40] sm:$0xf0] }
  0xe5   : > { %1104 = vmatpush.bf16.msra.mxu2 %v3811_v48  ;;  %v3742_v24 = vld [vmem:[%s5243_s16] sm:$0xf]  ;;  %v4149_v25 = vld [vmem:[%s5243_s16 + $0x8] sm:$0xf0]  ;;  %v4148_v26 = vld [vmem:[%s5243_s16 + $0x4] sm:$0xf] }
  0xe6   : > { %858 = vadd.xlane.f32.xlu0 %v853_v6  ;;  %v864_v12 = vadd.f32 %v4396_v8, %v863_v11  ;;  %v3743_v28 = vor.u32 %v4149_v25, %v3742_v24  ;;  %v3744_v29 = vld [vmem:[%s5243_s16 + $0xc] sm:$0xf0]  ;;  %v3750_v30 = vld [vmem:[%s5243_s16 + $0x8] sm:$0xf]  ;;  %v4150_v31 = vld [vmem:[%s5243_s16 + $0x10] sm:$0xf0] }
  0xe7   : > { %1077 = vmatpush.bf16.msra.mxu0 %v3791_v52  ;;  %v3747_v33 = vor.u32 %v4148_v26, %v3744_v29  ;;  %v3751_v34 = vor.u32 %v4150_v31, %v3750_v30  ;;  %v4389_v52 = vld [vmem:[%s6100_s27] ss:$0 sm:$0xff]  ;;  %vm1841_vm8 = vcmask 261120   ;;  %vm2017_vm10 = vcmask 64512   ;;  %s6104_s15 = sld [smem:[#allocation24_spill]] }
  0xe8   : > { %v5256_v13 = vsel %vm865_vm0, %v4396_v8, %v864_v12  ;;  %1091 = vmatpush.bf16.msra.mxu1 %v3795_v56  ;;  %v3774_v8 = vld [vmem:[%s5243_s16 + $0x38] sm:$0xf]  ;;  %vm2221_vm11 = vcmask 1043456  }
  0xe9   : > { %1105 = vmatpush.bf16.msra.mxu2 %v3799_v57  ;;  %v3775_v11 = vor.u32 %v4156_v9, %v3774_v8  ;;  %v3754_v12 = vld [vmem:[%s5243_s16 + $0x18] sm:$0xf]  ;;  %v4390_v57 = vld [vmem:[%s681_s13] ss:$0 sm:$0xff] }
  0xeb   : > { %1078 = vmatpush.bf16.msra.mxu0 %v3779_v61 }
  0xec   : > { %1092 = vmatpush.bf16.msra.mxu1 %v3783_v1 }
  0xed   : > { %1106 = vmatpush.bf16.msra.mxu2 %v3787_v2  ;;  %p4140_p8 = scmp.ne.s32.totalorder %s6104_s15, 1 }
  0xee   : > { %s6105_s17 = sld [smem:[#allocation33_spill]] (!%p4140_p8) }
  0xef   : > { %s6106_s25 = sld [smem:[#allocation34_spill]] (!%p4140_p8) }
  0xf1   : > { %1107 = vmatpush.bf16.msra.mxu2 %v3775_v11 }
 0x151   : > { %v857_v14 = vpop.xlane.xlu0 %856 }
 0x152   : > { %v867_v15 = vmul.f32 %v5256_v13, %v857_v14  ;;  %v4152_v14 = vld [vmem:[%s5243_s16 + $0x20] sm:$0xf0] }
 0x154   : > { %v5259_v16 = vsub.f32 %v852_v5, %v867_v15  ;;  %v4154_v5 = vld [vmem:[%s5243_s16 + $0x34] sm:$0xf]  ;;  %v4151_v15 = vld [vmem:[%s5243_s16 + $0x1c] sm:$0xf] }
 0x155   : > { %v3771_v10 = vor.u32 %v4154_v5, %v3768_v7 }
 0x156   : > { %v871_v17 = vmul.f32 %v5259_v16, %v5259_v16 }
 0x157   : > { %1093 = vmatpush.bf16.msra.mxu1 %v3771_v10 }
 0x158   : > { %873 = vadd.xlane.f32.xlu1 %v871_v17  ;;  %v3755_v17 = vor.u32 %v4152_v14, %v3754_v12 }
 0x159   : > { %v859_v18 = vpop.xlane.xlu0 %858 }
 0x15a   : > { %v868_v19 = vmul.f32 %v5256_v13, %v859_v18  ;;  %v3756_v18 = vld [vmem:[%s5243_s16 + $0x24] sm:$0xf0] }
 0x15b   : > { %v3759_v22 = vor.u32 %v4151_v15, %v3756_v18 }
 0x15c   : > { %v5264_v20 = vsub.f32 %v853_v6, %v868_v19  ;;  %v3767_v6 = vor.u32 %v4155_v4, %v3766_v3  ;;  %v3762_v19 = vld [vmem:[%s5243_s16 + $0x20] sm:$0xf]  ;;  %v4881_v4 = vmov 1983009808  }
 0x15d   : > { %1094 = vmatpush.bf16.msra.mxu1 %v3759_v22  ;;  %v1160_v5 = vunpack.c.l.s4 %v4881_v4 }
 0x15e   : > { %v872_v21 = vmul.f32 %v5264_v20, %v5264_v20  ;;  %1079 = vmatpush.bf16.msra.mxu0 %v3767_v6 }
 0x15f   : > { %v5335_v8 = vunpack.c.0.s8 %v1160_v5 }
 0x160   : > { %875 = vadd.xlane.f32.xlu1 %v872_v21  ;;  %v4153_v21 = vld [vmem:[%s5243_s16 + $0x28] sm:$0xf0] }
 0x161   : > { %v3763_v23 = vor.u32 %v4153_v21, %v3762_v19  ;;  %1095 = vmatpush.bf16.msra.mxu1 %v3747_v33  ;;  %v4882_v21 = vmov 1934713408  }
 0x162   : > { %1080 = vmatpush.bf16.msra.mxu0 %v3755_v17  ;;  %v1174_v22 = vunpack.c.l.s4 %v4882_v21 }
 0x163   : > { %1108 = vmatpush.bf16.msra.mxu2 %v3763_v23 }
 0x164   : > { %v5348_v31 = vunpack.c.0.s8 %v1174_v22 }
 0x166   : > { %1081 = vmatpush.bf16.msra.mxu0 %v3743_v28 }
 0x167   : > { %1109 = vmatpush.bf16.msra.mxu2 %v3751_v34 }
 0x1cb   : > { %v874_v27 = vpop.xlane.xlu1 %873 }
 0x1cc   : > { %v877_v32 = vmul.f32 %v874_v27, %v5256_v13 }
 0x1ce   : > { %v879_v35 = vadd.f32 1e-08, %v877_v32 }
 0x1d0   : > { %4397 = vrsqrt.f32 %v879_v35  ;;  %vm887_vm2 = vweird.f32 %v879_v35 }
 0x1d3   : > { %v876_v36 = vpop.xlane.xlu1 %875 }
 0x1d4   : > { %v878_v37 = vmul.f32 %v876_v36, %v5256_v13 }
 0x1d6   : > { %v4398_v38 = vpop.eup %4397  ;;  %v880_v39 = vadd.f32 1e-08, %v878_v37 }
 0x1d7   : > { %v882_v40 = vmul.f32 %v4398_v38, %v879_v35  ;;  %vm888_vm1 = vweird.f32 %v4398_v38 }
 0x1d8   : > { %4399 = vrsqrt.f32 %v880_v39  ;;  %vm889_vm3 = vmor %vm887_vm2, %vm888_vm1  ;;  %vm897_vm5 = vweird.f32 %v880_v39 }
 0x1d9   : > { %v883_v41 = vmul.f32 %v4398_v38, %v882_v40 }
 0x1db   : > { %v884_v42 = vmul.f32 0.5, %v883_v41 }
 0x1dd   : > { %v885_v43 = vsub.f32 1.5, %v884_v42 }
 0x1de   : > { %v4400_v44 = vpop.eup %4399 }
 0x1df   : > { %v886_v45 = vmul.f32 %v4398_v38, %v885_v43  ;;  %v892_v46 = vmul.f32 %v4400_v44, %v880_v39  ;;  %vm898_vm4 = vweird.f32 %v4400_v44 }
 0x1e0   : > { %vm899_vm6 = vmor %vm897_vm5, %vm898_vm4 }
 0x1e1   : > { %v893_v47 = vmul.f32 %v4400_v44, %v892_v46  ;;  %v890_v48 = vsel %vm889_vm3, %v4398_v38, %v886_v45 }
 0x1e2   : > { %v901_v51 = vmul.f32 %v890_v48, %v5259_v16 }
 0x1e3   : > { %v894_v49 = vmul.f32 0.5, %v893_v47 }
 0x1e4   : > { %v906_v56 = vmul.f32 %v4389_v52, %v901_v51 }
 0x1e5   : > { %v895_v50 = vsub.f32 1.5, %v894_v49 }
 0x1e6   : > { %v911_v59 = vadd.f32 %v4390_v57, %v906_v56 }
 0x1e7   : > { %v896_v53 = vmul.f32 %v4400_v44, %v895_v50 }
 0x1e9   : > { %v900_v54 = vsel %vm899_vm6, %v4400_v44, %v896_v53 }
 0x1ea   : > { %v902_v55 = vmul.f32 %v900_v54, %v5264_v20 }
 0x1ec   : > { %v907_v58 = vmul.f32 %v4389_v52, %v902_v55 }
 0x1ee   : > { %v912_v60 = vadd.f32 %v4390_v57, %v907_v58 }
 0x1f0   : > { %v913_v61 = vpack.c.bf16 %v912_v60, %v911_v59 }
 0x1f2   : > { %1082 = vmatmul.bf16.vlgmr.msra.gmra.mxu0 %v913_v61  ;;  %1096 = vmatmul.bf16.vlgmr.msra.gmra.mxu1 %v913_v61 }
 0x1f3   : > { %1110 = vmatmul.bf16.vlgmr.msra.gmra.mxu2 %v913_v61 }
 0x26f   : > { %v1083_v62 = vpop.f32.mrf.mxu0  ;;  %v1097_v16 = vpop.f32.mrf.mxu1 }
 0x270   : > { %v1116_v63 = vpack.c.bf16 %v1097_v16, %v1083_v62 }
 0x272   : > { %1130 = vrot.lane.b32.xlu0 %v1116_v63, %s4878_s24  ;;  %1122 = vrot.lane.b32.xlu2 %v1116_v63, %s4879_s23  ;;  %v1137_v10 = vshrl.u32 %v1116_v63, 16  ;;  %v1363_v11 = vrot.slane %v1116_v63, 4 }
 0x274   : > { %v1374_v24 = vshrl.u32 %v1363_v11, 16 }
 0x277   : > { %v1085_v20 = vpop.f32.mrf.mxu0  ;;  %v1099_v0 = vpop.f32.mrf.mxu1 }
 0x278   : > { %v5326_v1 = vpack.c.bf16 %v1099_v0, %v1085_v20 }
 0x27a   : > { %1126 = vrot.lane.b32.xlu2 %v1116_v63, %s4880_s19  ;;  %1124 = vrot.lane.b32.xlu1 %v5326_v1, %s4879_s23  ;;  %v1364_v17 = vrot.slane %v5326_v1, 4  ;;  %v1149_v27 = vshrl.u32 %v5326_v1, 16 }
 0x27c   : > { %v5346_v28 = vshrl.u32 %v1364_v17, 16 }
 0x282   : > { %1128 = vrot.lane.b32.xlu2 %v5326_v1, %s4880_s19 }
 0x28a   : > { %1132 = vrot.lane.b32.xlu2 %v5326_v1, %s4878_s24 }
 0x2cc   : > { %v1123_v2 = vpop.permute.xlu2 %1122 }
 0x2cd   : > { %v1138_v6 = vshrl.u32 %v1123_v2, 16  ;;  %v1365_v7 = vrot.slane %v1123_v2, 4  ;;  %v1136_v9 = vpack.i.b16 %v1123_v2, %v1116_v63 }
 0x2cf   : > { %v1139_v14 = vpack.i.b16 %v1138_v6, %v1137_v10  ;;  %v1373_v15 = vpack.i.b16 %v1365_v7, %v1363_v11  ;;  %v1162_v18 = vperm.slane %v1136_v9, %v5335_v8  ;;  %v1375_v19 = vshrl.u32 %v1365_v7, 16 }
 0x2d1   : > { %v1189_v23 = vperm.slane %v1139_v14, %v5335_v8  ;;  %v1399_v25 = vperm.slane %v1373_v15, %v5335_v8  ;;  %v1171_v29 = vrot.slane %v1162_v18, 4  ;;  %v1376_v30 = vpack.i.b16 %v1375_v19, %v1374_v24 }
 0x2d3   : > { %v1197_v38 = vrot.slane %v1189_v23, 4  ;;  %v1407_v39 = vrot.slane %v1399_v25, 4  ;;  %v1425_v46 = vperm.slane %v1376_v30, %v5335_v8 }
 0x2d4   : > { %v1127_v3 = vpop.permute.xlu2 %1126 }
 0x2d5   : > { %v1367_v26 = vrot.slane %v1127_v3, 4  ;;  %v1143_v34 = vshrl.u32 %v1127_v3, 16  ;;  %v1433_v5 = vrot.slane %v1425_v46, 4 }
 0x2d7   : > { %v1380_v40 = vshrl.u32 %v1367_v26, 16 }
 0x2dc   : > { %v5337_v12 = vpop.permute.xlu2 %1128 }
 0x2dd   : > { %v1155_v47 = vshrl.u32 %v5337_v12, 16  ;;  %v1368_v48 = vrot.slane %v5337_v12, 4 }
 0x2df   : > { %v1392_v15 = vshrl.u32 %v1368_v48, 16 }
 0x2e4   : > { %v1131_v32 = vpop.permute.xlu0 %1130  ;;  %v1133_v33 = vpop.permute.xlu2 %1132 }
 0x2e5   : > { %v1142_v35 = vpack.i.b16 %v1131_v32, %v1127_v3  ;;  %v1144_v36 = vshrl.u32 %v1131_v32, 16  ;;  %v1369_v37 = vrot.slane %v1131_v32, 4  ;;  %v1154_v41 = vpack.i.b16 %v1133_v33, %v5337_v12 }
 0x2e6   : > { %v1156_v49 = vshrl.u32 %v1133_v33, 16  ;;  %v1370_v57 = vrot.slane %v1133_v33, 4 }
 0x2e7   : > { %v1145_v42 = vpack.i.b16 %v1144_v36, %v1143_v34  ;;  %v1167_v43 = vperm.slane %v1142_v35, %v5335_v8  ;;  %v1379_v44 = vpack.i.b16 %v1369_v37, %v1367_v26  ;;  %v1381_v45 = vshrl.u32 %v1369_v37, 16 }
 0x2e8   : > { %v1220_v56 = vperm.slane %v1154_v41, %v5335_v8  ;;  %v1157_v4 = vpack.i.b16 %v1156_v49, %v1155_v47  ;;  %v1393_v9 = vshrl.u32 %v1370_v57, 16  ;;  %v1391_v21 = vpack.i.b16 %v1370_v57, %v1368_v48 }
 0x2e9   : > { %v1168_v50 = vrot.slane %v1167_v43, 4  ;;  %v1172_v51 = vsel %vm1169_vm7, %v1167_v43, %v1171_v29  ;;  %v1194_v52 = vperm.slane %v1145_v42, %v5335_v8  ;;  %v1382_v53 = vpack.i.b16 %v1381_v45, %v1380_v40 }
 0x2ea   : > { %v1180_v54 = vperm.slane %v1172_v51, %v5348_v31  ;;  %v1404_v55 = vperm.slane %v1379_v44, %v5335_v8  ;;  %v1221_v19 = vrot.slane %v1220_v56, 4  ;;  %v1246_v29 = vperm.slane %v1157_v4, %v5335_v8 }
 0x2eb   : > { %v1170_v58 = vsel %vm1169_vm7, %v1168_v50, %v1162_v18  ;;  %v1195_v59 = vrot.slane %v1194_v52, 4  ;;  %v1198_v60 = vsel %vm1169_vm7, %v1194_v52, %v1197_v38  ;;  %v1430_v61 = vperm.slane %v1382_v53, %v5335_v8 }
 0x2ec   : > { %v5364_v62 = vperm.slane %v1170_v58, %v5348_v31  ;;  %v5366_v16 = vrot.slane %v1180_v54, 4  ;;  %v1206_v63 = vperm.slane %v1198_v60, %v5348_v31  ;;  %v1405_v20 = vrot.slane %v1404_v55, 4  ;;  %v1125_v22 = vpop.permute.xlu1 %1124 }
 0x2ed   : > { %v1196_v0 = vsel %vm1169_vm7, %v1195_v59, %v1189_v23  ;;  %v1408_v2 = vsel %vm1169_vm7, %v1404_v55, %v1407_v39  ;;  %v1431_v3 = vrot.slane %v1430_v61, 4  ;;  %v1434_v18 = vsel %vm1169_vm7, %v1430_v61, %v1433_v5 }
 0x2ee   : > { %v1181_v6 = vrot.slane %v5364_v62, 4  ;;  %v5372_v7 = vrot.slane %v1206_v63, 4  ;;  %v5376_v10 = vsel %vm1169_vm7, 0, %v5366_v16  ;;  %v5379_v11 = vperm.slane %v1196_v0, %v5348_v31 }
 0x2ef   : > { %v1406_v12 = vsel %vm1169_vm7, %v1405_v20, %v1399_v25  ;;  %v1416_v14 = vperm.slane %v1408_v2, %v5348_v31  ;;  %v1432_v26 = vsel %vm1169_vm7, %v1431_v3, %v1425_v46  ;;  %v1268_v30 = vrot.slane %v5376_v10, 4 }
 0x2f0   : > { %v5386_v23 = vsel %vm1169_vm7, 0, %v5372_v7  ;;  %v1412_v24 = vperm.slane %v1406_v12, %v5348_v31  ;;  %v5392_v25 = vsel %vm1169_vm7, 0, %v1181_v6  ;;  %v1394_v33 = vpack.i.b16 %v1393_v9, %v1392_v15 }
 0x2f1   : > { %v1419_v32 = vrot.slane %v1416_v14, 4  ;;  %v1207_v34 = vrot.slane %v5379_v11, 4  ;;  %v1442_v35 = vperm.slane %v1434_v18, %v5348_v31  ;;  %v1148_v36 = vpack.i.b16 %v1125_v22, %v5326_v1 }
 0x2f2   : > { %v1150_v37 = vshrl.u32 %v1125_v22, 16  ;;  %v1287_v38 = vrot.slane %v5386_v23, 4  ;;  %v1438_v39 = vperm.slane %v1432_v26, %v5348_v31  ;;  %v1456_v40 = vperm.slane %v1391_v21, %v5335_v8 }
 0x2f3   : > { %v1366_v41 = vrot.slane %v1125_v22, 4  ;;  %v1417_v42 = vrot.slane %v1412_v24, 4  ;;  %v1247_v43 = vrot.slane %v1246_v29, 4  ;;  %v1215_v45 = vperm.slane %v1148_v36, %v5335_v8 }
 0x2f4   : > { %v1151_v44 = vpack.i.b16 %v1150_v37, %v1149_v27  ;;  %v1420_v46 = vsel %vm1169_vm7, 0, %v1419_v32  ;;  %v1482_v47 = vperm.slane %v1394_v33, %v5335_v8  ;;  %v1445_v50 = vrot.slane %v1442_v35, 4 }
 0x2f5   : > { %v1385_v48 = vpack.i.b16 %v1366_v41, %v1364_v17  ;;  %v1387_v49 = vshrl.u32 %v1366_v41, 16  ;;  %v1222_v51 = vsel %vm1169_vm7, %v1221_v19, %v1215_v45  ;;  %v1223_v52 = vrot.slane %v1215_v45, 4 }
 0x2f6   : > { %v1241_v53 = vperm.slane %v1151_v44, %v5335_v8  ;;  %v1457_v54 = vrot.slane %v1456_v40, 4  ;;  %v5411_v55 = vperm.slane %v1222_v51, %v5348_v31  ;;  %v1504_v58 = vrot.slane %v1420_v46, 4 }
 0x2f7   : > { %v1388_v27 = vpack.i.b16 %v1387_v49, %v5346_v28  ;;  %v1451_v57 = vperm.slane %v1385_v48, %v5335_v8  ;;  %v1224_v59 = vsel %vm1169_vm7, %v1220_v56, %v1223_v52  ;;  %v1483_v60 = vrot.slane %v1482_v47, 4 }
 0x2f8   : > { %v1248_v1 = vsel %vm1169_vm7, %v1247_v43, %v1241_v53  ;;  %v1249_v17 = vrot.slane %v1241_v53, 4  ;;  %v1232_v61 = vperm.slane %v1224_v59, %v5348_v31  ;;  %v1443_v3 = vrot.slane %v1438_v39, 4 }
 0x2f9   : > { %v5419_v63 = vperm.slane %v1248_v1, %v5348_v31  ;;  %v1458_v20 = vsel %vm1169_vm7, %v1457_v54, %v1451_v57  ;;  %v1459_v2 = vrot.slane %v1451_v57, 4  ;;  %v1477_v28 = vperm.slane %v1388_v27, %v5335_v8 }
 0x2fa   : > { %v1250_v0 = vsel %vm1169_vm7, %v1246_v29, %v1249_v17  ;;  %v1233_v4 = vrot.slane %v5411_v55, 4  ;;  %v5425_v56 = vrot.slane %v1232_v61, 4  ;;  %v1499_v6 = vsel %vm1169_vm7, %v1419_v32, %v1412_v24 }
 0x2fb   : > { %v1258_v5 = vperm.slane %v1250_v0, %v5348_v31  ;;  %v1460_v9 = vsel %vm1169_vm7, %v1456_v40, %v1459_v2  ;;  %v1464_v12 = vperm.slane %v1458_v20, %v5348_v31  ;;  %v1484_v14 = vsel %vm1169_vm7, %v1483_v60, %v1477_v28 }
 0x2fc   : > { %v1485_v15 = vrot.slane %v1477_v28, 4  ;;  %v1236_v18 = vsel %vm1169_vm7, 0, %v5425_v56  ;;  %v1259_v19 = vrot.slane %v5419_v63, 4  ;;  %v1418_v22 = vsel %vm1169_vm7, 0, %v1417_v42 }
 0x2fd   : > { %v5435_v21 = vrot.slane %v1258_v5, 4  ;;  %v1446_v26 = vsel %vm1169_vm7, 0, %v1445_v50  ;;  %v1306_v29 = vrot.slane %v1236_v18, 4  ;;  %v1468_v24 = vperm.slane %v1460_v9, %v5348_v31 }
 0x2fe   : > { %v1486_v32 = vsel %vm1169_vm7, %v1482_v47, %v1485_v15  ;;  %v1490_v33 = vperm.slane %v1484_v14, %v5348_v31  ;;  %v1444_v36 = vsel %vm1169_vm7, 0, %v1443_v3  ;;  %v1503_v37 = vperm.slane %v1499_v6, %v5335_v8 }
 0x2ff   : > { %v1494_v35 = vperm.slane %v1486_v32, %v5348_v31  ;;  %v1234_v40 = vsel %vm1169_vm7, 0, %v1233_v4  ;;  %v1469_v41 = vrot.slane %v1464_v12, 4  ;;  %v1471_v43 = vrot.slane %v1468_v24, 4 }
 0x300   : > { %v1505_v42 = vsel %vm1169_vm7, %v1504_v58, %v1418_v22  ;;  %v5448_v44 = vsel %vm1169_vm7, 0, %v1259_v19  ;;  %v5452_v45 = vsel %vm1169_vm7, 0, %v5435_v21  ;;  %v1518_v47 = vsel %vm1169_vm7, %v1445_v50, %v1438_v39 }
 0x301   : > { %v1509_v46 = vperm.slane %v1505_v42, %v5335_v8  ;;  %v5457_v48 = vsel %vm1169_vm7, %v1306_v29, %v1234_v40  ;;  %v1472_v49 = vsel %vm1169_vm7, 0, %v1471_v43  ;;  %v1495_v51 = vrot.slane %v1490_v33, 4 }
 0x302   : > { %v1523_v52 = vrot.slane %v1446_v26, 4  ;;  %v1497_v53 = vrot.slane %v1494_v35, 4  ;;  %v1208_v27 = vsel %vm1169_vm7, 0, %v1207_v34  ;;  %v1263_v57 = vsel %vm1169_vm7, %v5366_v16, %v5364_v62 }
 0x303   : > { %v1510_v54 = vrot.slane %v1509_v46, 4  ;;  %v1542_v58 = vrot.slane %v1472_v49, 4  ;;  %v1522_v39 = vperm.slane %v1518_v47, %v5335_v8  ;;  %v1269_v59 = vsel %vm1169_vm7, %v1268_v30, %v5392_v25 }
 0x304   : > { %v1524_v50 = vsel %vm1169_vm7, %v1523_v52, %v1444_v36  ;;  %v1273_v34 = vperm.slane %v1269_v59, %v5335_v8  ;;  %v1282_v62 = vsel %vm1169_vm7, %v5372_v7, %v5379_v11  ;;  %v1267_v60 = vperm.slane %v1263_v57, %v5335_v8 }
 0x305   : > { %v1511_v1 = vsel %vm1169_vm7, %v1510_v54, %v1503_v37  ;;  %v1528_v17 = vperm.slane %v1524_v50, %v5335_v8  ;;  %v1288_v10 = vsel %vm1169_vm7, %v1287_v38, %v1208_v27  ;;  %v1470_v20 = vsel %vm1169_vm7, 0, %v1469_v41 }
 0x306   : > { %v1515_v16 = vperm.slane %v1511_v1, %v5348_v31  ;;  %v1274_v30 = vrot.slane %v1273_v34, 4  ;;  %v1292_v61 = vperm.slane %v1288_v10, %v5335_v8  ;;  %v1286_v2 = vperm.slane %v1282_v62, %v5335_v8 }
 0x307   : > { %v1529_v25 = vrot.slane %v1528_v17, 4  ;;  %v1498_v7 = vsel %vm1169_vm7, 0, %v1497_v53  ;;  %v1543_v11 = vsel %vm1169_vm7, %v1542_v58, %v1470_v20  ;;  %v1496_v38 = vsel %vm1169_vm7, 0, %v1495_v51 }
 0x308   : > { %v1516_v0 = vrot.slane %v1515_v16, 4  ;;  %v1275_v3 = vsel %vm1169_vm7, %v1274_v30, %v1267_v60  ;;  %v1293_v23 = vrot.slane %v1292_v61, 4  ;;  %v1537_v6 = vsel %vm1169_vm7, %v1471_v43, %v1464_v12 }
 0x309   : > { %v1530_v28 = vsel %vm1169_vm7, %v1529_v25, %v1522_v39  ;;  %v5493_v5 = vperm.slane %v1275_v3, %v5348_v31  ;;  %v1547_v9 = vperm.slane %v1543_v11, %v5335_v8  ;;  %v1578_v14 = vshrl.u32 %v1515_v16, 16 }
 0x30a   : > { %v1534_v4 = vperm.slane %v1530_v28, %v5348_v31  ;;  %v1517_v15 = vsel %vm1169_vm7, 0, %v1516_v0  ;;  %v1294_v18 = vsel %vm1169_vm7, %v1293_v23, %v1286_v2  ;;  %v1561_v19 = vrot.slane %v1498_v7, 4 }
 0x30b   : > { %v5500_v24 = vperm.slane %v1294_v18, %v5348_v31  ;;  %v1541_v32 = vperm.slane %v1537_v6, %v5335_v8  ;;  %v1548_v35 = vrot.slane %v1547_v9, 4  ;;  %v1556_v36 = vsel %vm1169_vm7, %v1497_v53, %v1490_v33 }
 0x30c   : > { %v1577_v22 = vpack.i.b16 %v1534_v4, %v1515_v16  ;;  %v1579_v26 = vshrl.u32 %v1534_v4, 16  ;;  %v1535_v29 = vrot.slane %v1534_v4, 4  ;;  %v1562_v12 = vsel %vm1169_vm7, %v1561_v19, %v1496_v38 }
 0x30d   : > { %v1280_v43 = vrot.slane %v5493_v5, 4  ;;  %v1584_v42 = vshrl.u32 %v1517_v15, 16  ;;  %v1549_v47 = vsel %vm1169_vm7, %v1548_v35, %v1541_v32  ;;  %v1566_v49 = vperm.slane %v1562_v12, %v5335_v8 }
 0x30e   : > { %v1846_v37 = vsel %vm1841_vm8, %v1577_v22, 0  ;;  %v1580_v40 = vpack.i.b16 %v1579_v26, %v1578_v14  ;;  %v1536_v41 = vsel %vm1169_vm7, 0, %v1535_v29  ;;  %v1553_v33 = vperm.slane %v1549_v47, %v5348_v31 }
 0x30f   : > { %1855 = vmatpush.bf16.xpose.msra.mxu3 %v1846_v37  ;;  %v1585_v46 = vshrl.u32 %v1536_v41, 16  ;;  %v1583_v52 = vpack.i.b16 %v1536_v41, %v1517_v15  ;;  %v1299_v53 = vrot.slane %v5500_v24, 4  ;;  %v1325_v54 = vrot.slane %v5452_v45, 4 }
 0x310   : > { %v1865_v51 = vsel %vm1841_vm8, %v1580_v40, 0  ;;  %v1560_v57 = vperm.slane %v1556_v36, %v5335_v8  ;;  %v1567_v58 = vrot.slane %v1566_v49, 4  ;;  %v5516_v39 = vsel %vm1169_vm7, 0, %v1280_v43 }
 0x311   : > { %v1586_v27 = vpack.i.b16 %v1585_v46, %v1584_v42  ;;  %v5519_v50 = vsel %vm1169_vm7, 0, %v1299_v53  ;;  %v1554_v59 = vrot.slane %v1553_v33, 4  ;;  %v1311_v1 = vperm.slane %v5457_v48, %v5335_v8  ;;  %v1111_v53 = vpop.f32.mrf.mxu2 }
 0x312   : > { %v1301_v17 = vsel %vm1169_vm7, %v5425_v56, %v5411_v55  ;;  %v1320_v45 = vsel %vm1169_vm7, %v5435_v21, %v5419_v63  ;;  %v1568_v62 = vsel %vm1169_vm7, %v1567_v58, %v1560_v57  ;;  %v1341_v16 = vpack.i.b16 %v5500_v24, %v5493_v5 }
 0x313   : > { %v1903_v34 = vsel %vm1841_vm8, %v1586_v27, 0  ;;  %v1884_v60 = vsel %vm1841_vm8, %v1583_v52, 0  ;;  %v1572_v48 = vperm.slane %v1568_v62, %v5348_v31  ;;  %v1349_v10 = vshrl.u32 %v5519_v50, 16 }
 0x314   : > { %1912 = vmatpush.bf16.xpose.msrb.mxu0 %v1903_v34  ;;  %v1348_v55 = vshrl.u32 %v5516_v39, 16  ;;  %v1590_v56 = vshrl.u32 %v1553_v33, 16  ;;  %v1312_v25 = vrot.slane %v1311_v1, 4  ;;  %v1326_v63 = vsel %vm1169_vm7, %v1325_v54, %v5448_v44 }
 0x315   : > { %v1589_v21 = vpack.i.b16 %v1572_v48, %v1553_v33  ;;  %v1591_v30 = vshrl.u32 %v1572_v48, 16  ;;  %v1555_v61 = vsel %vm1169_vm7, 0, %v1554_v59  ;;  %v1573_v20 = vrot.slane %v1572_v48, 4 }
 0x316   : > { %3836 = vmatmul.msk.bf16.vlgmr.msra.gmra.mxu3 %vm1841_vm8, %v1341_v16  ;;  %v1305_v0 = vperm.slane %v1301_v17, %v5335_v8  ;;  %v1324_v2 = vperm.slane %v1320_v45, %v5335_v8  ;;  %v1330_v7 = vperm.slane %v1326_v63, %v5335_v8  ;;  %v1350_v28 = vpack.i.b16 %v1349_v10, %v1348_v55 }
 0x317   : > { %1874 = vmatpush.bf16.xpose.msrb.mxu3 %v1865_v51  ;;  %v1922_v11 = vsel %vm1841_vm8, %v1589_v21, 0  ;;  %v1592_v3 = vpack.i.b16 %v1591_v30, %v1590_v56  ;;  %v1574_v44 = vsel %vm1169_vm7, 0, %v1573_v20  ;;  %v1596_v23 = vshrl.u32 %v1555_v61, 16 }
 0x318   : > { %1931 = vmatpush.bf16.xpose.msrb.mxu2 %v1922_v11  ;;  %v1597_v38 = vshrl.u32 %v1574_v44, 16  ;;  %v1313_v4 = vsel %vm1169_vm7, %v1312_v25, %v1305_v0  ;;  %v1331_v6 = vrot.slane %v1330_v7, 4  ;;  %v1343_v35 = vshrl.u32 %v5500_v24, 16 }
 0x319   : > { %v1941_v9 = vsel %vm1841_vm8, %v1592_v3, 0  ;;  %v1317_v18 = vperm.slane %v1313_v4, %v5348_v31  ;;  %v1342_v36 = vshrl.u32 %v5493_v5, 16  ;;  %v1595_v12 = vpack.i.b16 %v1574_v44, %v1555_v61  ;;  %v1113_v45 = vpop.f32.mrf.mxu2 }
 0x31a   : > { %v1598_v14 = vpack.i.b16 %v1597_v38, %v1596_v23  ;;  %v1332_v15 = vsel %vm1169_vm7, %v1331_v6, %v1324_v2  ;;  %v1347_v5 = vpack.i.b16 %v5519_v50, %v5516_v39  ;;  %v2002_v33 = vlaneseq }
 0x31b   : > { %3839 = vmatmul.msk.bf16.vlgmr.msrb.gmra.mxu0 %vm1841_vm8, %v1350_v28  ;;  %v1336_v19 = vperm.slane %v1332_v15, %v5348_v31  ;;  %v1318_v32 = vrot.slane %v1317_v18, 4  ;;  %v1344_v40 = vpack.i.b16 %v1343_v35, %v1342_v36  ;;  %v1960_v42 = vsel %vm1841_vm8, %v1595_v12, 0 }
 0x31c   : > { %v1979_v22 = vsel %vm1841_vm8, %v1598_v14, 0  ;;  %v1354_v24 = vshrl.u32 %v1317_v18, 16  ;;  %v2003_v54 = vshrl.u32 %v2002_v33, 7  ;;  %v2005_v27 = vand.u32 127, %v2002_v33 }
 0x31d   : > { %1988 = vmatpush.bf16.xpose.msra.mxu0 %v1979_v22  ;;  %v1337_v26 = vrot.slane %v1336_v19, 4  ;;  %v1353_v29 = vpack.i.b16 %v1336_v19, %v1317_v18  ;;  %v1319_v41 = vsel %vm1169_vm7, 0, %v1318_v32  ;;  %v1355_v49 = vshrl.u32 %v1336_v19, 16 }
 0x31e   : > { %v1360_v46 = vshrl.u32 %v1319_v41, 16  ;;  %vm5566_vm9 = vcmp.gt.s32.totalorder %v2005_v27, %v2003_v54  ;;  %v5599_v15 = vpack.c.bf16 %v1111_v53, %v1111_v53  ;;  %v1119_v22 = vpack.c.bf16 %v1113_v45, %v1113_v45 }
 0x31f   : > { %1893 = vmatpush.bf16.xpose.msra.mxu3 %v1884_v60  ;;  %3840 = vmatmul.msk.bf16.vlgmr.msrb.gmra.mxu2 %vm1841_vm8, %v1353_v29  ;;  %v1338_v37 = vsel %vm1169_vm7, 0, %v1337_v26  ;;  %v1356_v51 = vpack.i.b16 %v1355_v49, %v1354_v24 }
 0x320   : > { %1950 = vmatpush.bf16.xpose.msra.mxu2 %v1941_v9  ;;  %v1361_v43 = vshrl.u32 %v1338_v37, 16  ;;  %v1359_v52 = vpack.i.b16 %v1338_v37, %v1319_v41 }
 0x322   : > { %v1362_v47 = vpack.i.b16 %v1361_v43, %v1360_v46 }
 0x326   : > { %3837 = vmatmul.msk.bf16.vlgmr.msrb.gmra.mxu3 %vm1841_vm8, %v1344_v40 }
 0x327   : > { %1969 = vmatpush.bf16.xpose.msrb.mxu3 %v1960_v42 }
 0x32b   : > { %3843 = vmatmul.msk.bf16.vlgmr.msra.gmra.mxu0 %vm1841_vm8, %v1362_v47 }
 0x32f   : > { %3841 = vmatmul.msk.bf16.vlgmr.msra.gmra.mxu2 %vm1841_vm8, %v1356_v51 }
 0x336   : > { %3838 = vmatmul.msk.bf16.vlgmr.msra.gmra.mxu3 %vm1841_vm8, %v1347_v5 }
 0x346   : > { %3842 = vmatmul.msk.bf16.vlgmr.msrb.gmra.mxu3 %vm1841_vm8, %v1359_v52 }
 0x398   : > { %v1914_v57 = vpop.f32.mrf.mxu0 }
 0x399   : > { %v1997_v59 = vmul.f32 0.17677669, %v1914_v57  ;;  %v1857_v1 = vpop.f32.mrf.mxu3 }
 0x39a   : > { %v1994_v17 = vmul.f32 0.17677669, %v1857_v1 }
 0x39b   : > { %v5572_v39 = vsel %vm5566_vm9, -1e+30, %v1997_v59 }
 0x39c   : > { %v2027_v50 = vsel %vm2017_vm10, %v5572_v39, -inf  ;;  %v2009_v34 = vsel %vm5566_vm9, -1e+30, %v1994_v17 }
 0x39d   : > { %2028 = vmax.xlane.f32.xlu2 %v2027_v50  ;;  %v2018_v62 = vsel %vm2017_vm10, %v2009_v34, -inf }
 0x39e   : > { %2019 = vmax.xlane.f32.xlu1 %v2018_v62 }
 0x3a0   : > { %v1916_v16 = vpop.f32.mrf.mxu0 }
 0x3a1   : > { %v1859_v60 = vpop.f32.mrf.mxu3 }
 0x3a2   : > { %v1933_v48 = vpop.f32.mrf.mxu2 }
 0x3a3   : > { %v1998_v10 = vmul.f32 0.17677669, %v1933_v48 }
 0x3a5   : > { %v5581_v55 = vsel %vm5566_vm9, -1e+30, %v1998_v10 }
 0x3a6   : > { %v2030_v56 = vsel %vm2017_vm10, %v5581_v55, -inf }
 0x3a7   : > { %2031 = vmax.xlane.f32.xlu1 %v2030_v56 }
 0x3a8   : > { %v1990_v25 = vpop.f32.mrf.mxu0 }
 0x3a9   : > { %v2001_v63 = vmul.f32 0.17677669, %v1990_v25  ;;  %v1876_v21 = vpop.f32.mrf.mxu3 }
 0x3aa   : > { %v1935_v30 = vpop.f32.mrf.mxu2  ;;  %v1995_v0 = vmul.f32 0.17677669, %v1876_v21 }
 0x3ab   : > { %v5587_v61 = vsel %vm5566_vm9, -1e+30, %v2001_v63  ;;  %v1628_v63 = vshrl.u32 %v1119_v22, 16 }
 0x3ac   : > { %v2039_v20 = vsel %vm2017_vm10, %v5587_v61, -inf  ;;  %v2010_v11 = vsel %vm5566_vm9, -1e+30, %v1995_v0 }
 0x3ad   : > { %2040 = vmax.xlane.f32.xlu0 %v2039_v20  ;;  %v2021_v44 = vsel %vm2017_vm10, %v2010_v11, -inf }
 0x3b0   : > { %v1992_v2 = vpop.f32.mrf.mxu0 }
 0x3b1   : > { %v1878_v7 = vpop.f32.mrf.mxu3 }
 0x3b2   : > { %v1952_v28 = vpop.f32.mrf.mxu2 }
 0x3b3   : > { %v1999_v3 = vmul.f32 0.17677669, %v1952_v28 }
 0x3b5   : > { %2022 = vmax.xlane.f32.xlu0 %v2021_v44  ;;  %v2014_v23 = vsel %vm5566_vm9, -1e+30, %v1999_v3 }
 0x3b6   : > { %v2033_v38 = vsel %vm2017_vm10, %v2014_v23, -inf }
 0x3b7   : > { %2034 = vmax.xlane.f32.xlu2 %v2033_v38 }
 0x3b9   : > { %v1895_v4 = vpop.f32.mrf.mxu3 }
 0x3ba   : > { %v1996_v6 = vmul.f32 0.17677669, %v1895_v4  ;;  %v1954_v9 = vpop.f32.mrf.mxu2 }
 0x3bc   : > { %v2011_v14 = vsel %vm5566_vm9, -1e+30, %v1996_v6 }
 0x3bd   : > { %v2024_v18 = vsel %vm2017_vm10, %v2011_v14, -inf }
 0x3bf   : > { %2025 = vmax.xlane.f32.xlu2 %v2024_v18 }
 0x3c0   : > { %1605 = vrot.lane.b32.xlu1 %v5599_v15, %s4880_s19 }
 0x3c1   : > { %v1897_v19 = vpop.f32.mrf.mxu3 }
 0x3c2   : > { %v1616_v19 = vshrl.u32 %v5599_v15, 16 }
 0x3c8   : > { %1603 = vrot.lane.b32.xlu1 %v1119_v22, %s4879_s23 }
 0x3c9   : > { %v1971_v26 = vpop.f32.mrf.mxu3 }
 0x3ca   : > { %v2000_v29 = vmul.f32 0.17677669, %v1971_v26 }
 0x3cc   : > { %v2015_v32 = vsel %vm5566_vm9, -1e+30, %v2000_v29 }
 0x3cd   : > { %v2036_v35 = vsel %vm2017_vm10, %v2015_v32, -inf }
 0x3ce   : > { %2037 = vmax.xlane.f32.xlu0 %v2036_v35 }
 0x3d0   : > { %1607 = vrot.lane.b32.xlu1 %v1119_v22, %s4880_s19 }
 0x3d1   : > { %v1973_v36 = vpop.f32.mrf.mxu3 }
 0x3d7   : > { %1601 = vrot.lane.b32.xlu2 %v5599_v15, %s4879_s23 }
 0x3d8   : > { %1611 = vrot.lane.b32.xlu1 %v1119_v22, %s4878_s24 }
 0x3e2   : > { %1609 = vrot.lane.b32.xlu0 %v5599_v15, %s4878_s24 }
 0x410   : > { %v2029_v46 = vpop.xlane.xlu2 %2028 }
 0x411   : > { %v2020_v12 = vpop.xlane.xlu1 %2019  ;;  %v2045_v57 = vsub.f32 %v5572_v39, %v2029_v46 }
 0x412   : > { %v2042_v37 = vsub.f32 %v2009_v34, %v2020_v12 }
 0x413   : > { %v2056_v59 = vmul.f32 1.442695, %v2045_v57 }
 0x414   : > { %v2050_v40 = vmul.f32 1.442695, %v2042_v37 }
 0x416   : > { %4401 = vpow2.f32 %v2050_v40 }
 0x41a   : > { %v2032_v24 = vpop.xlane.xlu1 %2031 }
 0x41b   : > { %v2046_v60 = vsub.f32 %v5581_v55, %v2032_v24 }
 0x41c   : > { %v5614_v41 = vpop.eup %4401 }
 0x41d   : > { %v2066_v43 = vsel %vm2017_vm10, %v5614_v41, 0.0  ;;  %v2058_v30 = vmul.f32 1.442695, %v2046_v60 }
 0x41e   : > { %2067 = vadd.xlane.f32.xlu1 %v2066_v43 }
 0x420   : > { %v2041_v42 = vpop.xlane.xlu0 %2040 }
 0x421   : > { %v2049_v25 = vsub.f32 %v5587_v61, %v2041_v42 }
 0x423   : > { %v2064_v2 = vmul.f32 1.442695, %v2049_v25 }
 0x428   : > { %v2023_v47 = vpop.xlane.xlu0 %2022 }
 0x429   : > { %v2043_v49 = vsub.f32 %v2010_v11, %v2023_v47 }
 0x42a   : > { %v2035_v5 = vpop.xlane.xlu2 %2034 }
 0x42b   : > { %v2052_v51 = vmul.f32 1.442695, %v2043_v49  ;;  %v2047_v17 = vsub.f32 %v2014_v23, %v2035_v5 }
 0x42d   : > { %4403 = vpow2.f32 %v2052_v51  ;;  %v2060_v34 = vmul.f32 1.442695, %v2047_v17 }
 0x432   : > { %v5620_v33 = vpop.permute.xlu1 %1605  ;;  %v2026_v53 = vpop.xlane.xlu2 %2025 }
 0x433   : > { %v5618_v52 = vpop.eup %4403  ;;  %v2044_v54 = vsub.f32 %v2011_v14, %v2026_v53  ;;  %v1622_v51 = vshrl.u32 %v5620_v33, 16 }
 0x434   : > { %v2069_v27 = vsel %vm2017_vm10, %v5618_v52, 0.0 }
 0x435   : > { %2070 = vadd.xlane.f32.xlu0 %v2069_v27  ;;  %v2054_v58 = vmul.f32 1.442695, %v2044_v54 }
 0x437   : > { %4405 = vpow2.f32 %v2054_v58 }
 0x438   : > { %4407 = vpow2.f32 %v2056_v59 }
 0x439   : > { %4409 = vpow2.f32 %v2060_v34 }
 0x43a   : > { %v1604_v1 = vpop.permute.xlu1 %1603  ;;  %v1602_v11 = vpop.permute.xlu2 %1601 }
 0x43b   : > { %v1629_v39 = vshrl.u32 %v1604_v1, 16  ;;  %v1627_v21 = vpack.i.b16 %v1604_v1, %v1119_v22  ;;  %v1617_v9 = vshrl.u32 %v1602_v11, 16  ;;  %v1615_v22 = vpack.i.b16 %v1602_v11, %v5599_v15 }
 0x43d   : > { %v5625_v45 = vpop.eup %4405  ;;  %v1630_v0 = vpack.i.b16 %v1629_v39, %v1628_v63  ;;  %v1693_v55 = vperm.slane %v1627_v21, %v5335_v8  ;;  %v1618_v40 = vpack.i.b16 %v1617_v9, %v1616_v19  ;;  %v1641_v5 = vperm.slane %v1615_v22, %v5335_v8 }
 0x43e   : > { %v2072_v50 = vsel %vm2017_vm10, %v5625_v45, 0.0  ;;  %v5630_v10 = vpop.eup %4407 }
 0x43f   : > { %2073 = vadd.xlane.f32.xlu2 %v2072_v50  ;;  %v2075_v20 = vsel %vm2017_vm10, %v5630_v10, 0.0  ;;  %v5636_v7 = vpop.eup %4409  ;;  %v1719_v61 = vperm.slane %v1630_v0, %v5335_v8  ;;  %v1701_v6 = vrot.slane %v1693_v55, 4  ;;  %v1667_v17 = vperm.slane %v1618_v40, %v5335_v8 }
 0x440   : > { %v2081_v26 = vsel %vm2017_vm10, %v5636_v7, 0.0  ;;  %v1649_v21 = vrot.slane %v1641_v5, 4 }
 0x441   : > { %v2038_v62 = vpop.xlane.xlu0 %2037  ;;  %v1727_v29 = vrot.slane %v1719_v61, 4  ;;  %v1675_v0 = vrot.slane %v1667_v17, 4 }
 0x442   : > { %v2048_v16 = vsub.f32 %v2015_v32, %v2038_v62  ;;  %v1608_v48 = vpop.permute.xlu1 %1607 }
 0x443   : > { %v1634_v44 = vshrl.u32 %v1608_v48, 16 }
 0x444   : > { %v2062_v56 = vmul.f32 1.442695, %v2048_v16 }
 0x446   : > { %4411 = vpow2.f32 %v2062_v56 }
 0x447   : > { %2076 = vadd.xlane.f32.xlu2 %v2075_v20  ;;  %4413 = vpow2.f32 %v2058_v30 }
 0x448   : > { %4415 = vpow2.f32 %v2064_v2 }
 0x44a   : > { %v1612_v28 = vpop.permute.xlu1 %1611 }
 0x44b   : > { %v1633_v23 = vpack.i.b16 %v1612_v28, %v1608_v48  ;;  %v1635_v38 = vshrl.u32 %v1612_v28, 16 }
 0x44c   : > { %v5638_v3 = vpop.eup %4411 }
 0x44d   : > { %v2084_v4 = vsel %vm2017_vm10, %v5638_v3, 0.0  ;;  %v1636_v14 = vpack.i.b16 %v1635_v38, %v1634_v44  ;;  %v1698_v18 = vperm.slane %v1633_v23, %v5335_v8  ;;  %v5650_v12 = vpop.eup %4413 }
 0x44e   : > { %2085 = vadd.xlane.f32.xlu0 %v2084_v4  ;;  %v5655_v46 = vpop.eup %4415  ;;  %v2078_v27 = vsel %vm2017_vm10, %v5650_v12, 0.0 }
 0x44f   : > { %v1699_v32 = vrot.slane %v1698_v18, 4  ;;  %v1702_v35 = vsel %vm1169_vm7, %v1698_v18, %v1701_v6  ;;  %v1724_v36 = vperm.slane %v1636_v14, %v5335_v8  ;;  %2082 = vadd.xlane.f32.xlu2 %v2081_v26  ;;  %v2087_v39 = vsel %vm2017_vm10, %v5655_v46, 0.0 }
 0x450   : > { %v1710_v37 = vperm.slane %v1702_v35, %v5348_v31 }
 0x451   : > { %v1700_v43 = vsel %vm1169_vm7, %v1699_v32, %v1693_v55  ;;  %v1725_v42 = vrot.slane %v1724_v36, 4  ;;  %v1728_v15 = vsel %vm1169_vm7, %v1724_v36, %v1727_v29 }
 0x452   : > { %v1706_v47 = vperm.slane %v1700_v43, %v5348_v31  ;;  %v1713_v49 = vrot.slane %v1710_v37, 4  ;;  %v1736_v24 = vperm.slane %v1728_v15, %v5348_v31 }
 0x453   : > { %v1726_v53 = vsel %vm1169_vm7, %v1725_v42, %v1719_v61 }
 0x454   : > { %v1610_v54 = vpop.permute.xlu0 %1609  ;;  %v1711_v57 = vrot.slane %v1706_v47, 4  ;;  %v1714_v58 = vsel %vm1169_vm7, 0, %v1713_v49  ;;  %v1732_v59 = vperm.slane %v1726_v53, %v5348_v31  ;;  %v1739_v1 = vrot.slane %v1736_v24, 4 }
 0x455   : > { %v1784_v50 = vrot.slane %v1714_v58, 4  ;;  %v1621_v34 = vpack.i.b16 %v1610_v54, %v5620_v33  ;;  %v1623_v62 = vshrl.u32 %v1610_v54, 16  ;;  %v1779_v28 = vsel %vm1169_vm7, %v1713_v49, %v1706_v47 }
 0x456   : > { %2079 = vadd.xlane.f32.xlu0 %v2078_v27  ;;  %v1712_v16 = vsel %vm1169_vm7, 0, %v1711_v57  ;;  %v1737_v60 = vrot.slane %v1732_v59, 4  ;;  %v1740_v48 = vsel %vm1169_vm7, 0, %v1739_v1  ;;  %v1798_v2 = vsel %vm1169_vm7, %v1739_v1, %v1732_v59 }
 0x457   : > { %v1785_v56 = vsel %vm1169_vm7, %v1784_v50, %v1712_v16  ;;  %v1803_v25 = vrot.slane %v1740_v48, 4  ;;  %v1624_v63 = vpack.i.b16 %v1623_v62, %v1622_v51  ;;  %2088 = vadd.xlane.f32.xlu2 %v2087_v39  ;;  %v1646_v33 = vperm.slane %v1621_v34, %v5335_v8 }
 0x458   : > { %v1738_v30 = vsel %vm1169_vm7, 0, %v1737_v60  ;;  %v1789_v20 = vperm.slane %v1785_v56, %v5335_v8  ;;  %v1802_v19 = vperm.slane %v1798_v2, %v5335_v8  ;;  %v1783_v26 = vperm.slane %v1779_v28, %v5335_v8 }
 0x459   : > { %v1672_v55 = vperm.slane %v1624_v63, %v5335_v8  ;;  %v1804_v11 = vsel %vm1169_vm7, %v1803_v25, %v1738_v30  ;;  %v1647_v61 = vrot.slane %v1646_v33, 4  ;;  %v1650_v44 = vsel %vm1169_vm7, %v1646_v33, %v1649_v21 }
 0x45a   : > { %v1808_v23 = vperm.slane %v1804_v11, %v5335_v8  ;;  %v1658_v38 = vperm.slane %v1650_v44, %v5348_v31  ;;  %v1790_v9 = vrot.slane %v1789_v20, 4 }
 0x45b   : > { %v1673_v4 = vrot.slane %v1672_v55, 4  ;;  %v1676_v6 = vsel %vm1169_vm7, %v1672_v55, %v1675_v0  ;;  %v1648_v14 = vsel %vm1169_vm7, %v1647_v61, %v1641_v5 }
 0x45c   : > { %v1684_v18 = vperm.slane %v1676_v6, %v5348_v31  ;;  %v1809_v22 = vrot.slane %v1808_v23, 4  ;;  %v1654_v29 = vperm.slane %v1648_v14, %v5348_v31  ;;  %v1661_v32 = vrot.slane %v1658_v38, 4 }
 0x45d   : > { %v1674_v35 = vsel %vm1169_vm7, %v1673_v4, %v1667_v17  ;;  %v1791_v15 = vsel %vm1169_vm7, %v1790_v9, %v1783_v26 }
 0x45e   : > { %v1680_v36 = vperm.slane %v1674_v35, %v5348_v31  ;;  %v1687_v37 = vrot.slane %v1684_v18, 4  ;;  %v1810_v40 = vsel %vm1169_vm7, %v1809_v22, %v1802_v19  ;;  %v1659_v43 = vrot.slane %v1654_v29, 4 }
 0x45f   : > { %v1662_v42 = vsel %vm1169_vm7, 0, %v1661_v32  ;;  %v1814_v51 = vperm.slane %v1810_v40, %v5348_v31  ;;  %v1741_v27 = vsel %vm1169_vm7, %v1661_v32, %v1654_v29  ;;  %v1795_v58 = vperm.slane %v1791_v15, %v5348_v31 }
 0x460   : > { %v1685_v47 = vrot.slane %v1680_v36, 4  ;;  %v1688_v49 = vsel %vm1169_vm7, 0, %v1687_v37  ;;  %v1746_v24 = vrot.slane %v1662_v42, 4  ;;  %v1660_v5 = vsel %vm1169_vm7, 0, %v1659_v43 }
 0x461   : > { %v1765_v53 = vrot.slane %v1688_v49, 4  ;;  %v1760_v1 = vsel %vm1169_vm7, %v1687_v37, %v1680_v36  ;;  %v1815_v34 = vrot.slane %v1814_v51, 4  ;;  %v1745_v62 = vperm.slane %v1741_v27, %v5335_v8 }
 0x462   : > { %v1686_v54 = vsel %vm1169_vm7, 0, %v1685_v47  ;;  %v1747_v57 = vsel %vm1169_vm7, %v1746_v24, %v1660_v5  ;;  %v1764_v60 = vperm.slane %v1760_v1, %v5335_v8  ;;  %v1796_v39 = vrot.slane %v1795_v58, 4 }
 0x463   : > { %v1751_v59 = vperm.slane %v1747_v57, %v5335_v8  ;;  %v1766_v17 = vsel %vm1169_vm7, %v1765_v53, %v1686_v54  ;;  %v1816_v25 = vsel %vm1169_vm7, 0, %v1815_v34  ;;  %v1833_v30 = vshrl.u32 %v1814_v51, 16 }
 0x464   : > { %v1770_v50 = vperm.slane %v1766_v17, %v5335_v8  ;;  %v1831_v20 = vpack.i.b16 %v1814_v51, %v1795_v58  ;;  %v1832_v2 = vshrl.u32 %v1795_v58, 16  ;;  %v1797_v55 = vsel %vm1169_vm7, 0, %v1796_v39 }
 0x465   : > { %v1752_v16 = vrot.slane %v1751_v59, 4  ;;  %v1839_v11 = vshrl.u32 %v1816_v25, 16  ;;  %v1837_v6 = vpack.i.b16 %v1816_v25, %v1797_v55  ;;  %v1838_v19 = vshrl.u32 %v1797_v55, 16 }
 0x466   : > { %v1771_v48 = vrot.slane %v1770_v50, 4  ;;  %v1834_v4 = vpack.i.b16 %v1833_v30, %v1832_v2  ;;  %v2299_v22 = vsel %vm2221_vm11, %v1831_v20, 0 }
 0x467   : > { %v1753_v56 = vsel %vm1169_vm7, %v1752_v16, %v1745_v62  ;;  %v1840_v36 = vpack.i.b16 %v1839_v11, %v1838_v19  ;;  %v2337_v42 = vsel %vm2221_vm11, %v1837_v6, 0 }
 0x468   : > { %v1757_v63 = vperm.slane %v1753_v56, %v5348_v31  ;;  %v1772_v21 = vsel %vm1169_vm7, %v1771_v48, %v1764_v60  ;;  %v2318_v40 = vsel %vm2221_vm11, %v1834_v4, 0 }
 0x469   : > { %v1776_v33 = vperm.slane %v1772_v21, %v5348_v31  ;;  %v2356_v47 = vsel %vm2221_vm11, %v1840_v36, 0 }
 0x46a   : > { %v1758_v0 = vrot.slane %v1757_v63, 4  ;;  %v1820_v61 = vshrl.u32 %v1757_v63, 16 }
 0x46b   : > { %v1819_v28 = vpack.i.b16 %v1776_v33, %v1757_v63  ;;  %v1821_v44 = vshrl.u32 %v1776_v33, 16  ;;  %v1777_v23 = vrot.slane %v1776_v33, 4 }
 0x46c   : > { %v1759_v38 = vsel %vm1169_vm7, 0, %v1758_v0 }
 0x46d   : > { %v2223_v9 = vsel %vm2221_vm11, %v1819_v28, 0  ;;  %v1822_v14 = vpack.i.b16 %v1821_v44, %v1820_v61  ;;  %v1778_v18 = vsel %vm1169_vm7, 0, %v1777_v23  ;;  %v1826_v29 = vshrl.u32 %v1759_v38, 16 }
 0x46e   : > { %2232 = vmatpush.bf16.msrb.mxu1 %v2223_v9  ;;  %v1825_v26 = vpack.i.b16 %v1778_v18, %v1759_v38  ;;  %v1827_v32 = vshrl.u32 %v1778_v18, 16 }
 0x46f   : > { %v2242_v35 = vsel %vm2221_vm11, %v1822_v14, 0 }
 0x470   : > { %2251 = vmatpush.bf16.msrb.mxu2 %v2242_v35  ;;  %v2261_v37 = vsel %vm2221_vm11, %v1825_v26, 0  ;;  %v1828_v43 = vpack.i.b16 %v1827_v32, %v1826_v29 }
 0x471   : > { %2270 = vmatpush.bf16.msra.mxu3 %v2261_v37 }
 0x472   : > { %2308 = vmatpush.bf16.msra.mxu1 %v2299_v22  ;;  %v2280_v15 = vsel %vm2221_vm11, %v1828_v43, 0 }
 0x473   : > { %2289 = vmatpush.bf16.msrb.mxu0 %v2280_v15 }
 0x474   : > { %2327 = vmatpush.bf16.msra.mxu2 %v2318_v40 }
 0x475   : > { %2346 = vmatpush.bf16.msrb.mxu3 %v2337_v42 }
 0x477   : > { %2365 = vmatpush.bf16.msra.mxu0 %v2356_v47 }
 0x491   : > { %v2068_v49 = vpop.xlane.xlu1 %2067 }
 0x492   : > { %4417 = vrcp.f32 %v2068_v49  ;;  %v2101_v53 = vand.u32 2147483648, %v2068_v49  ;;  %v2099_v27 = vand.u32 2147483647, %v2068_v49  ;;  %vm2095_vm13 = vweird.f32 %v2068_v49 }
 0x494   : > { %v2102_v58 = vor.u32 1.1754944e-38, %v2101_v53  ;;  %vm2100_vm15 = vcmp.eq.f32.partialorder %v2099_v27, 8.507059e+37 }
 0x498   : > { %v4418_v24 = vpop.eup %4417 }
 0x499   : > { %v2091_v51 = vmul.f32 %v4418_v24, %v2068_v49  ;;  %vm2096_vm12 = vweird.f32 %v4418_v24 }
 0x49a   : > { %vm2097_vm14 = vmor %vm2095_vm13, %vm2096_vm12 }
 0x49b   : > { %v2092_v5 = vsub.f32 1.0, %v2091_v51 }
 0x49d   : > { %v2093_v54 = vmul.f32 %v4418_v24, %v2092_v5 }
 0x49f   : > { %v2094_v57 = vadd.f32 %v4418_v24, %v2093_v54 }
 0x4a1   : > { %v2098_v59 = vsel %vm2097_vm14, %v4418_v24, %v2094_v57 }
 0x4a2   : > { %v2103_v1 = vsel %vm2100_vm15, %v2102_v58, %v2098_v59 }
 0x4a3   : > { %v2104_v17 = vmul.f32 %v5614_v41, %v2103_v1 }
 0x4a5   : > { %v2210_v50 = vpack.c.bf16 %v2104_v17, %v2104_v17 }
 0x4a7   : > { %3844 = vmatmul.msk.bf16.vlgmr.msrb.gmra.mxu1 %vm2017_vm10, %v2210_v50 }
 0x4a8   : > { %v2071_v34 = vpop.xlane.xlu0 %2070 }
 0x4a9   : > { %4419 = vrcp.f32 %v2071_v34  ;;  %v2116_v48 = vand.u32 2147483648, %v2071_v34  ;;  %v2114_v25 = vand.u32 2147483647, %v2071_v34  ;;  %vm2110_vm1 = vweird.f32 %v2071_v34 }
 0x4ab   : > { %v2117_v21 = vor.u32 1.1754944e-38, %v2116_v48  ;;  %vm2115_vm3 = vcmp.eq.f32.partialorder %v2114_v25, 8.507059e+37 }
 0x4af   : > { %v4420_v62 = vpop.eup %4419 }
 0x4b0   : > { %v2106_v16 = vmul.f32 %v4420_v62, %v2071_v34  ;;  %vm2111_vm0 = vweird.f32 %v4420_v62 }
 0x4b1   : > { %vm2112_vm2 = vmor %vm2110_vm1, %vm2111_vm0 }
 0x4b2   : > { %v2107_v60 = vsub.f32 1.0, %v2106_v16  ;;  %v2074_v39 = vpop.xlane.xlu2 %2073 }
 0x4b3   : > { %4421 = vrcp.f32 %v2074_v39  ;;  %v2131_v28 = vand.u32 2147483648, %v2074_v39  ;;  %v2129_v44 = vand.u32 2147483647, %v2074_v39  ;;  %vm2125_vm5 = vweird.f32 %v2074_v39 }
 0x4b4   : > { %v2108_v56 = vmul.f32 %v4420_v62, %v2107_v60 }
 0x4b5   : > { %v2132_v6 = vor.u32 1.1754944e-38, %v2131_v28  ;;  %vm2130_vm9 = vcmp.eq.f32.partialorder %v2129_v44, 8.507059e+37 }
 0x4b6   : > { %v2109_v63 = vadd.f32 %v4420_v62, %v2108_v56 }
 0x4b8   : > { %v2113_v30 = vsel %vm2112_vm2, %v4420_v62, %v2109_v63 }
 0x4b9   : > { %v2118_v41 = vsel %vm2115_vm3, %v2117_v21, %v2113_v30  ;;  %v4422_v33 = vpop.eup %4421 }
 0x4ba   : > { %v2119_v20 = vmul.f32 %v5618_v52, %v2118_v41  ;;  %v2121_v0 = vmul.f32 %v4422_v33, %v2074_v39  ;;  %v2077_v2 = vpop.xlane.xlu2 %2076  ;;  %vm2126_vm4 = vweird.f32 %v4422_v33 }
 0x4bb   : > { %4423 = vrcp.f32 %v2077_v2  ;;  %vm2127_vm6 = vmor %vm2125_vm5, %vm2126_vm4  ;;  %v2146_v26 = vand.u32 2147483648, %v2077_v2  ;;  %v2144_v32 = vand.u32 2147483647, %v2077_v2  ;;  %vm2140_vm12 = vweird.f32 %v2077_v2 }
 0x4bc   : > { %v2122_v55 = vsub.f32 1.0, %v2121_v0  ;;  %v2211_v11 = vpack.c.bf16 %v2119_v20, %v2119_v20 }
 0x4bd   : > { %v2147_v15 = vor.u32 1.1754944e-38, %v2146_v26  ;;  %vm2145_vm14 = vcmp.eq.f32.partialorder %v2144_v32, 8.507059e+37 }
 0x4be   : > { %v2123_v61 = vmul.f32 %v4422_v33, %v2122_v55  ;;  %3845 = vmatmul.msk.bf16.vlgmr.msrb.gmra.mxu2 %vm2017_vm10, %v2211_v11 }
 0x4c0   : > { %v2124_v23 = vadd.f32 %v4422_v33, %v2123_v61 }
 0x4c1   : > { %v2086_v38 = vpop.xlane.xlu0 %2085  ;;  %v4424_v4 = vpop.eup %4423 }
 0x4c2   : > { %4425 = vrcp.f32 %v2086_v38  ;;  %v2128_v9 = vsel %vm2127_vm6, %v4422_v33, %v2124_v23  ;;  %v2136_v52 = vmul.f32 %v4424_v4, %v2077_v2  ;;  %v2083_v14 = vpop.xlane.xlu2 %2082  ;;  %vm2141_vm11 = vweird.f32 %v4424_v4 }
 0x4c3   : > { %v2133_v18 = vsel %vm2130_vm9, %v2132_v6, %v2128_v9  ;;  %4427 = vrcp.f32 %v2083_v14  ;;  %vm2142_vm13 = vmor %vm2140_vm12, %vm2141_vm11  ;;  %v2189_v5 = vand.u32 2147483647, %v2086_v38  ;;  %v2191_v53 = vand.u32 2147483648, %v2086_v38 }
 0x4c4   : > { %v2134_v19 = vmul.f32 %v5625_v45, %v2133_v18  ;;  %v2137_v22 = vsub.f32 1.0, %v2136_v52  ;;  %vm2185_vm0 = vweird.f32 %v2086_v38  ;;  %v2174_v58 = vand.u32 2147483647, %v2083_v14 }
 0x4c5   : > { %v2176_v59 = vand.u32 2147483648, %v2083_v14  ;;  %vm2190_vm3 = vcmp.eq.f32.partialorder %v2189_v5, 8.507059e+37  ;;  %v2192_v62 = vor.u32 1.1754944e-38, %v2191_v53  ;;  %vm2170_vm4 = vweird.f32 %v2083_v14 }
 0x4c6   : > { %v2138_v29 = vmul.f32 %v4424_v4, %v2137_v22  ;;  %v2212_v35 = vpack.c.bf16 %v2134_v19, %v2134_v19  ;;  %vm2175_vm6 = vcmp.eq.f32.partialorder %v2174_v58, 8.507059e+37 }
 0x4c7   : > { %v2177_v56 = vor.u32 1.1754944e-38, %v2176_v59 }
 0x4c8   : > { %v4426_v36 = vpop.eup %4425  ;;  %v2139_v37 = vadd.f32 %v4424_v4, %v2138_v29  ;;  %3846 = vmatmul.msk.bf16.vlgmr.msra.gmra.mxu3 %vm2017_vm10, %v2212_v35 }
 0x4c9   : > { %v2181_v40 = vmul.f32 %v4426_v36, %v2086_v38  ;;  %v2080_v43 = vpop.xlane.xlu0 %2079  ;;  %v4428_v42 = vpop.eup %4427  ;;  %vm2186_vm15 = vweird.f32 %v4426_v36 }
 0x4ca   : > { %4429 = vrcp.f32 %v2080_v43  ;;  %v2143_v47 = vsel %vm2142_vm13, %v4424_v4, %v2139_v37  ;;  %v2166_v49 = vmul.f32 %v4428_v42, %v2083_v14  ;;  %v5729_v24 = vpop.xlane.xlu2 %2088  ;;  %vm2171_vm1 = vweird.f32 %v4428_v42  ;;  %vm2187_vm2 = vmor %vm2185_vm0, %vm2186_vm15 }
 0x4cb   : > { %v2182_v45 = vsub.f32 1.0, %v2181_v40  ;;  %v2148_v51 = vsel %vm2145_vm14, %v2147_v15, %v2143_v47  ;;  %4431 = vrcp.f32 %v5729_v24  ;;  %vm2172_vm5 = vmor %vm2170_vm4, %vm2171_vm1  ;;  %v2159_v33 = vand.u32 2147483647, %v2080_v43 }
 0x4cc   : > { %v2149_v54 = vmul.f32 %v5630_v10, %v2148_v51  ;;  %v2167_v57 = vsub.f32 1.0, %v2166_v49  ;;  %v2161_v20 = vand.u32 2147483648, %v2080_v43  ;;  %vm2155_vm11 = vweird.f32 %v2080_v43 }
 0x4cd   : > { %v2183_v27 = vmul.f32 %v4426_v36, %v2182_v45  ;;  %v2204_v11 = vand.u32 2147483647, %v5729_v24  ;;  %v2206_v28 = vand.u32 2147483648, %v5729_v24  ;;  %vm2160_vm14 = vcmp.eq.f32.partialorder %v2159_v33, 8.507059e+37 }
 0x4ce   : > { %v2168_v17 = vmul.f32 %v4428_v42, %v2167_v57  ;;  %v2213_v50 = vpack.c.bf16 %v2149_v54, %v2149_v54  ;;  %v2162_v38 = vor.u32 1.1754944e-38, %v2161_v20  ;;  %vm2200_vm15 = vweird.f32 %v5729_v24 }
 0x4cf   : > { %v2184_v1 = vadd.f32 %v4426_v36, %v2183_v27  ;;  %v2207_v9 = vor.u32 1.1754944e-38, %v2206_v28  ;;  %vm2205_vm1 = vcmp.eq.f32.partialorder %v2204_v11, 8.507059e+37 }
 0x4d0   : > { %v4430_v34 = vpop.eup %4429  ;;  %v2169_v60 = vadd.f32 %v4428_v42, %v2168_v17  ;;  %3847 = vmatmul.msk.bf16.vlgmr.msrb.gmra.mxu0 %vm2017_vm10, %v2213_v50 }
 0x4d1   : > { %v2188_v16 = vsel %vm2187_vm2, %v4426_v36, %v2184_v1  ;;  %v2151_v48 = vmul.f32 %v4430_v34, %v2080_v43  ;;  %v4432_v10 = vpop.eup %4431  ;;  %vm2156_vm9 = vweird.f32 %v4430_v34 }
 0x4d2   : > { %v2193_v39 = vsel %vm2190_vm3, %v2192_v62, %v2188_v16  ;;  %v2173_v63 = vsel %vm2172_vm5, %v4428_v42, %v2169_v60  ;;  %v2196_v30 = vmul.f32 %v4432_v10, %v5729_v24  ;;  %vm2201_vm12 = vweird.f32 %v4432_v10  ;;  %vm2157_vm13 = vmor %vm2155_vm11, %vm2156_vm9 }
 0x4d3   : > { %v2194_v25 = vmul.f32 %v5638_v3, %v2193_v39  ;;  %v2152_v21 = vsub.f32 1.0, %v2151_v48  ;;  %v2178_v41 = vsel %vm2175_vm6, %v2177_v56, %v2173_v63  ;;  %vm2202_vm0 = vmor %vm2200_vm15, %vm2201_vm12 }
 0x4d4   : > { %v2179_v0 = vmul.f32 %v5636_v7, %v2178_v41  ;;  %v2197_v55 = vsub.f32 1.0, %v2196_v30 }
 0x4d5   : > { %v2153_v2 = vmul.f32 %v4430_v34, %v2152_v21  ;;  %v2216_v23 = vpack.c.bf16 %v2194_v25, %v2194_v25 }
 0x4d6   : > { %v2198_v3 = vmul.f32 %v4432_v10, %v2197_v55  ;;  %v2215_v44 = vpack.c.bf16 %v2179_v0, %v2179_v0 }
 0x4d7   : > { %v2154_v61 = vadd.f32 %v4430_v34, %v2153_v2 }
 0x4d8   : > { %v2199_v6 = vadd.f32 %v4432_v10, %v2198_v3  ;;  %3849 = vmatmul.msk.bf16.vlgmr.msra.gmra.mxu2 %vm2017_vm10, %v2215_v44  ;;  %3850 = vmatmul.msk.bf16.vlgmr.msrb.gmra.mxu3 %vm2017_vm10, %v2216_v23 }
 0x4d9   : > { %v2158_v4 = vsel %vm2157_vm13, %v4430_v34, %v2154_v61 }
 0x4da   : > { %v2163_v7 = vsel %vm2160_vm14, %v2162_v38, %v2158_v4  ;;  %v2203_v14 = vsel %vm2202_vm0, %v4432_v10, %v2199_v6 }
 0x4db   : > { %v2164_v52 = vmul.f32 %v5650_v12, %v2163_v7  ;;  %v2208_v18 = vsel %vm2205_vm1, %v2207_v9, %v2203_v14 }
 0x4dc   : > { %v2209_v19 = vmul.f32 %v5655_v46, %v2208_v18 }
 0x4dd   : > { %v2214_v22 = vpack.c.bf16 %v2164_v52, %v2164_v52 }
 0x4de   : > { %v2217_v26 = vpack.c.bf16 %v2209_v19, %v2209_v19 }
 0x4df   : > { %3848 = vmatmul.msk.bf16.vlgmr.msra.gmra.mxu1 %vm2017_vm10, %v2214_v22 }
 0x4e0   : > { %3851 = vmatmul.msk.bf16.vlgmr.msra.gmra.mxu0 %vm2017_vm10, %v2217_v26  ;;  %vm2621_vm10 = vcmask 785408  }
 0x524   : > { %v2234_v29 = vpop.f32.mrf.mxu1 }
 0x525   : > { %v2374_v37 = vrot.slane %v2234_v29, 4 }
 0x52c   : > { %v2236_v32 = vpop.f32.mrf.mxu1 }
 0x541   : > { %v2253_v35 = vpop.f32.mrf.mxu2 }
 0x542   : > { %v2386_v43 = vrot.slane %v2253_v35, 4 }
 0x549   : > { %v2255_v36 = vpop.f32.mrf.mxu2 }
 0x54b   : > { %v2272_v40 = vpop.f32.mrf.mxu3 }
 0x54c   : > { %v2371_v42 = vrot.slane %v2272_v40, 4  ;;  %v2375_v12 = vsel %vm1169_vm7, %v2272_v40, %v2374_v37 }
 0x54d   : > { %v2383_v15 = vperm.slane %v2375_v12, %v5335_v8  ;;  %v2291_v47 = vpop.f32.mrf.mxu0 }
 0x54e   : > { %v2373_v46 = vsel %vm1169_vm7, %v2371_v42, %v2234_v29  ;;  %v2384_v45 = vrot.slane %v2291_v47, 4  ;;  %v2387_v49 = vsel %vm1169_vm7, %v2291_v47, %v2386_v43 }
 0x54f   : > { %v2379_v24 = vperm.slane %v2373_v46, %v5335_v8  ;;  %v2410_v51 = vrot.slane %v2383_v15, 4  ;;  %v2395_v5 = vperm.slane %v2387_v49, %v5335_v8 }
 0x550   : > { %v2385_v53 = vsel %vm1169_vm7, %v2384_v45, %v2253_v35 }
 0x551   : > { %v2398_v54 = vrot.slane %v2379_v24, 4  ;;  %v2391_v27 = vperm.slane %v2385_v53, %v5335_v8  ;;  %v2408_v57 = vrot.slane %v2395_v5, 4  ;;  %v2411_v58 = vsel %vm1169_vm7, %v2395_v5, %v2410_v51 }
 0x552   : > { %v2419_v59 = vperm.slane %v2411_v58, %v5348_v31 }
 0x553   : > { %v2396_v1 = vrot.slane %v2391_v27, 4  ;;  %v2399_v17 = vsel %vm1169_vm7, %v2391_v27, %v2398_v54  ;;  %v2409_v50 = vsel %vm1169_vm7, %v2408_v57, %v2383_v15  ;;  %v2274_v34 = vpop.f32.mrf.mxu3 }
 0x554   : > { %v2407_v62 = vperm.slane %v2399_v17, %v5348_v31  ;;  %v2415_v16 = vperm.slane %v2409_v50, %v5348_v31  ;;  %v2426_v60 = vrot.slane %v2419_v59, 4 }
 0x555   : > { %v2397_v48 = vsel %vm1169_vm7, %v2396_v1, %v2379_v24  ;;  %v2293_v10 = vpop.f32.mrf.mxu0 }
 0x556   : > { %v2403_v39 = vperm.slane %v2397_v48, %v5348_v31  ;;  %v2422_v56 = vrot.slane %v2407_v62, 4  ;;  %v2424_v25 = vrot.slane %v2415_v16, 4  ;;  %v2427_v63 = vsel %vm1169_vm7, 0.0, %v2426_v60 }
 0x557   : > { %v2500_v21 = vrot.slane %v2427_v63, 4  ;;  %v2495_v44 = vsel %vm1169_vm7, %v2426_v60, %v2415_v16 }
 0x558   : > { %v2420_v30 = vrot.slane %v2403_v39, 4  ;;  %v2423_v41 = vsel %vm1169_vm7, 0.0, %v2422_v56  ;;  %v2425_v33 = vsel %vm1169_vm7, 0.0, %v2424_v25  ;;  %v2484_v55 = vsel %vm1169_vm7, %v2422_v56, %v2403_v39 }
 0x559   : > { %v2489_v20 = vrot.slane %v2423_v41, 4  ;;  %v2501_v0 = vsel %vm1169_vm7, %v2500_v21, %v2425_v33  ;;  %v2488_v7 = vperm.slane %v2484_v55, %v5335_v8  ;;  %v2499_v26 = vperm.slane %v2495_v44, %v5335_v8 }
 0x55a   : > { %v2421_v2 = vsel %vm1169_vm7, 0.0, %v2420_v30  ;;  %v2505_v11 = vperm.slane %v2501_v0, %v5335_v8 }
 0x55b   : > { %v2329_v61 = vpop.f32.mrf.mxu2  ;;  %v2490_v3 = vsel %vm1169_vm7, %v2489_v20, %v2421_v2  ;;  %v2348_v4 = vpop.f32.mrf.mxu3  ;;  %v2508_v47 = vrot.slane %v2488_v7, 4  ;;  %v2520_v53 = vrot.slane %v2499_v26, 4 }
 0x55c   : > { %v2310_v28 = vpop.f32.mrf.mxu1  ;;  %v2442_v38 = vrot.slane %v2329_v61, 4  ;;  %v2494_v6 = vperm.slane %v2490_v3, %v5335_v8  ;;  %v2428_v9 = vrot.slane %v2348_v4, 4  ;;  %v2518_v22 = vrot.slane %v2505_v11, 4 }
 0x55d   : > { %v2430_v23 = vrot.slane %v2310_v28, 4  ;;  %v2367_v52 = vpop.f32.mrf.mxu0  ;;  %v2521_v10 = vsel %vm1169_vm7, %v2505_v11, %v2520_v53 }
 0x55e   : > { %v2440_v18 = vrot.slane %v2367_v52, 4  ;;  %v2443_v19 = vsel %vm1169_vm7, %v2367_v52, %v2442_v38  ;;  %v2429_v29 = vsel %vm1169_vm7, %v2428_v9, %v2310_v28  ;;  %v2506_v40 = vrot.slane %v2494_v6, 4 }
 0x55f   : > { %v2431_v14 = vsel %vm1169_vm7, %v2348_v4, %v2430_v23  ;;  %v2451_v35 = vperm.slane %v2443_v19, %v5335_v8  ;;  %v2435_v36 = vperm.slane %v2429_v29, %v5335_v8  ;;  %v2519_v46 = vsel %vm1169_vm7, %v2518_v22, %v2499_v26 }
 0x560   : > { %v2439_v32 = vperm.slane %v2431_v14, %v5335_v8  ;;  %v2441_v37 = vsel %vm1169_vm7, %v2440_v18, %v2329_v61  ;;  %v2507_v59 = vsel %vm1169_vm7, %v2506_v40, %v2488_v7  ;;  %v2525_v34 = vperm.slane %v2519_v46, %v5348_v31 }
 0x561   : > { %v2447_v42 = vperm.slane %v2441_v37, %v5335_v8  ;;  %v2464_v12 = vrot.slane %v2451_v35, 4  ;;  %v2454_v15 = vrot.slane %v2435_v36, 4  ;;  %v2513_v39 = vperm.slane %v2507_v59, %v5348_v31  ;;  %v4176_v59 = vld [vmem:[%s5245_s2 + $0x20] sm:$0xff] }
 0x562   : > { %v2466_v43 = vrot.slane %v2439_v32, 4  ;;  %v2530_v56 = vrot.slane %v2525_v34, 4  ;;  %v2509_v30 = vsel %vm1169_vm7, %v2494_v6, %v2508_v47  ;;  %v2529_v3 = vperm.slane %v2521_v10, %v5348_v31 }
 0x563   : > { %v2452_v45 = vrot.slane %v2447_v42, 4  ;;  %v2465_v49 = vsel %vm1169_vm7, %v2464_v12, %v2439_v32  ;;  %v2331_v5 = vpop.f32.mrf.mxu2  ;;  %v2455_v54 = vsel %vm1169_vm7, %v2447_v42, %v2454_v15  ;;  %v2350_v58 = vpop.f32.mrf.mxu3  ;;  %v2517_v38 = vperm.slane %v2509_v30, %v5348_v31 }
 0x564   : > { %v2467_v24 = vsel %vm1169_vm7, %v2451_v35, %v2466_v43  ;;  %v2312_v51 = vpop.f32.mrf.mxu1  ;;  %v2471_v27 = vperm.slane %v2465_v49, %v5348_v31  ;;  %v2463_v17 = vperm.slane %v2455_v54, %v5348_v31  ;;  %v5808_v23 = vsel %vm1169_vm7, %v2530_v56, %v2513_v39  ;;  %v4177_v58 = vld [vmem:[%s5245_s2 + $0x28] sm:$0xff] }
 0x565   : > { %v2475_v57 = vperm.slane %v2467_v24, %v5348_v31  ;;  %v2453_v1 = vsel %vm1169_vm7, %v2452_v45, %v2435_v36  ;;  %v2369_v50 = vpop.f32.mrf.mxu0  ;;  %v2534_v22 = vrot.slane %v2529_v3, 4  ;;  %v2536_v29 = vrot.slane %v2517_v38, 4 }
 0x566   : > { %v2459_v62 = vperm.slane %v2453_v1, %v5348_v31  ;;  %v2480_v16 = vrot.slane %v2471_v27, 4  ;;  %v2478_v48 = vrot.slane %v2463_v17, 4  ;;  %v2532_v43 = vrot.slane %v2513_v39, 4  ;;  %v4175_v1 = vld [vmem:[%s5245_s2 + $0x18] sm:$0xff]  ;;  %v4174_v17 = vld [vmem:[%s5245_s2 + $0x10] sm:$0xff]  ;;  %v4173_v50 = vld [vmem:[%s5245_s2 + $0x8] sm:$0xff] }
 0x567   : > { %v2482_v60 = vrot.slane %v2475_v57, 4  ;;  %v2535_v12 = vsel %vm1169_vm7, %v2534_v22, %v2517_v38  ;;  %v2537_v46 = vsel %vm1169_vm7, %v2529_v3, %v2536_v29  ;;  %v4178_v57 = vld [vmem:[%s5245_s2 + $0x30] sm:$0xff]  ;;  %v4454_v38 = vld [vmem:[#allocation2 + $0x8] sm:$0xff] }
 0x568   : > { %v2476_v25 = vrot.slane %v2459_v62, 4  ;;  %v2479_v41 = vsel %vm1169_vm7, 0.0, %v2478_v48  ;;  %v2538_v33 = vsel %vm1169_vm7, %v2478_v48, %v2459_v62  ;;  %v2481_v55 = vsel %vm1169_vm7, 0.0, %v2480_v16  ;;  %v4210_v29 = vld [vmem:[%s5250_s29 + $0xec] sm:$0xf0] }
 0x569   : > { %v2483_v63 = vsel %vm1169_vm7, 0.0, %v2482_v60  ;;  %v2549_v21 = vsel %vm1169_vm7, %v2482_v60, %v2471_v27  ;;  %v2542_v11 = vperm.slane %v2538_v33, %v5335_v8  ;;  %v2543_v28 = vrot.slane %v2479_v41, 4  ;;  %v4179_v27 = vld [vmem:[%s5245_s2 + $0x38] sm:$0xff] }
 0x56a   : > { %v2553_v20 = vperm.slane %v2549_v21, %v5335_v8  ;;  %v2554_v0 = vrot.slane %v2483_v63, 4  ;;  %v2477_v2 = vsel %vm1169_vm7, 0.0, %v2476_v25  ;;  %2693 = vmatpush.bf16.msrb.mxu1 %v4179_v27  ;;  %v3992_v27 = vld [vmem:[%s5250_s29 + $0xd8] sm:$0xf0] }
 0x56b   : > { %v2544_v4 = vsel %vm1169_vm7, %v2543_v28, %v2477_v2  ;;  %v2562_v7 = vrot.slane %v2542_v11, 4 }
 0x56c   : > { %v2555_v61 = vsel %vm1169_vm7, %v2554_v0, %v2481_v55  ;;  %v2574_v44 = vrot.slane %v2553_v20, 4  ;;  %v2548_v9 = vperm.slane %v2544_v4, %v5335_v8  ;;  %v4391_v55 = vld [vmem:[%s710_s30] ss:$0 sm:$0xff] }
 0x56d   : > { %v2559_v6 = vperm.slane %v2555_v61, %v5335_v8  ;;  %v4453_v61 = vld [vmem:[#allocation2] sm:$0xff] }
 0x56e   : > { %v2563_v18 = vsel %vm1169_vm7, %v2548_v9, %v2562_v7  ;;  %v2560_v26 = vrot.slane %v2548_v9, 4  ;;  %2694 = vmatpush.bf16.msrb.mxu1 %v4178_v57 }
 0x56f   : > { %v2575_v52 = vsel %vm1169_vm7, %v2559_v6, %v2574_v44  ;;  %v2572_v14 = vrot.slane %v2559_v6, 4  ;;  %v2571_v32 = vperm.slane %v2563_v18, %v5348_v31 }
 0x570   : > { %v2583_v19 = vperm.slane %v2575_v52, %v5348_v31  ;;  %v2561_v37 = vsel %vm1169_vm7, %v2560_v26, %v2542_v11  ;;  %v3998_v26 = vld [vmem:[%s5250_s29 + $0xe0] sm:$0xf] }
 0x571   : > { %v2573_v35 = vsel %vm1169_vm7, %v2572_v14, %v2553_v20  ;;  %v2590_v8 = vrot.slane %v2571_v32, 4  ;;  %v2567_v42 = vperm.slane %v2561_v37, %v5348_v31  ;;  %v4006_v37 = vld [vmem:[%s5250_s29 + $0xe8] sm:$0xf] }
 0x572   : > { %v2588_v36 = vrot.slane %v2583_v19, 4  ;;  %v2579_v40 = vperm.slane %v2573_v35, %v5348_v31  ;;  %v2533_v31 = vsel %vm1169_vm7, %v2525_v34, %v2532_v43  ;;  %2695 = vmatpush.bf16.msrb.mxu1 %v4177_v58  ;;  %v4172_v34 = vld [vmem:[%s5245_s2] sm:$0xff]  ;;  %v3999_v35 = vor.u32 %v4210_v29, %v3998_v26 }
 0x573   : > { %v2591_v45 = vsel %vm1169_vm7, %v2583_v19, %v2590_v8  ;;  %v2586_v24 = vrot.slane %v2567_v42, 4  ;;  %v3966_v58 = vld [vmem:[%s5250_s29 + $0xa0] sm:$0xf]  ;;  %v3944_v29 = vld [vmem:[%s5250_s29 + $0x78] sm:$0xf0] }
 0x574   : > { %v2589_v15 = vsel %vm1169_vm7, %v2588_v36, %v2571_v32  ;;  %v2584_v47 = vrot.slane %v2579_v40, 4  ;;  %v4384_v51 = vpack.i.bf16 %v2591_v45, %v2537_v46  ;;  %v4208_v32 = vld [vmem:[%s5250_s29 + $0xe4] sm:$0xf]  ;;  %v4000_v36 = vld [vmem:[%s5250_s29 + $0xf0] sm:$0xf0]  ;;  %2964 = vmatpush.bf16.msrb.mxu2 %v3999_v35 }
 0x575   : > { %v4379_v49 = vpack.i.bf16 %v2589_v15, %v2535_v12  ;;  %v2587_v53 = vsel %vm1169_vm7, %v2579_v40, %v2586_v24  ;;  %v4211_v40 = vld [vmem:[%s5250_s29 + $0xf4] sm:$0xf0]  ;;  %v4003_v8 = vor.u32 %v4208_v32, %v4000_v36  ;;  %v4008_v12 = vld [vmem:[%s5250_s29 + $0xf8] sm:$0xf0]  ;;  %v4206_v46 = vld [vmem:[%s5250_s29 + $0xcc] sm:$0xf0] }
 0x576   : > { %v2585_v5 = vsel %vm1169_vm7, %v2584_v47, %v2567_v42  ;;  %4385 = vrot.lane.b32.xlu1 %v4384_v51, %s4879_s23  ;;  %v4374_v54 = vpack.i.bf16 %v2587_v53, %v2533_v31  ;;  %2696 = vmatpush.bf16.msrb.mxu1 %v4176_v59  ;;  %vm2618_vm7 = vcmask 523264   ;;  %v4007_v43 = vor.u32 %v4211_v40, %v4006_v37  ;;  %v4209_v42 = vld [vmem:[%s5250_s29 + $0xec] sm:$0xf]  ;;  %v3982_v47 = vld [vmem:[%s5250_s29 + $0xc0] sm:$0xf] }
 0x577   : > { %4380 = vrot.lane.b32.xlu2 %v4379_v49, %s4880_s19  ;;  %v4011_v15 = vor.u32 %v4209_v42, %v4008_v12  ;;  %2978 = vmatpush.bf16.msra.mxu3 %v4003_v8  ;;  %v4204_v45 = vld [vmem:[%s5250_s29 + $0xc4] sm:$0xf]  ;;  %v3983_v49 = vor.u32 %v4206_v46, %v3982_v47  ;;  %v3984_v24 = vld [vmem:[%s5250_s29 + $0xd0] sm:$0xf0]  ;;  %v3990_v51 = vld [vmem:[%s5250_s29 + $0xc8] sm:$0xf] }
 0x578   : > { %4375 = vrot.lane.b32.xlu0 %v4374_v54, %s4878_s24  ;;  %2992 = vmatpush.bf16.msrb.mxu0 %v4007_v43  ;;  %v3987_v31 = vor.u32 %v4204_v45, %v3984_v24  ;;  %v4205_v54 = vld [vmem:[%s5250_s29 + $0xcc] sm:$0xf]  ;;  %v4202_v59 = vld [vmem:[%s5250_s29 + $0xac] sm:$0xf0]  ;;  %v3918_v32 = vld [vmem:[%s5250_s29 + $0x40] sm:$0xf] }
 0x579   : > { %2965 = vmatpush.bf16.msrb.mxu2 %v3983_v49  ;;  %v3995_v57 = vor.u32 %v4205_v54, %v3992_v27  ;;  %v4190_v35 = vld [vmem:[%s5250_s29 + $0x4c] sm:$0xf0]  ;;  %v4188_v40 = vld [vmem:[%s5250_s29 + $0x44] sm:$0xf]  ;;  %v3920_v8 = vld [vmem:[%s5250_s29 + $0x50] sm:$0xf0] }
 0x57a   : > { %2697 = vmatpush.bf16.msrb.mxu1 %v4175_v1  ;;  %v4200_v1 = vld [vmem:[%s5250_s29 + $0xa4] sm:$0xf]  ;;  %v3919_v43 = vor.u32 %v4190_v35, %v3918_v32  ;;  %v3926_v42 = vld [vmem:[%s5250_s29 + $0x48] sm:$0xf]  ;;  %v4191_v12 = vld [vmem:[%s5250_s29 + $0x54] sm:$0xf0]  ;;  %v3923_v47 = vor.u32 %v4188_v40, %v3920_v8 }
 0x57b   : > { %2979 = vmatpush.bf16.msra.mxu3 %v3987_v31  ;;  %v3927_v46 = vor.u32 %v4191_v12, %v3926_v42  ;;  %v3928_v45 = vld [vmem:[%s5250_s29 + $0x58] sm:$0xf0]  ;;  %v3902_v49 = vld [vmem:[%s5250_s29 + $0x20] sm:$0xf]  ;;  %v4186_v24 = vld [vmem:[%s5250_s29 + $0x2c] sm:$0xf0] }
 0x57c   : > { %v3904_v31 = vld [vmem:[%s5250_s29 + $0x30] sm:$0xf0]  ;;  %v4187_v54 = vld [vmem:[%s5250_s29 + $0x34] sm:$0xf0]  ;;  %v4185_v27 = vld [vmem:[%s5250_s29 + $0x2c] sm:$0xf] }
 0x57d   : > { %v4242_v42 = vld [vmem:[%s5252_s20 + $0xf0] sm:$0xff]  ;;  %v4227_v12 = vld [vmem:[%s5252_s20 + $0x78] sm:$0xff] }
 0x57e   : > { %2698 = vmatpush.bf16.msrb.mxu1 %v4174_v17  ;;  %v3967_v17 = vor.u32 %v4202_v59, %v3966_v58  ;;  %v3903_v59 = vor.u32 %v4186_v24, %v3902_v49  ;;  %v4232_v49 = vld [vmem:[%s5252_s20 + $0xa0] sm:$0xff] }
 0x57f   : > { %v4240_v24 = vld [vmem:[%s5252_s20 + $0xe0] sm:$0xff] }
 0x580   : > { %2966 = vmatpush.bf16.msrb.mxu2 %v3967_v17 }
 0x582   : > { %2699 = vmatpush.bf16.msrb.mxu1 %v4173_v50  ;;  %v3968_v50 = vld [vmem:[%s5250_s29 + $0xb0] sm:$0xf0] }
 0x586   : > { %2700 = vmatpush.bf16.msrb.mxu1 %v4172_v34  ;;  %v3974_v34 = vld [vmem:[%s5250_s29 + $0xa8] sm:$0xf] }
 0x58a   : > { %3006 = vmatpush.bf16.msra.mxu1 %v4011_v15  ;;  %v4189_v15 = vld [vmem:[%s5250_s29 + $0x4c] sm:$0xf] }
 0x58e   : > { %3007 = vmatpush.bf16.msra.mxu1 %v3995_v57  ;;  %v3912_v57 = vld [vmem:[%s5250_s29 + $0x38] sm:$0xf0] }
 0x5d1   : > { %v4381_v62 = vpop.permute.xlu2 %4380 }
 0x5d2   : > { %v4383_v39 = vunpack.i.h.bf16 %v4381_v62  ;;  %v4382_v56 = vunpack.i.l.bf16 %v4381_v62  ;;  %v4203_v62 = vld [vmem:[%s5250_s29 + $0xb4] sm:$0xf0] }
 0x5e8   : > { %v4386_v16 = vpop.permute.xlu1 %4385 }
 0x5e9   : > { %v4388_v25 = vunpack.i.h.bf16 %v4386_v16  ;;  %v4387_v63 = vunpack.i.l.bf16 %v4386_v16  ;;  %v3971_v16 = vor.u32 %v4200_v1, %v3968_v50 }
 0x5ea   : > { %v4376_v60 = vpop.permute.xlu0 %4375 }
 0x5eb   : > { %v4378_v48 = vunpack.i.h.bf16 %v4376_v60  ;;  %v4377_v10 = vunpack.i.l.bf16 %v4376_v60  ;;  %v3975_v60 = vor.u32 %v4203_v62, %v3974_v34  ;;  %2980 = vmatpush.bf16.msra.mxu3 %v3971_v16  ;;  %v3886_v34 = vld [vmem:[%s5250_s29] sm:$0xf]  ;;  %v4182_v62 = vld [vmem:[%s5250_s29 + $0xc] sm:$0xf0]  ;;  %v4180_v16 = vld [vmem:[%s5250_s29 + $0x4] sm:$0xf] }
 0x5ed   : > { %v2616_v21 = vsel %vm1841_vm8, %v5808_v23, %v4377_v10  ;;  %v2617_v30 = vsel %vm1841_vm8, %v2585_v5, %v4378_v48  ;;  %v4207_v5 = vld [vmem:[%s5250_s29 + $0xd4] sm:$0xf0]  ;;  %v4201_v48 = vld [vmem:[%s5250_s29 + $0xac] sm:$0xf]  ;;  %v3976_v10 = vld [vmem:[%s5250_s29 + $0xb8] sm:$0xf0] }
 0x5ee   : > { %v2619_v41 = vsel %vm2618_vm7, %v2616_v21, %v4382_v56  ;;  %v2620_v33 = vsel %vm2618_vm7, %v2617_v30, %v4383_v39  ;;  %v3991_v53 = vor.u32 %v4207_v5, %v3990_v51  ;;  %v3979_v39 = vor.u32 %v4201_v48, %v3976_v10  ;;  %v3950_v56 = vld [vmem:[%s5250_s29 + $0x80] sm:$0xf]  ;;  %v3952_v30 = vld [vmem:[%s5250_s29 + $0x90] sm:$0xf0]  ;;  %v4184_v5 = vld [vmem:[%s5250_s29 + $0x24] sm:$0xf] }
 0x5ef   : > { %v2622_v20 = vsel %vm2621_vm10, %v2619_v41, %v4387_v63  ;;  %v2623_v0 = vsel %vm2621_vm10, %v2620_v33, %v4388_v25  ;;  %v4198_v25 = vld [vmem:[%s5250_s29 + $0x8c] sm:$0xf0]  ;;  %v4196_v63 = vld [vmem:[%s5250_s29 + $0x84] sm:$0xf]  ;;  %v3958_v41 = vld [vmem:[%s5250_s29 + $0x88] sm:$0xf]  ;;  %v3931_v51 = vor.u32 %v4189_v15, %v3928_v45  ;;  %v3907_v17 = vor.u32 %v4184_v5, %v3904_v31 }
 0x5f0   : > { %v2624_v2 = vpack.c.bf16 %v2623_v0, %v2622_v20  ;;  %2993 = vmatpush.bf16.msrb.mxu0 %v3991_v53  ;;  %3008 = vmatpush.bf16.msra.mxu1 %v3979_v39  ;;  %v3951_v21 = vor.u32 %v4198_v25, %v3950_v56  ;;  %v4199_v33 = vld [vmem:[%s5250_s29 + $0x94] sm:$0xf0]  ;;  %v3955_v20 = vor.u32 %v4196_v63, %v3952_v30  ;;  %v3910_v53 = vld [vmem:[%s5250_s29 + $0x28] sm:$0xf]  ;;  %v3888_v48 = vld [vmem:[%s5250_s29 + $0x10] sm:$0xf0] }
 0x5f1   : > { %v3959_v0 = vor.u32 %v4199_v33, %v3958_v41  ;;  %v3911_v50 = vor.u32 %v4187_v54, %v3910_v53  ;;  %v3894_v10 = vld [vmem:[%s5250_s29 + $0x8] sm:$0xf]  ;;  %v4183_v39 = vld [vmem:[%s5250_s29 + $0x14] sm:$0xf0]  ;;  %v4181_v63 = vld [vmem:[%s5250_s29 + $0xc] sm:$0xf]  ;;  %v3887_v41 = vor.u32 %v4182_v62, %v3886_v34  ;;  %v3891_v33 = vor.u32 %v4180_v16, %v3888_v48 }
 0x5f2   : > { %2701 = vmatmul.bf16.vlgmr.msrb.gmra.mxu1 %v2624_v2  ;;  %v4197_v2 = vld [vmem:[%s5250_s29 + $0x8c] sm:$0xf]  ;;  %2967 = vmatpush.bf16.msrb.mxu2 %v3951_v21  ;;  %v3896_v21 = vld [vmem:[%s5250_s29 + $0x18] sm:$0xf0]  ;;  %v4226_v45 = vld [vmem:[%s5252_s20 + $0x70] sm:$0xff] }
 0x5f3   : > { %2981 = vmatpush.bf16.msra.mxu3 %v3955_v20  ;;  %v3895_v20 = vor.u32 %v4183_v39, %v3894_v10  ;;  %v4233_v15 = vld [vmem:[%s5252_s20 + $0xa8] sm:$0xff]  ;;  %v4231_v31 = vld [vmem:[%s5252_s20 + $0x98] sm:$0xff]  ;;  %v4216_v54 = vld [vmem:[%s5252_s20 + $0x20] sm:$0xff] }
 0x5f4   : > { %2994 = vmatpush.bf16.msrb.mxu0 %v3975_v60  ;;  %v3915_v60 = vor.u32 %v4185_v27, %v3912_v57  ;;  %v4225_v5 = vld [vmem:[%s5252_s20 + $0x68] sm:$0xff]  ;;  %v4239_v53 = vld [vmem:[%s5252_s20 + $0xd8] sm:$0xff]  ;;  %v4224_v27 = vld [vmem:[%s5252_s20 + $0x60] sm:$0xff] }
 0x5f5   : > { %v4230_v57 = vld [vmem:[%s5252_s20 + $0x90] sm:$0xff]  ;;  %v4229_v62 = vld [vmem:[%s5252_s20 + $0x88] sm:$0xff] }
 0x5f6   : > { %v4237_v16 = vld [vmem:[%s5252_s20 + $0xc8] sm:$0xff]  ;;  %v4214_v10 = vld [vmem:[%s5252_s20 + $0x10] sm:$0xff] }
 0x5f7   : > { %v4222_v39 = vld [vmem:[%s5252_s20 + $0x50] sm:$0xff] }
 0x5f8   : > { %2995 = vmatpush.bf16.msrb.mxu0 %v3959_v0 }
 0x66f   : > { %v2702_v11 = vpop.f32.mrf.mxu1 }
 0x670   : > { %v2703_v28 = vadd.f32 %v4391_v55, %v2702_v11  ;;  %v3934_v11 = vld [vmem:[%s5250_s29 + $0x60] sm:$0xf] }
 0x672   : > { %v5845_v3 = vadd.f32 %v4453_v61, %v2703_v28 }
 0x674   : > { %2711 = vadd.xlane.f32.xlu0 %v5845_v3 }
 0x677   : > { %v2704_v44 = vpop.f32.mrf.mxu1 }
 0x678   : > { %v2705_v23 = vadd.f32 %v4391_v55, %v2704_v44  ;;  %v3960_v55 = vld [vmem:[%s5250_s29 + $0x98] sm:$0xf0]  ;;  %v4194_v44 = vld [vmem:[%s5250_s29 + $0x6c] sm:$0xf0] }
 0x679   : > { %v3963_v61 = vor.u32 %v4197_v2, %v3960_v55  ;;  %v3899_v2 = vor.u32 %v4181_v63, %v3896_v21  ;;  %v4235_v55 = vld [vmem:[%s5252_s20 + $0xb8] sm:$0xff]  ;;  %v4228_v63 = vld [vmem:[%s5252_s20 + $0x80] sm:$0xff] }
 0x67a   : > { %v5848_v4 = vadd.f32 %v4454_v38, %v2705_v23  ;;  %v4192_v23 = vld [vmem:[%s5250_s29 + $0x64] sm:$0xf]  ;;  %v3936_v38 = vld [vmem:[%s5250_s29 + $0x70] sm:$0xf0] }
 0x67b   : > { %3009 = vmatpush.bf16.msra.mxu1 %v3963_v61  ;;  %v4236_v21 = vld [vmem:[%s5252_s20 + $0xc0] sm:$0xff] }
 0x67c   : > { %2713 = vadd.xlane.f32.xlu2 %v5848_v4 }
 0x6e7   : > { %v2712_v6 = vpop.xlane.xlu0 %2711 }
 0x6e8   : > { %v2715_v7 = vmul.f32 %v2712_v6, %v5256_v13 }
 0x6ea   : > { %v5853_v9 = vsub.f32 %v5845_v3, %v2715_v7  ;;  %v3935_v7 = vor.u32 %v4194_v44, %v3934_v11  ;;  %v4243_v11 = vld [vmem:[%s5252_s20 + $0xf8] sm:$0xff] }
 0x6ec   : > { %v2719_v52 = vmul.f32 %v5853_v9, %v5853_v9  ;;  %2968 = vmatpush.bf16.msrb.mxu2 %v3935_v7 }
 0x6ee   : > { %2721 = vadd.xlane.f32.xlu1 %v2719_v52  ;;  %v3939_v52 = vor.u32 %v4192_v23, %v3936_v38 }
 0x6ef   : > { %v2714_v14 = vpop.xlane.xlu2 %2713 }
 0x6f0   : > { %v2716_v18 = vmul.f32 %v2714_v14, %v5256_v13  ;;  %v3942_v14 = vld [vmem:[%s5250_s29 + $0x68] sm:$0xf]  ;;  %2982 = vmatpush.bf16.msra.mxu3 %v3939_v52  ;;  %2969 = vmatpush.bf16.msrb.mxu2 %v3919_v43  ;;  %v4234_v43 = vld [vmem:[%s5252_s20 + $0xb0] sm:$0xff] }
 0x6f2   : > { %v5859_v19 = vsub.f32 %v5848_v4, %v2716_v18  ;;  %v4195_v18 = vld [vmem:[%s5250_s29 + $0x74] sm:$0xf0] }
 0x6f3   : > { %v3943_v26 = vor.u32 %v4195_v18, %v3942_v14 }
 0x6f4   : > { %v2720_v22 = vmul.f32 %v5859_v19, %v5859_v19  ;;  %2983 = vmatpush.bf16.msra.mxu3 %v3923_v47  ;;  %2970 = vmatpush.bf16.msrb.mxu2 %v3903_v59  ;;  %v4241_v47 = vld [vmem:[%s5252_s20 + $0xe8] sm:$0xff] }
 0x6f5   : > { %2996 = vmatpush.bf16.msrb.mxu0 %v3943_v26  ;;  %v5961_v59 = vld [vmem:[%s5240_s3] sm:$0xf] }
 0x6f6   : > { %2723 = vadd.xlane.f32.xlu0 %v2720_v22  ;;  %v4193_v22 = vld [vmem:[%s5250_s29 + $0x6c] sm:$0xf]  ;;  %v2799_v34 = vperm.slane %v5961_v59, 3 }
 0x6f7   : > { %v3947_v37 = vor.u32 %v4193_v22, %v3944_v29  ;;  %v4392_v22 = vld [vmem:[%s719_s18] ss:$0 sm:$0xff] }
 0x6f8   : > { %2984 = vmatpush.bf16.msra.mxu3 %v3907_v17  ;;  %2971 = vmatpush.bf16.msrb.mxu2 %v3887_v41  ;;  %v4223_v17 = vld [vmem:[%s5252_s20 + $0x58] sm:$0xff]  ;;  %v2797_v41 = vperm.slane %v5961_v59, 1 }
 0x6f9   : > { %3010 = vmatpush.bf16.msra.mxu1 %v3947_v37  ;;  %2997 = vmatpush.bf16.msrb.mxu0 %v3927_v46  ;;  %v4218_v46 = vld [vmem:[%s5252_s20 + $0x30] sm:$0xff] }
 0x6fc   : > { %2985 = vmatpush.bf16.msra.mxu3 %v3891_v33 }
 0x6fd   : > { %3011 = vmatpush.bf16.msra.mxu1 %v3931_v51  ;;  %2998 = vmatpush.bf16.msrb.mxu0 %v3911_v50  ;;  %v4217_v51 = vld [vmem:[%s5252_s20 + $0x28] sm:$0xff]  ;;  %v2798_v50 = vperm.slane %v5961_v59, 2 }
 0x700   : > { %3370 = vmatpush.bf16.msrb.mxu3 %v4227_v12 }
 0x701   : > { %3012 = vmatpush.bf16.msra.mxu1 %v3915_v60  ;;  %2999 = vmatpush.bf16.msrb.mxu0 %v3895_v20 }
 0x704   : > { %3371 = vmatpush.bf16.msrb.mxu3 %v4226_v45 }
 0x705   : > { %3013 = vmatpush.bf16.msra.mxu1 %v3899_v2  ;;  %3384 = vmatpush.bf16.msra.mxu0 %v4235_v55  ;;  %v4213_v55 = vld [vmem:[%s5252_s20 + $0x8] sm:$0xff] }
 0x708   : > { %3372 = vmatpush.bf16.msrb.mxu3 %v4225_v5 }
 0x709   : > { %3398 = vmatpush.bf16.msrb.mxu1 %v4243_v11  ;;  %3385 = vmatpush.bf16.msra.mxu0 %v4234_v43  ;;  %v4221_v11 = vld [vmem:[%s5252_s20 + $0x48] sm:$0xff] }
 0x70c   : > { %3373 = vmatpush.bf16.msrb.mxu3 %v4224_v27 }
 0x70d   : > { %3399 = vmatpush.bf16.msrb.mxu1 %v4242_v42  ;;  %3386 = vmatpush.bf16.msra.mxu0 %v4233_v15 }
 0x710   : > { %3374 = vmatpush.bf16.msrb.mxu3 %v4223_v17 }
 0x711   : > { %3400 = vmatpush.bf16.msrb.mxu1 %v4241_v47  ;;  %3387 = vmatpush.bf16.msra.mxu0 %v4232_v49 }
 0x714   : > { %3375 = vmatpush.bf16.msrb.mxu3 %v4222_v39 }
 0x715   : > { %3401 = vmatpush.bf16.msrb.mxu1 %v4240_v24  ;;  %3388 = vmatpush.bf16.msra.mxu0 %v4231_v31 }
 0x718   : > { %3376 = vmatpush.bf16.msrb.mxu3 %v4221_v11 }
 0x719   : > { %3402 = vmatpush.bf16.msrb.mxu1 %v4239_v53  ;;  %3389 = vmatpush.bf16.msra.mxu0 %v4230_v57 }
 0x71d   : > { %3390 = vmatpush.bf16.msra.mxu0 %v4229_v62 }
 0x721   : > { %3391 = vmatpush.bf16.msra.mxu0 %v4228_v63 }
 0x761   : > { %v2722_v28 = vpop.xlane.xlu1 %2721 }
 0x762   : > { %v2725_v6 = vmul.f32 %v2722_v28, %v5256_v13 }
 0x764   : > { %v5906_v36 = vadd.f32 1e-08, %v2725_v6 }
 0x766   : > { %4433 = vrsqrt.f32 %v5906_v36  ;;  %vm2735_vm2 = vweird.f32 %v5906_v36 }
 0x769   : > { %v2724_v58 = vpop.xlane.xlu0 %2723 }
 0x76a   : > { %v2726_v1 = vmul.f32 %v2724_v58, %v5256_v13  ;;  %v4238_v58 = vld [vmem:[%s5252_s20 + $0xd0] sm:$0xff] }
 0x76b   : > { %3403 = vmatpush.bf16.msrb.mxu1 %v4238_v58 }
 0x76c   : > { %v4434_v56 = vpop.eup %4433  ;;  %v2728_v25 = vadd.f32 1e-08, %v2726_v1  ;;  %v4215_v1 = vld [vmem:[%s5252_s20 + $0x18] sm:$0xff] }
 0x76d   : > { %v2730_v30 = vmul.f32 %v4434_v56, %v5906_v36  ;;  %vm2736_vm8 = vweird.f32 %v4434_v56  ;;  %v4393_v36 = vld [vmem:[%s728_s10] ss:$0 sm:$0xff] }
 0x76e   : > { %4435 = vrsqrt.f32 %v2728_v25  ;;  %vm2737_vm3 = vmor %vm2735_vm2, %vm2736_vm8  ;;  %vm2745_vm5 = vweird.f32 %v2728_v25 }
 0x76f   : > { %v2731_v0 = vmul.f32 %v4434_v56, %v2730_v30  ;;  %3404 = vmatpush.bf16.msrb.mxu1 %v4237_v16  ;;  %v2796_v30 = vperm.slane %v5961_v59, 0 }
 0x771   : > { %v2732_v28 = vmul.f32 0.5, %v2731_v0 }
 0x773   : > { %v2733_v61 = vsub.f32 1.5, %v2732_v28  ;;  %3405 = vmatpush.bf16.msrb.mxu1 %v4236_v21 }
 0x774   : > { %v4436_v44 = vpop.eup %4435 }
 0x775   : > { %v2734_v23 = vmul.f32 %v4434_v56, %v2733_v61  ;;  %v2740_v38 = vmul.f32 %v4436_v44, %v2728_v25  ;;  %vm2746_vm4 = vweird.f32 %v4436_v44 }
 0x776   : > { %vm2747_vm6 = vmor %vm2745_vm5, %vm2746_vm4 }
 0x777   : > { %v2741_v6 = vmul.f32 %v4436_v44, %v2740_v38  ;;  %v2738_v7 = vsel %vm2737_vm3, %v4434_v56, %v2734_v23 }
 0x778   : > { %v2749_v18 = vmul.f32 %v2738_v7, %v5853_v9 }
 0x779   : > { %v2742_v52 = vmul.f32 0.5, %v2741_v6 }
 0x77a   : > { %v2754_v35 = vmul.f32 %v4392_v22, %v2749_v18 }
 0x77b   : > { %v2743_v14 = vsub.f32 1.5, %v2742_v52 }
 0x77c   : > { %v2759_v40 = vadd.f32 %v4393_v36, %v2754_v35 }
 0x77d   : > { %v2744_v26 = vmul.f32 %v4436_v44, %v2743_v14 }
 0x77f   : > { %v2748_v29 = vsel %vm2747_vm6, %v4436_v44, %v2744_v26 }
 0x780   : > { %v2750_v32 = vmul.f32 %v2748_v29, %v5859_v19  ;;  %v4219_v19 = vld [vmem:[%s5252_s20 + $0x38] sm:$0xff]  ;;  %v4212_v29 = vld [vmem:[%s5252_s20] sm:$0xff] }
 0x781   : > { %3356 = vmatpush.bf16.msra.mxu2 %v4219_v19 }
 0x782   : > { %v2755_v37 = vmul.f32 %v4392_v22, %v2750_v32  ;;  %v4220_v32 = vld [vmem:[%s5252_s20 + $0x40] sm:$0xff] }
 0x783   : > { %3377 = vmatpush.bf16.msrb.mxu3 %v4220_v32 }
 0x784   : > { %v2760_v9 = vadd.f32 %v4393_v36, %v2755_v37 }
 0x785   : > { %3357 = vmatpush.bf16.msra.mxu2 %v4218_v46 }
 0x786   : > { %v2761_v8 = vpack.c.bf16 %v2760_v9, %v2759_v40 }
 0x788   : > { %2972 = vmatmul.bf16.vlgmr.msrb.gmra.mxu2 %v2761_v8  ;;  %2986 = vmatmul.bf16.vlgmr.msra.gmra.mxu3 %v2761_v8 }
 0x789   : > { %3000 = vmatmul.bf16.vlgmr.msrb.gmra.mxu0 %v2761_v8  ;;  %3014 = vmatmul.bf16.vlgmr.msra.gmra.mxu1 %v2761_v8 }
 0x78a   : > { %3358 = vmatpush.bf16.msra.mxu2 %v4217_v51 }
 0x78e   : > { %3359 = vmatpush.bf16.msra.mxu2 %v4216_v54 }
 0x792   : > { %3360 = vmatpush.bf16.msra.mxu2 %v4215_v1 }
 0x796   : > { %3361 = vmatpush.bf16.msra.mxu2 %v4214_v10 }
 0x79a   : > { %3362 = vmatpush.bf16.msra.mxu2 %v4213_v55 }
 0x79e   : > { %3363 = vmatpush.bf16.msra.mxu2 %v4212_v29 }
 0x806   : > { %v3001_v60 = vpop.f32.mrf.mxu0  ;;  %v3015_v48 = vpop.f32.mrf.mxu1 }
 0x807   : > { %v5971_v56 = vadd.f32 %v3001_v60, %v2798_v50  ;;  %v5973_v25 = vadd.f32 %v3015_v48, %v2799_v34 }
 0x809   : > { %v3030_v33 = vadd.f32 0.044715, %v5971_v56  ;;  %v3046_v20 = vmul.f32 %v5971_v56, %v5971_v56  ;;  %v3031_v0 = vadd.f32 0.044715, %v5973_v25  ;;  %v3047_v2 = vmul.f32 %v5973_v25, %v5973_v25 }
 0x80a   : > { %v3022_v11 = vmul.f32 0.5, %v5971_v56 }
 0x80b   : > { %v2973_v28 = vpop.f32.mrf.mxu2  ;;  %v2987_v61 = vpop.f32.mrf.mxu3  ;;  %v3038_v44 = vmul.f32 0.7978846, %v3030_v33  ;;  %v3054_v23 = vmul.f32 %v3046_v20, %v5971_v56  ;;  %v3039_v7 = vmul.f32 0.7978846, %v3031_v0  ;;  %v3055_v52 = vmul.f32 %v3047_v2, %v5973_v25 }
 0x80c   : > { %v5988_v38 = vadd.f32 %v2973_v28, %v2796_v30  ;;  %v5990_v6 = vadd.f32 %v2987_v61, %v2797_v41 }
 0x80d   : > { %v3062_v37 = vmul.f32 %v3054_v23, %v3038_v44  ;;  %v3063_v43 = vmul.f32 %v3055_v52, %v3039_v7  ;;  %v3023_v44 = vmul.f32 0.5, %v5973_v25 }
 0x80e   : > { %v3028_v14 = vadd.f32 0.044715, %v5988_v38  ;;  %v3044_v18 = vmul.f32 %v5988_v38, %v5988_v38  ;;  %v3003_v22 = vpop.f32.mrf.mxu0  ;;  %v3017_v26 = vpop.f32.mrf.mxu1  ;;  %v3029_v35 = vadd.f32 0.044715, %v5990_v6  ;;  %v3045_v36 = vmul.f32 %v5990_v6, %v5990_v6 }
 0x80f   : > { %v3004_v8 = vadd.f32 %v3003_v22, %v2798_v50  ;;  %v3018_v12 = vadd.f32 %v3017_v26, %v2799_v34  ;;  %4437 = vtanh.f32 %v3062_v37 }
 0x810   : > { %v3036_v40 = vmul.f32 0.7978846, %v3028_v14  ;;  %v3052_v9 = vmul.f32 %v3044_v18, %v5988_v38  ;;  %v3037_v42 = vmul.f32 0.7978846, %v3029_v35  ;;  %v3053_v19 = vmul.f32 %v3045_v36, %v5990_v6 }
 0x811   : > { %v3034_v47 = vadd.f32 0.044715, %v3004_v8  ;;  %v3050_v46 = vmul.f32 %v3004_v8, %v3004_v8  ;;  %v3035_v49 = vadd.f32 0.044715, %v3018_v12  ;;  %v3051_v24 = vmul.f32 %v3018_v12, %v3018_v12 }
 0x812   : > { %v3060_v15 = vmul.f32 %v3052_v9, %v3036_v40  ;;  %v3061_v45 = vmul.f32 %v3053_v19, %v3037_v42  ;;  %4439 = vtanh.f32 %v3063_v43  ;;  %v3026_v28 = vmul.f32 0.5, %v3004_v8 }
 0x813   : > { %v2975_v51 = vpop.f32.mrf.mxu2  ;;  %v2989_v5 = vpop.f32.mrf.mxu3  ;;  %v3042_v31 = vmul.f32 0.7978846, %v3034_v47  ;;  %v3058_v53 = vmul.f32 %v3050_v46, %v3004_v8  ;;  %v3043_v27 = vmul.f32 0.7978846, %v3035_v49  ;;  %v3059_v57 = vmul.f32 %v3051_v24, %v3018_v12 }
 0x814   : > { %v2976_v54 = vadd.f32 %v2975_v51, %v2796_v30  ;;  %v2990_v58 = vadd.f32 %v2989_v5, %v2797_v41  ;;  %4441 = vtanh.f32 %v3060_v15  ;;  %v3027_v23 = vmul.f32 0.5, %v3018_v12 }
 0x815   : > { %v3066_v59 = vmul.f32 %v3058_v53, %v3042_v31  ;;  %4443 = vtanh.f32 %v3061_v45  ;;  %v3067_v50 = vmul.f32 %v3059_v57, %v3043_v27  ;;  %v4438_v39 = vpop.eup %4437  ;;  %v3020_v36 = vmul.f32 0.5, %v5988_v38  ;;  %v4394_v38 = vld [vmem:[%s839_s26] ss:$0 sm:$0xff] }
 0x816   : > { %v3032_v1 = vadd.f32 0.044715, %v2976_v54  ;;  %v3048_v17 = vmul.f32 %v2976_v54, %v2976_v54  ;;  %v3033_v34 = vadd.f32 0.044715, %v2990_v58  ;;  %v3049_v62 = vmul.f32 %v2990_v58, %v2990_v58 }
 0x817   : > { %4445 = vtanh.f32 %v3066_v59  ;;  %v3078_v20 = vadd.f32 1.0, %v4438_v39  ;;  %v3024_v37 = vmul.f32 0.5, %v2976_v54  ;;  %v3021_v9 = vmul.f32 0.5, %v5990_v6 }
 0x818   : > { %v3040_v16 = vmul.f32 0.7978846, %v3032_v1  ;;  %v3056_v60 = vmul.f32 %v3048_v17, %v2976_v54  ;;  %4447 = vtanh.f32 %v3067_v50  ;;  %v3041_v48 = vmul.f32 0.7978846, %v3033_v34  ;;  %v4440_v21 = vpop.eup %4439 }
 0x819   : > { %v3057_v10 = vmul.f32 %v3049_v62, %v2990_v58  ;;  %v3079_v2 = vadd.f32 1.0, %v4440_v21  ;;  %v3086_v52 = vmul.f32 %v3078_v20, %v3022_v11  ;;  %v3025_v8 = vmul.f32 0.5, %v2990_v58 }
 0x81a   : > { %v3064_v63 = vmul.f32 %v3056_v60, %v3040_v16  ;;  %v4442_v33 = vpop.eup %4441 }
 0x81b   : > { %v3065_v30 = vmul.f32 %v3057_v10, %v3041_v48  ;;  %v4444_v41 = vpop.eup %4443  ;;  %v3076_v18 = vadd.f32 1.0, %v4442_v33  ;;  %v3087_v26 = vmul.f32 %v3079_v2, %v3023_v44 }
 0x81c   : > { %4449 = vtanh.f32 %v3064_v63  ;;  %v3077_v32 = vadd.f32 1.0, %v4444_v41 }
 0x81d   : > { %4451 = vtanh.f32 %v3065_v30  ;;  %v4446_v0 = vpop.eup %4445  ;;  %v3084_v42 = vmul.f32 %v3076_v18, %v3020_v36 }
 0x81e   : > { %v4448_v55 = vpop.eup %4447  ;;  %v3082_v61 = vadd.f32 1.0, %v4446_v0  ;;  %v3085_v12 = vmul.f32 %v3077_v32, %v3021_v9 }
 0x81f   : > { %v3083_v7 = vadd.f32 1.0, %v4448_v55 }
 0x820   : > { %v3090_v14 = vmul.f32 %v3082_v61, %v3026_v28 }
 0x821   : > { %v3091_v29 = vmul.f32 %v3083_v7, %v3027_v23 }
 0x822   : > { %v4450_v22 = vpop.eup %4449  ;;  %v3094_v40 = vpack.c.bf16 %v3090_v14, %v3086_v52 }
 0x823   : > { %v4452_v35 = vpop.eup %4451  ;;  %v3080_v56 = vadd.f32 1.0, %v4450_v22  ;;  %v3095_v25 = vpack.c.bf16 %v3091_v29, %v3087_v26 }
 0x824   : > { %v3081_v43 = vadd.f32 1.0, %v4452_v35  ;;  %3392 = vmatmul.bf16.vlgmr.msra.gmra.mxu0 %v3094_v40 }
 0x825   : > { %v3088_v19 = vmul.f32 %v3080_v56, %v3024_v37  ;;  %3406 = vmatmul.bf16.vlgmr.msrb.gmra.mxu1 %v3095_v25 }
 0x826   : > { %v3089_v15 = vmul.f32 %v3081_v43, %v3025_v8 }
 0x827   : > { %v3092_v47 = vpack.c.bf16 %v3088_v19, %v3084_v42 }
 0x828   : > { %v3093_v46 = vpack.c.bf16 %v3089_v15, %v3085_v12 }
 0x829   : > { %3364 = vmatmul.bf16.vlgmr.msra.gmra.mxu2 %v3092_v47 }
 0x82a   : > { %3378 = vmatmul.bf16.vlgmr.msrb.gmra.mxu3 %v3093_v46 }
 0x8a1   : > { %v3393_v24 = vpop.f32.mrf.mxu0 }
 0x8a2   : > { %v3407_v5 = vpop.f32.mrf.mxu1 }
 0x8a9   : > { %v3395_v1 = vpop.f32.mrf.mxu0 }
 0x8aa   : > { %v3409_v50 = vpop.f32.mrf.mxu1 }
 0x8ac   : > { %v3365_v45 = vpop.f32.mrf.mxu2 }
 0x8ad   : > { %v3366_v6 = vadd.f32 %v4394_v38, %v3365_v45  ;;  %v3379_v49 = vpop.f32.mrf.mxu3 }
 0x8af   : > { %v3380_v51 = vadd.f32 %v3379_v49, %v3366_v6 }
 0x8b1   : > { %v3394_v31 = vadd.f32 %v3393_v24, %v3380_v51 }
 0x8b3   : > { %v3408_v53 = vadd.f32 %v3407_v5, %v3394_v31 }
 0x8b4   : > { %v3367_v54 = vpop.f32.mrf.mxu2 }
 0x8b5   : > { %v3412_v27 = vadd.f32 %v3408_v53, %v5845_v3  ;;  %v3368_v57 = vadd.f32 %v4394_v38, %v3367_v54  ;;  %v3381_v58 = vpop.f32.mrf.mxu3 }
 0x8b7   : > { %3414 = vst [vmem:[#allocation2] sm:$0xff] %v3412_v27  ;;  %v3382_v59 = vadd.f32 %v3381_v58, %v3368_v57 }
 0x8b9   : > { %v3396_v17 = vadd.f32 %v3395_v1, %v3382_v59 }
 0x8bb   : > { %v3410_v34 = vadd.f32 %v3409_v50, %v3396_v17  ;;  %3419 = sbr.rel (%p4140_p8) target bundleno = 2517 (0x9d5), region = 132 }
 0x8bd   : > { %v3413_v62 = vadd.f32 %v3410_v34, %v5848_v4 }
 0x8bf   : > { %3415 = vst [vmem:[#allocation2 + $0x8] sm:$0xff] %v3413_v62 }
 0x8c0   : > { %3422 = vadd.xlane.f32.xlu0 %v3412_v27  ;;  %v4456_v36 = vld [vmem:[%s6106_s25] ss:$0 sm:$0xff] }
 0x8c8   : > { %3424 = vadd.xlane.f32.xlu0 %v3413_v62 }
 0x933   : > { %v3423_v16 = vpop.xlane.xlu0 %3422 }
 0x934   : > { %v3426_v60 = vmul.f32 %v3423_v16, %v5256_v13 }
 0x936   : > { %v3428_v3 = vsub.f32 %v3412_v27, %v3426_v60 }
 0x938   : > { %v3430_v48 = vmul.f32 %v3428_v3, %v3428_v3 }
 0x93a   : > { %3432 = vadd.xlane.f32.xlu1 %v3430_v48 }
 0x93b   : > { %v3425_v10 = vpop.xlane.xlu0 %3424 }
 0x93c   : > { %v3427_v39 = vmul.f32 %v3425_v10, %v5256_v13 }
 0x93e   : > { %v3429_v63 = vsub.f32 %v3413_v62, %v3427_v39 }
 0x940   : > { %v3431_v21 = vmul.f32 %v3429_v63, %v3429_v63 }
 0x942   : > { %3434 = vadd.xlane.f32.xlu1 %v3431_v21 }
 0x9ad   : > { %v3433_v30 = vpop.xlane.xlu1 %3432 }
 0x9ae   : > { %v3436_v4 = vmul.f32 %v3433_v30, %v5256_v13 }
 0x9b0   : > { %v3438_v33 = vadd.f32 1e-08, %v3436_v4 }
 0x9b2   : > { %4457 = vrsqrt.f32 %v3438_v33  ;;  %vm3446_vm11 = vweird.f32 %v3438_v33 }
 0x9b5   : > { %v3435_v41 = vpop.xlane.xlu1 %3434 }
 0x9b6   : > { %v3437_v20 = vmul.f32 %v3435_v41, %v5256_v13  ;;  %v4455_v13 = vld [vmem:[%s6105_s17] ss:$0 sm:$0xff] }
 0x9b8   : > { %v4458_v0 = vpop.eup %4457  ;;  %v3439_v2 = vadd.f32 1e-08, %v3437_v20 }
 0x9b9   : > { %v3441_v55 = vmul.f32 %v4458_v0, %v3438_v33  ;;  %vm3447_vm9 = vweird.f32 %v4458_v0 }
 0x9ba   : > { %4459 = vrsqrt.f32 %v3439_v2  ;;  %vm3448_vm12 = vmor %vm3446_vm11, %vm3447_vm9  ;;  %vm3456_vm14 = vweird.f32 %v3439_v2 }
 0x9bb   : > { %v3442_v11 = vmul.f32 %v4458_v0, %v3441_v55 }
 0x9bd   : > { %v3443_v28 = vmul.f32 0.5, %v3442_v11 }
 0x9bf   : > { %v3444_v61 = vsub.f32 1.5, %v3443_v28 }
 0x9c0   : > { %v4460_v44 = vpop.eup %4459 }
 0x9c1   : > { %v3445_v23 = vmul.f32 %v4458_v0, %v3444_v61  ;;  %v3451_v7 = vmul.f32 %v4460_v44, %v3439_v2  ;;  %vm3457_vm13 = vweird.f32 %v4460_v44 }
 0x9c2   : > { %vm3458_vm15 = vmor %vm3456_vm14, %vm3457_vm13 }
 0x9c3   : > { %v3452_v52 = vmul.f32 %v4460_v44, %v3451_v7  ;;  %v3449_v14 = vsel %vm3448_vm12, %v4458_v0, %v3445_v23 }
 0x9c4   : > { %v3460_v26 = vmul.f32 %v3449_v14, %v3428_v3 }
 0x9c5   : > { %v3453_v18 = vmul.f32 0.5, %v3452_v52 }
 0x9c6   : > { %v3465_v35 = vmul.f32 %v4455_v13, %v3460_v26 }
 0x9c7   : > { %v3454_v22 = vsub.f32 1.5, %v3453_v18 }
 0x9c8   : > { %v3470_v56 = vadd.f32 %v4456_v36, %v3465_v35 }
 0x9c9   : > { %v3455_v29 = vmul.f32 %v4460_v44, %v3454_v22 }
 0x9cb   : > { %v3459_v32 = vsel %vm3458_vm15, %v4460_v44, %v3455_v29 }
 0x9cc   : > { %v3461_v37 = vmul.f32 %v3459_v32, %v3429_v63 }
 0x9ce   : > { %v3466_v40 = vmul.f32 %v4455_v13, %v3461_v37 }
 0x9d0   : > { %v3471_v9 = vadd.f32 %v4456_v36, %v3466_v40 }
 0x9d2   : > { %v4247_v8 = vpack.c.bf16 %v3471_v9, %v3470_v56 }
 0x9d4   : > { %4248 = vst [vmem:[#allocation17] sm:$0xff] %v4247_v8  }
 0x9d5 PF: > { %s6107_s0 = sld [smem:[#allocation24_spill]]  ;;  %s4883_s3 = smov [#allocation17]  }
 0x9d6   : > { %s3481_s13 = sshll.u32 %s4883_s3, 4  ;;  %s6108_s30 = sld [smem:[#allocation35_spill]]  ;;  %s3482_s13 = int_to_ptr.vmem [resolvable:$true] %s3481_s13 }
 0x9d7   : > { %s4884_s10 = smov 4  }
 0x9db   : > { %p4322_p9 = scmp.eq.s32.totalorder %s6107_s0, 1 }
 0x9dc   : > { %s3483_s18 = sshll.u32 %s6108_s30, 4  ;;  %s3484_s18 = int_to_ptr.hbm [resolvable:$true] %s3483_s18 }
 0x9dd   : > { %4279 = dma.vmem_to_hbm [thread:$0]  (%p4322_p9), %s3482_s13, 128, %s3484_s18, [#allocation5], %s4880_s19, %s4880_s19, %s4884_s10  }
 0x9de   : > { %4848 = dma.done.wait (%p4322_p9), [#allocation5], 128  }
 0x9df   : > { %4850 = vsyncadd (%p4322_p9), [#allocation5], 4294967168 }
 0x9e0 PF: > { %s6109_s21 = sld [smem:[#allocation25_spill]] }
 0x9e1   : > { %s6110_s18 = sld [smem:[#allocation22_spill]] }
 0x9e2   : > { %s6111_s19 = sld [smem:[#allocation23_spill]] }
 0x9e3   : > { %s6112_s20 = sld [smem:[#allocation26_spill]] }
 0x9e6   : > { %p25_p10 = scmp.ge.s32.totalorder %s6109_s21, 4  }
 0x9e8   :  { %27 = sbr.rel (!%p25_p10) target bundleno = 13 (0xd), region = 226 }
 0x9ed   :  { %3500 = vsyncpa [#allocation4], 1 }
 0x9ee   :  { %3502 = vsyncpa [#allocation4 + $0x1], 1 }
 0x9ef   :  { %3503 = vsyncpa [#allocation7], 1 }
 0x9f0   :  { %3504 = vsyncpa [#allocation5], 1 }
 0x9f1   :  { %3506 = vsyncpa [#allocation5 + $0x1], 1 }

</bundles_post_ra>
